<compile_context>
chip_gen: v7x
topology: tpu7x:2x2x1
jax: 0.10.0
libtpu: 0.0.40
codegen_flags: <defaults>
</compile_context>

<pallas_src>
import functools

import jax
import jax.numpy as jnp
import numpy as np
from jax.experimental import pallas as pl
from jax.experimental.pallas import tpu as pltpu


def _vmem():
    return pl.BlockSpec(memory_space=pltpu.MemorySpace.VMEM)


# ----------------------------------------------------------------------------
# Raw parameters (deterministic, in-script), matching the PyTorch module layout
# ----------------------------------------------------------------------------
def make_flow_params(key, feats_hidden, blocks, flows):
    feats_base = feats_hidden // blocks
    shift = flows // blocks
    convinv, affine, logabsdet = [], [], []
    feats_block = feats_hidden
    for i in range(flows):
        if i % shift == 0 and i > 0:
            feats_block = feats_block - feats_base
        key, k1, k2, k3, k4, k5 = jax.random.split(key, 6)

        # Orthogonal 1x1-conv weight (det forced > 0, WaveGlow-style init)
        a = jax.random.normal(k1, (feats_block, feats_block), jnp.float32)
        q, _ = jnp.linalg.qr(a)
        q = jnp.where(jnp.linalg.det(q) < 0, q.at[:, 0].set(-q[:, 0]), q)
        convinv.append(q)
        logabsdet.append(jnp.linalg.slogdet(q)[1])   # hoisted off the forward

        half = feats_block // 2
        H = feats_hidden
        affine.append({
            # conv1 weights, tap-first (3, out, in), split into x- / cond- parts
            "w1x": 0.05 * jax.random.normal(k2, (3, H, half), jnp.float32),
            "w1c": 0.05 * jax.random.normal(k3, (3, H, feats_hidden), jnp.float32),
            "b1": jnp.zeros((H, 1), jnp.float32),
            # conv2 weights split into log_s rows and shift(t) rows
            "w2s": 0.05 * jax.random.normal(k4, (3, half, H), jnp.float32),
            "b2s": jnp.zeros((half, 1), jnp.float32),
            "w2t": 0.05 * jax.random.normal(k5, (3, half, H), jnp.float32),
            "b2t": jnp.zeros((half, 1), jnp.float32),
        })
    return {"convinv": convinv, "affine": affine, "logabsdet": logabsdet}


# ----------------------------------------------------------------------------
# Pack / pad / merge parameters (done once, outside the kernel):
#   * padded parameterization -> every flow acts on the full (H, lanes) state
#   * 3 conv taps pre-concatenated on the contraction axis (one matmul / layer)
#   * 1x1 conv folded into the layer-1 x-weights (off the critical path)
#   * coupling-net weights cast to bf16 (MXU-native, halves the param DMA)
# ----------------------------------------------------------------------------
def pack_flow_params(params, feats_hidden, blocks, flows):
    H = feats_hidden
    feats_base = H // blocks
    shift = flows // blocks
    hi = jax.lax.Precision.HIGHEST
    wc_l, w1m_l, w1c_l, b1_l, w2m_l, b2_l = [], [], [], [], [], []
    feats_block = H
    for k in range(flows):
        if k % shift == 0 and k > 0:
            feats_block -= feats_base
        dropped = H - feats_block          # channels already emitted to Z
        half = feats_block // 2
        p = params["affine"][k]
        wc = params["convinv"][k]

        # 1x1 conv: identity on already-emitted channels, W on the active block.
        wc_pad = jnp.zeros((H, H), jnp.float32)
        if dropped > 0:
            wc_pad = wc_pad.at[:dropped, :dropped].set(
                jnp.eye(dropped, dtype=jnp.float32))
        wc_pad = wc_pad.at[dropped:, dropped:].set(wc)
        wc_l.append(wc_pad)

        # Layer-1 x-part: only x0 rows contribute; fold the 1x1 conv in and
        # merge the 3 taps on the contraction axis -> (H, 3H).
        w1xf = []
        for t in range(3):
            w1x_pad = jnp.zeros((H, H), jnp.float32)
            w1x_pad = w1x_pad.at[:, dropped:dropped + half].set(p["w1x"][t])
            w1xf.append(jnp.matmul(w1x_pad, wc_pad, precision=hi))
        w1m_l.append(jnp.concatenate(w1xf, axis=1))

        # Conditioning weights merged over taps -> (H, 3F)
        w1c_l.append(jnp.concatenate([p["w1c"][t] for t in range(3)], axis=1))
        b1_l.append(p["b1"])

        # Layer-2 ([log_s ; t] stacked on sublanes), zero outside x1 rows so
        # exp(log_s)=1, t=0 on pass-through / emitted channels; taps merged.
        w2t_l = []
        for t in range(3):
            w2_pad = jnp.zeros((2 * H, H), jnp.float32)
            w2_pad = w2_pad.at[dropped + half:H, :].set(p["w2s"][t])
            w2_pad = w2_pad.at[H + dropped + half:2 * H, :].set(p["w2t"][t])
            w2t_l.append(w2_pad)
        w2m_l.append(jnp.concatenate(w2t_l, axis=1))              # (2H, 3H)

        b2_pad = jnp.zeros((2 * H, 1), jnp.float32)
        b2_pad = b2_pad.at[dropped + half:H].set(p["b2s"])
        b2_pad = b2_pad.at[H + dropped + half:2 * H].set(p["b2t"])
        b2_l.append(b2_pad)

    return {
        "wc": jnp.stack(wc_l),                                   # (flows,H,H) f32
        "w1m": jnp.stack(w1m_l).astype(jnp.bfloat16),            # (flows,H,3H)
        "w1c": jnp.concatenate(w1c_l, 0).astype(jnp.bfloat16),   # (flows*H,3F)
        "b1": jnp.concatenate(b1_l, axis=0),                     # (flows*H,1) f32
        "w2m": jnp.stack(w2m_l).astype(jnp.bfloat16),            # (flows,2H,3H)
        "b2": jnp.stack(b2_l),                                   # (flows,2H,1) f32
        "logabsdet_sum": jnp.sum(jnp.stack(params["logabsdet"])),
    }


# ----------------------------------------------------------------------------
# Flow_aff_conv.forward — one fused Pallas kernel for all flows
# ----------------------------------------------------------------------------
def flow_aff_conv_forward(future_enc, history_enc, packed, *, feats_hidden, flows):
    B, F, K = history_enc.shape
    H = feats_hidden
    BK = B * K
    LANES = max(128, -(-BK // 128) * 128)     # pad lane axis to a 128 multiple
    # z_his = torch.randn(B, F, K) in the original forward is created but unused.

    fe0 = jnp.transpose(future_enc, (1, 0, 2)).reshape(H, BK)    # batch -> lanes
    cond = jnp.transpose(history_enc, (1, 0, 2)).reshape(F, BK)
    fe0 = jnp.pad(fe0, ((0, 0), (0, LANES - BK)))
    cond = jnp.pad(cond, ((0, 0), (0, LANES - BK)))

    # {0,1} lane masks: zero the conv-tap columns at sequence boundaries (and
    # the circular-roll wrap / lane padding), and mark the BK valid lanes.
    lane = jnp.arange(LANES)
    keep_prev = ((lane % K) != 0).astype(jnp.float32).reshape(1, LANES)
    keep_next = ((lane % K) != (K - 1)).astype(jnp.float32).reshape(1, LANES)
    valid = (lane < BK).astype(jnp.float32).reshape(1, LANES)

    def kernel(fe_ref, c_ref, kp_ref, kn_ref, va_ref, wc_ref, w1m_ref,
               w1c_ref, b1_ref, w2m_ref, b2_ref, z_ref, ls_ref, cc_ref):
        f32 = jnp.float32
        bf16 = jnp.bfloat16
        kp = kp_ref[...]                      # keep-mask for the "prev" tap
        kn = kn_ref[...]                      # keep-mask for the "next" tap

        def taps(x):
            # (R, LANES) f32 -> stacked conv taps (3R, LANES) bf16 for the MXU.
            prev = pltpu.roll(x, shift=1, axis=1) * kp
            nxt = pltpu.roll(x, shift=LANES - 1, axis=1) * kn
            return jnp.concatenate([prev, x, nxt], axis=0).astype(bf16)

        # Conditioning contribution + layer-1 bias for ALL flows, computed once
        # (one bf16 matmul) and spilled to VMEM scratch so it is not held in
        # ~32 live vregs across the unrolled flow loop.
        cc_ref[...] = b1_ref[...] + jnp.dot(
            w1c_ref[...], taps(c_ref[...]), preferred_element_type=f32)

        fe = fe_ref[...]                      # padded flow state (H, LANES) f32
        s_sum = jnp.zeros((H, LANES), f32)    # element-wise log_s accumulator
        for k in range(flows):                # static unroll: flows is small
            fe_taps = taps(fe)
            # Invertible 1x1 conv of the state.  Off the critical path (its
            # effect on the coupling net is folded into w1m); f32 so the
            # pass-through / emitted channels stay (near) bit-stable.
            fe_c = jnp.dot(wc_ref[k], fe, preferred_element_type=f32)

            # Coupling conv layer 1 (kernel=3, "same"): ONE merged-tap matmul.
            acc1 = cc_ref[k * H:(k + 1) * H, :] + jnp.dot(
                w1m_ref[k], fe_taps, preferred_element_type=f32)
            h = jnp.maximum(acc1, 0.0)

            # Conv layer 2 -> [log_s ; t] stacked on sublanes: ONE matmul.
            st = b2_ref[k] + jnp.dot(w2m_ref[k], taps(h),
                                     preferred_element_type=f32)
            log_s = st[:H, :]

            # Padded affine: exp(0)*x+0 on pass-through / emitted channels.
            fe = jnp.exp(log_s) * fe_c + st[H:, :]
            s_sum = s_sum + log_s

        z_ref[...] = fe                       # padded state == Z (emitted order)
        # padding lanes carry garbage log_s -> mask before the reduction
        ls_ref[...] = jnp.sum(jnp.sum(s_sum * va_ref[...], axis=-1,
                                      keepdims=True), axis=0, keepdims=True)

    args = (fe0, cond, keep_prev, keep_next, valid,
            packed["wc"], packed["w1m"], packed["w1c"], packed["b1"],
            packed["w2m"], packed["b2"])
    bytes_accessed = (sum(int(np.prod(a.shape)) * a.dtype.itemsize for a in args)
                      + H * LANES * 4 + 4)
    flops = 2 * LANES * (flows * (H * 3 * H + 2 * H * 3 * H + H * H)
                         + (flows * H) * (3 * F))

    z_pad, ls = pl.pallas_call(
        kernel,
        out_shape=(jax.ShapeDtypeStruct((H, LANES), jnp.float32),
                   jax.ShapeDtypeStruct((1, 1), jnp.float32)),
        in_specs=[_vmem()] * len(args),
        out_specs=(_vmem(), _vmem()),
        scratch_shapes=[pltpu.VMEM((flows * H, LANES), jnp.float32)],
        cost_estimate=pl.CostEstimate(flops=int(flops),
                                      transcendentals=int(flows * H * LANES),
                                      bytes_accessed=int(bytes_accessed)),
    )(*args)

    Z = jnp.transpose(z_pad[:, :BK].reshape(H, B, K), (1, 0, 2))
    log_det = jnp.reshape(ls[0, 0] + BK * packed["logabsdet_sum"], (1,))
    return Z, log_det


# ----------------------------------------------------------------------------
# Pure-JAX reference (lax.conv, HIGHEST precision) for a correctness check
# ----------------------------------------------------------------------------
def _ref_conv1d(x, w_oiw, b):
    out = jax.lax.conv_general_dilated(
        x, w_oiw, window_strides=(1,), padding=((1, 1),),
        dimension_numbers=("NCH", "OIH", "NCH"),
        precision=jax.lax.Precision.HIGHEST)
    return out + b.reshape(1, -1, 1)


def _ref_forward(future_enc, history_enc, params, feats_hidden, blocks, flows):
    feats_base = feats_hidden // blocks
    shift = flows // blocks
    B, Fh, K = history_enc.shape
    log_det = jnp.zeros((1,), jnp.float32)
    output_z = []
    fe = future_enc
    for k in range(flows):
        if k % shift == 0 and k > 0:
            output_z.append(fe[:, :feats_base, :])
            fe = fe[:, feats_base:, :]
        w = params["convinv"][k]
        fe = jnp.einsum("ij,bjk->bik", w, fe, precision=jax.lax.Precision.HIGHEST)
        _, logabsdet = jnp.linalg.slogdet(w)
        p = params["affine"][k]
        half = p["w2s"].shape[1]
        x0, x1 = fe[:, :half, :], fe[:, half:, :]
        w1 = jnp.concatenate([jnp.transpose(p["w1x"], (1, 2, 0)),
                              jnp.transpose(p["w1c"], (1, 2, 0))], axis=1)
        h = jnp.maximum(_ref_conv1d(jnp.concatenate([x0, history_enc], axis=1),
                                    w1, p["b1"][:, 0]), 0.0)
        w2 = jnp.concatenate([jnp.transpose(p["w2s"], (1, 2, 0)),
                              jnp.transpose(p["w2t"], (1, 2, 0))], axis=0)
        out = _ref_conv1d(h, w2, jnp.concatenate([p["b2s"][:, 0], p["b2t"][:, 0]]))
        log_s, tt = out[:, :half, :], out[:, half:, :]
        fe = jnp.concatenate([x0, jnp.exp(log_s) * x1 + tt], axis=1)
        log_det = log_det + (jnp.sum(log_s) + (B * K) * logabsdet)
    output_z.append(fe)
    return jnp.concatenate(output_z, axis=1), log_det


if __name__ == "__main__":
    # args: feats_hidden=32, blocks=4, flows=8, K=8 -> feats_base=8, shift=2
    feats_hidden, blocks, flows, K, B = 32, 4, 8, 8, 2
    key = jax.random.PRNGKey(0)
    k_p, k_f, k_h = jax.random.split(key, 3)
    params = make_flow_params(k_p, feats_hidden, blocks, flows)
    packed = pack_flow_params(params, feats_hidden, blocks, flows)
    future_enc = jax.random.normal(k_f, (B, feats_hidden, K), jnp.float32)
    history_enc = jax.random.normal(k_h, (B, feats_hidden, K), jnp.float32)

    fwd = jax.jit(functools.partial(flow_aff_conv_forward,
                                    feats_hidden=feats_hidden, flows=flows))
    Z, log_det = fwd(future_enc, history_enc, packed)
    jax.block_until_ready((Z, log_det))

    assert Z.shape == (B, feats_hidden, K)
    assert log_det.shape == (1,)

    Z_ref, log_det_ref = _ref_forward(future_enc, history_enc, params,
                                      feats_hidden, blocks, flows)
    # bf16 MXU operands in the coupling net (f32 accumulation / f32 state path)
    # vs a HIGHEST-precision f32 reference -> a few-percent tolerance on Z and
    # a small absolute slack on the ~1.3k-term log_s sum.
    np.testing.assert_allclose(np.asarray(Z), np.asarray(Z_ref),
                               rtol=3e-2, atol=3e-2)
    np.testing.assert_allclose(np.asarray(log_det), np.asarray(log_det_ref),
                               rtol=3e-2, atol=2e-1)
    print("KERNEL_OK")
</pallas_src>

<mosaic_0001>
module attributes {stable_mosaic.version = 11 : i64} {
  func.func @kernel(%arg0: memref<32x128xf32, #tpu.memory_space<vmem>>, %arg1: memref<32x128xf32, #tpu.memory_space<vmem>>, %arg2: memref<1x128xf32, #tpu.memory_space<vmem>>, %arg3: memref<1x128xf32, #tpu.memory_space<vmem>>, %arg4: memref<1x128xf32, #tpu.memory_space<vmem>>, %arg5: memref<8x32x32xf32, #tpu.memory_space<vmem>>, %arg6: memref<8x32x96xbf16, #tpu.memory_space<vmem>>, %arg7: memref<256x96xbf16, #tpu.memory_space<vmem>>, %arg8: memref<256x1xf32, #tpu.memory_space<vmem>>, %arg9: memref<8x64x96xbf16, #tpu.memory_space<vmem>>, %arg10: memref<8x64x1xf32, #tpu.memory_space<vmem>>, %arg11: memref<32x128xf32, #tpu.memory_space<vmem>>, %arg12: memref<1x1xf32, #tpu.memory_space<vmem>>, %arg13: memref<256x128xf32, #tpu.memory_space<vmem>>) attributes {dimension_semantics = [], scalar_prefetch = 0 : i64, scratch_operands = 1 : i64, tpu.core_type = #tpu.core_type<tc>} {
    %c0 = arith.constant 0 : index
    %c0_0 = arith.constant 0 : index
    %0 = vector.load %arg2[%c0, %c0_0] : memref<1x128xf32, #tpu.memory_space<vmem>>, vector<1x128xf32>
    %c0_1 = arith.constant 0 : index
    %c0_2 = arith.constant 0 : index
    %1 = vector.load %arg3[%c0_1, %c0_2] : memref<1x128xf32, #tpu.memory_space<vmem>>, vector<1x128xf32>
    %c0_3 = arith.constant 0 : index
    %c0_4 = arith.constant 0 : index
    %2 = vector.load %arg8[%c0_3, %c0_4] : memref<256x1xf32, #tpu.memory_space<vmem>>, vector<256x1xf32>
    %c0_5 = arith.constant 0 : index
    %c0_6 = arith.constant 0 : index
    %3 = vector.load %arg7[%c0_5, %c0_6] : memref<256x96xbf16, #tpu.memory_space<vmem>>, vector<256x96xbf16>
    %c0_7 = arith.constant 0 : index
    %c0_8 = arith.constant 0 : index
    %4 = vector.load %arg1[%c0_7, %c0_8] : memref<32x128xf32, #tpu.memory_space<vmem>>, vector<32x128xf32>
    %c1_i32 = arith.constant 1 : i32
    %5 = tpu.dynamic_rotate %4 by %c1_i32 dim 1 : vector<32x128xf32>, i32 -> vector<32x128xf32>
    %6 = vector.broadcast %0 : vector<1x128xf32> to vector<32x128xf32>
    %7 = arith.mulf %5, %6 : vector<32x128xf32>
    %c127_i32 = arith.constant 127 : i32
    %8 = tpu.dynamic_rotate %4 by %c127_i32 dim 1 : vector<32x128xf32>, i32 -> vector<32x128xf32>
    %9 = vector.broadcast %1 : vector<1x128xf32> to vector<32x128xf32>
    %10 = arith.mulf %8, %9 : vector<32x128xf32>
    %11 = tpu.concatenate %7, %4, %10 in 0 : vector<32x128xf32>, vector<32x128xf32>, vector<32x128xf32> -> vector<96x128xf32>
    %12 = arith.truncf %11 : vector<96x128xf32> to vector<96x128xbf16>
    %cst = arith.constant dense<0.000000e+00> : vector<256x128xf32>
    %13 = tpu.matmul %3, %12, %cst {dimension_numbers = #tpu.dot_dimension_numbers<[1], [0], [0], [1], [0, 0, 1, 1], [], []>} : vector<256x96xbf16>, vector<96x128xbf16>, vector<256x128xf32> -> vector<256x128xf32>
    %14 = vector.broadcast %2 : vector<256x1xf32> to vector<256x128xf32>
    %15 = arith.addf %14, %13 : vector<256x128xf32>
    %c0_9 = arith.constant 0 : index
    %c0_10 = arith.constant 0 : index
    %16 = vector.load %arg13[%c0_9, %c0_10] : memref<256x128xf32, #tpu.memory_space<vmem>>, vector<256x128xf32>
    tpu.vector_store %arg13[%c0_9, %c0_10], %15 {strides = array<i32>} : memref<256x128xf32, #tpu.memory_space<vmem>>, vector<256x128xf32>,
    %c0_11 = arith.constant 0 : index
    %c0_12 = arith.constant 0 : index
    %17 = vector.load %arg0[%c0_11, %c0_12] : memref<32x128xf32, #tpu.memory_space<vmem>>, vector<32x128xf32>
    %cst_13 = arith.constant 0.000000e+00 : f32
    %18 = vector.broadcast %cst_13 : f32 to vector<32x128xf32>
    %c1_i32_14 = arith.constant 1 : i32
    %19 = tpu.dynamic_rotate %17 by %c1_i32_14 dim 1 : vector<32x128xf32>, i32 -> vector<32x128xf32>
    %20 = vector.broadcast %0 : vector<1x128xf32> to vector<32x128xf32>
    %21 = arith.mulf %19, %20 : vector<32x128xf32>
    %c127_i32_15 = arith.constant 127 : i32
    %22 = tpu.dynamic_rotate %17 by %c127_i32_15 dim 1 : vector<32x128xf32>, i32 -> vector<32x128xf32>
    %23 = vector.broadcast %1 : vector<1x128xf32> to vector<32x128xf32>
    %24 = arith.mulf %22, %23 : vector<32x128xf32>
    %25 = tpu.concatenate %21, %17, %24 in 0 : vector<32x128xf32>, vector<32x128xf32>, vector<32x128xf32> -> vector<96x128xf32>
    %26 = arith.truncf %25 : vector<96x128xf32> to vector<96x128xbf16>
    %c0_16 = arith.constant 0 : index
    %c0_17 = arith.constant 0 : index
    %c0_18 = arith.constant 0 : index
    %27 = vector.load %arg5[%c0_16, %c0_17, %c0_18] : memref<8x32x32xf32, #tpu.memory_space<vmem>>, vector<1x32x32xf32>
    %28 = vector.shape_cast %27 : vector<1x32x32xf32> to vector<32x32xf32>
    %cst_19 = arith.constant dense<0.000000e+00> : vector<32x128xf32>
    %29 = tpu.matmul %28, %17, %cst_19 {dimension_numbers = #tpu.dot_dimension_numbers<[1], [0], [0], [1], [0, 0, 1, 1], [], []>} : vector<32x32xf32>, vector<32x128xf32>, vector<32x128xf32> -> vector<32x128xf32>
    %c0_20 = arith.constant 0 : index
    %c0_21 = arith.constant 0 : index
    %30 = vector.load %arg13[%c0_20, %c0_21] : memref<256x128xf32, #tpu.memory_space<vmem>>, vector<32x128xf32>
    %c0_22 = arith.constant 0 : index
    %c0_23 = arith.constant 0 : index
    %c0_24 = arith.constant 0 : index
    %31 = vector.load %arg6[%c0_22, %c0_23, %c0_24] : memref<8x32x96xbf16, #tpu.memory_space<vmem>>, vector<1x32x96xbf16>
    %32 = vector.shape_cast %31 : vector<1x32x96xbf16> to vector<32x96xbf16>
    %cst_25 = arith.constant dense<0.000000e+00> : vector<32x128xf32>
    %33 = tpu.matmul %32, %26, %cst_25 {dimension_numbers = #tpu.dot_dimension_numbers<[1], [0], [0], [1], [0, 0, 1, 1], [], []>} : vector<32x96xbf16>, vector<96x128xbf16>, vector<32x128xf32> -> vector<32x128xf32>
    %34 = arith.addf %30, %33 : vector<32x128xf32>
    %cst_26 = arith.constant 0.000000e+00 : f32
    %35 = vector.broadcast %cst_26 : f32 to vector<32x128xf32>
    %36 = arith.maximumf %34, %35 : vector<32x128xf32>
    %c0_27 = arith.constant 0 : index
    %c0_28 = arith.constant 0 : index
    %c0_29 = arith.constant 0 : index
    %37 = vector.load %arg10[%c0_27, %c0_28, %c0_29] : memref<8x64x1xf32, #tpu.memory_space<vmem>>, vector<1x64x1xf32>
    %38 = vector.shape_cast %37 : vector<1x64x1xf32> to vector<64x1xf32>
    %c0_30 = arith.constant 0 : index
    %c0_31 = arith.constant 0 : index
    %c0_32 = arith.constant 0 : index
    %39 = vector.load %arg9[%c0_30, %c0_31, %c0_32] : memref<8x64x96xbf16, #tpu.memory_space<vmem>>, vector<1x64x96xbf16>
    %40 = vector.shape_cast %39 : vector<1x64x96xbf16> to vector<64x96xbf16>
    %c1_i32_33 = arith.constant 1 : i32
    %41 = tpu.dynamic_rotate %36 by %c1_i32_33 dim 1 : vector<32x128xf32>, i32 -> vector<32x128xf32>
    %42 = vector.broadcast %0 : vector<1x128xf32> to vector<32x128xf32>
    %43 = arith.mulf %41, %42 : vector<32x128xf32>
    %c127_i32_34 = arith.constant 127 : i32
    %44 = tpu.dynamic_rotate %36 by %c127_i32_34 dim 1 : vector<32x128xf32>, i32 -> vector<32x128xf32>
    %45 = vector.broadcast %1 : vector<1x128xf32> to vector<32x128xf32>
    %46 = arith.mulf %44, %45 : vector<32x128xf32>
    %47 = tpu.concatenate %43, %36, %46 in 0 : vector<32x128xf32>, vector<32x128xf32>, vector<32x128xf32> -> vector<96x128xf32>
    %48 = arith.truncf %47 : vector<96x128xf32> to vector<96x128xbf16>
    %cst_35 = arith.constant dense<0.000000e+00> : vector<64x128xf32>
    %49 = tpu.matmul %40, %48, %cst_35 {dimension_numbers = #tpu.dot_dimension_numbers<[1], [0], [0], [1], [0, 0, 1, 1], [], []>} : vector<64x96xbf16>, vector<96x128xbf16>, vector<64x128xf32> -> vector<64x128xf32>
    %50 = vector.broadcast %38 : vector<64x1xf32> to vector<64x128xf32>
    %51 = arith.addf %50, %49 : vector<64x128xf32>
    %52 = vector.extract_strided_slice %51 {offsets = [0, 0], sizes = [32, 128], strides = [1, 1]} : vector<64x128xf32> to vector<32x128xf32>
    %53 = math.exp %52 : vector<32x128xf32>
    %54 = arith.mulf %53, %29 : vector<32x128xf32>
    %55 = vector.extract_strided_slice %51 {offsets = [32, 0], sizes = [32, 128], strides = [1, 1]} : vector<64x128xf32> to vector<32x128xf32>
    %56 = arith.addf %54, %55 : vector<32x128xf32>
    %57 = arith.addf %18, %52 : vector<32x128xf32>
    %c1_i32_36 = arith.constant 1 : i32
    %58 = tpu.dynamic_rotate %56 by %c1_i32_36 dim 1 : vector<32x128xf32>, i32 -> vector<32x128xf32>
    %59 = vector.broadcast %0 : vector<1x128xf32> to vector<32x128xf32>
    %60 = arith.mulf %58, %59 : vector<32x128xf32>
    %c127_i32_37 = arith.constant 127 : i32
    %61 = tpu.dynamic_rotate %56 by %c127_i32_37 dim 1 : vector<32x128xf32>, i32 -> vector<32x128xf32>
    %62 = vector.broadcast %1 : vector<1x128xf32> to vector<32x128xf32>
    %63 = arith.mulf %61, %62 : vector<32x128xf32>
    %64 = tpu.concatenate %60, %56, %63 in 0 : vector<32x128xf32>, vector<32x128xf32>, vector<32x128xf32> -> vector<96x128xf32>
    %65 = arith.truncf %64 : vector<96x128xf32> to vector<96x128xbf16>
    %c1 = arith.constant 1 : index
    %c0_38 = arith.constant 0 : index
    %c0_39 = arith.constant 0 : index
    %66 = vector.load %arg5[%c1, %c0_38, %c0_39] : memref<8x32x32xf32, #tpu.memory_space<vmem>>, vector<1x32x32xf32>
    %67 = vector.shape_cast %66 : vector<1x32x32xf32> to vector<32x32xf32>
    %cst_40 = arith.constant dense<0.000000e+00> : vector<32x128xf32>
    %68 = tpu.matmul %67, %56, %cst_40 {dimension_numbers = #tpu.dot_dimension_numbers<[1], [0], [0], [1], [0, 0, 1, 1], [], []>} : vector<32x32xf32>, vector<32x128xf32>, vector<32x128xf32> -> vector<32x128xf32>
    %c32 = arith.constant 32 : index
    %c0_41 = arith.constant 0 : index
    %69 = vector.load %arg13[%c32, %c0_41] : memref<256x128xf32, #tpu.memory_space<vmem>>, vector<32x128xf32>
    %c1_42 = arith.constant 1 : index
    %c0_43 = arith.constant 0 : index
    %c0_44 = arith.constant 0 : index
    %70 = vector.load %arg6[%c1_42, %c0_43, %c0_44] : memref<8x32x96xbf16, #tpu.memory_space<vmem>>, vector<1x32x96xbf16>
    %71 = vector.shape_cast %70 : vector<1x32x96xbf16> to vector<32x96xbf16>
    %cst_45 = arith.constant dense<0.000000e+00> : vector<32x128xf32>
    %72 = tpu.matmul %71, %65, %cst_45 {dimension_numbers = #tpu.dot_dimension_numbers<[1], [0], [0], [1], [0, 0, 1, 1], [], []>} : vector<32x96xbf16>, vector<96x128xbf16>, vector<32x128xf32> -> vector<32x128xf32>
    %73 = arith.addf %69, %72 : vector<32x128xf32>
    %cst_46 = arith.constant 0.000000e+00 : f32
    %74 = vector.broadcast %cst_46 : f32 to vector<32x128xf32>
    %75 = arith.maximumf %73, %74 : vector<32x128xf32>
    %c1_47 = arith.constant 1 : index
    %c0_48 = arith.constant 0 : index
    %c0_49 = arith.constant 0 : index
    %76 = vector.load %arg10[%c1_47, %c0_48, %c0_49] : memref<8x64x1xf32, #tpu.memory_space<vmem>>, vector<1x64x1xf32>
    %77 = vector.shape_cast %76 : vector<1x64x1xf32> to vector<64x1xf32>
    %c1_50 = arith.constant 1 : index
    %c0_51 = arith.constant 0 : index
    %c0_52 = arith.constant 0 : index
    %78 = vector.load %arg9[%c1_50, %c0_51, %c0_52] : memref<8x64x96xbf16, #tpu.memory_space<vmem>>, vector<1x64x96xbf16>
    %79 = vector.shape_cast %78 : vector<1x64x96xbf16> to vector<64x96xbf16>
    %c1_i32_53 = arith.constant 1 : i32
    %80 = tpu.dynamic_rotate %75 by %c1_i32_53 dim 1 : vector<32x128xf32>, i32 -> vector<32x128xf32>
    %81 = vector.broadcast %0 : vector<1x128xf32> to vector<32x128xf32>
    %82 = arith.mulf %80, %81 : vector<32x128xf32>
    %c127_i32_54 = arith.constant 127 : i32
    %83 = tpu.dynamic_rotate %75 by %c127_i32_54 dim 1 : vector<32x128xf32>, i32 -> vector<32x128xf32>
    %84 = vector.broadcast %1 : vector<1x128xf32> to vector<32x128xf32>
    %85 = arith.mulf %83, %84 : vector<32x128xf32>
    %86 = tpu.concatenate %82, %75, %85 in 0 : vector<32x128xf32>, vector<32x128xf32>, vector<32x128xf32> -> vector<96x128xf32>
    %87 = arith.truncf %86 : vector<96x128xf32> to vector<96x128xbf16>
    %cst_55 = arith.constant dense<0.000000e+00> : vector<64x128xf32>
    %88 = tpu.matmul %79, %87, %cst_55 {dimension_numbers = #tpu.dot_dimension_numbers<[1], [0], [0], [1], [0, 0, 1, 1], [], []>} : vector<64x96xbf16>, vector<96x128xbf16>, vector<64x128xf32> -> vector<64x128xf32>
    %89 = vector.broadcast %77 : vector<64x1xf32> to vector<64x128xf32>
    %90 = arith.addf %89, %88 : vector<64x128xf32>
    %91 = vector.extract_strided_slice %90 {offsets = [0, 0], sizes = [32, 128], strides = [1, 1]} : vector<64x128xf32> to vector<32x128xf32>
    %92 = math.exp %91 : vector<32x128xf32>
    %93 = arith.mulf %92, %68 : vector<32x128xf32>
    %94 = vector.extract_strided_slice %90 {offsets = [32, 0], sizes = [32, 128], strides = [1, 1]} : vector<64x128xf32> to vector<32x128xf32>
    %95 = arith.addf %93, %94 : vector<32x128xf32>
    %96 = arith.addf %57, %91 : vector<32x128xf32>
    %c1_i32_56 = arith.constant 1 : i32
    %97 = tpu.dynamic_rotate %95 by %c1_i32_56 dim 1 : vector<32x128xf32>, i32 -> vector<32x128xf32>
    %98 = vector.broadcast %0 : vector<1x128xf32> to vector<32x128xf32>
    %99 = arith.mulf %97, %98 : vector<32x128xf32>
    %c127_i32_57 = arith.constant 127 : i32
    %100 = tpu.dynamic_rotate %95 by %c127_i32_57 dim 1 : vector<32x128xf32>, i32 -> vector<32x128xf32>
    %101 = vector.broadcast %1 : vector<1x128xf32> to vector<32x128xf32>
    %102 = arith.mulf %100, %101 : vector<32x128xf32>
    %103 = tpu.concatenate %99, %95, %102 in 0 : vector<32x128xf32>, vector<32x128xf32>, vector<32x128xf32> -> vector<96x128xf32>
    %104 = arith.truncf %103 : vector<96x128xf32> to vector<96x128xbf16>
    %c2 = arith.constant 2 : index
    %c0_58 = arith.constant 0 : index
    %c0_59 = arith.constant 0 : index
    %105 = vector.load %arg5[%c2, %c0_58, %c0_59] : memref<8x32x32xf32, #tpu.memory_space<vmem>>, vector<1x32x32xf32>
    %106 = vector.shape_cast %105 : vector<1x32x32xf32> to vector<32x32xf32>
    %cst_60 = arith.constant dense<0.000000e+00> : vector<32x128xf32>
    %107 = tpu.matmul %106, %95, %cst_60 {dimension_numbers = #tpu.dot_dimension_numbers<[1], [0], [0], [1], [0, 0, 1, 1], [], []>} : vector<32x32xf32>, vector<32x128xf32>, vector<32x128xf32> -> vector<32x128xf32>
    %c64 = arith.constant 64 : index
    %c0_61 = arith.constant 0 : index
    %108 = vector.load %arg13[%c64, %c0_61] : memref<256x128xf32, #tpu.memory_space<vmem>>, vector<32x128xf32>
    %c2_62 = arith.constant 2 : index
    %c0_63 = arith.constant 0 : index
    %c0_64 = arith.constant 0 : index
    %109 = vector.load %arg6[%c2_62, %c0_63, %c0_64] : memref<8x32x96xbf16, #tpu.memory_space<vmem>>, vector<1x32x96xbf16>
    %110 = vector.shape_cast %109 : vector<1x32x96xbf16> to vector<32x96xbf16>
    %cst_65 = arith.constant dense<0.000000e+00> : vector<32x128xf32>
    %111 = tpu.matmul %110, %104, %cst_65 {dimension_numbers = #tpu.dot_dimension_numbers<[1], [0], [0], [1], [0, 0, 1, 1], [], []>} : vector<32x96xbf16>, vector<96x128xbf16>, vector<32x128xf32> -> vector<32x128xf32>
    %112 = arith.addf %108, %111 : vector<32x128xf32>
    %cst_66 = arith.constant 0.000000e+00 : f32
    %113 = vector.broadcast %cst_66 : f32 to vector<32x128xf32>
    %114 = arith.maximumf %112, %113 : vector<32x128xf32>
    %c2_67 = arith.constant 2 : index
    %c0_68 = arith.constant 0 : index
    %c0_69 = arith.constant 0 : index
    %115 = vector.load %arg10[%c2_67, %c0_68, %c0_69] : memref<8x64x1xf32, #tpu.memory_space<vmem>>, vector<1x64x1xf32>
    %116 = vector.shape_cast %115 : vector<1x64x1xf32> to vector<64x1xf32>
    %c2_70 = arith.constant 2 : index
    %c0_71 = arith.constant 0 : index
    %c0_72 = arith.constant 0 : index
    %117 = vector.load %arg9[%c2_70, %c0_71, %c0_72] : memref<8x64x96xbf16, #tpu.memory_space<vmem>>, vector<1x64x96xbf16>
    %118 = vector.shape_cast %117 : vector<1x64x96xbf16> to vector<64x96xbf16>
    %c1_i32_73 = arith.constant 1 : i32
    %119 = tpu.dynamic_rotate %114 by %c1_i32_73 dim 1 : vector<32x128xf32>, i32 -> vector<32x128xf32>
    %120 = vector.broadcast %0 : vector<1x128xf32> to vector<32x128xf32>
    %121 = arith.mulf %119, %120 : vector<32x128xf32>
    %c127_i32_74 = arith.constant 127 : i32
    %122 = tpu.dynamic_rotate %114 by %c127_i32_74 dim 1 : vector<32x128xf32>, i32 -> vector<32x128xf32>
    %123 = vector.broadcast %1 : vector<1x128xf32> to vector<32x128xf32>
    %124 = arith.mulf %122, %123 : vector<32x128xf32>
    %125 = tpu.concatenate %121, %114, %124 in 0 : vector<32x128xf32>, vector<32x128xf32>, vector<32x128xf32> -> vector<96x128xf32>
    %126 = arith.truncf %125 : vector<96x128xf32> to vector<96x128xbf16>
    %cst_75 = arith.constant dense<0.000000e+00> : vector<64x128xf32>
    %127 = tpu.matmul %118, %126, %cst_75 {dimension_numbers = #tpu.dot_dimension_numbers<[1], [0], [0], [1], [0, 0, 1, 1], [], []>} : vector<64x96xbf16>, vector<96x128xbf16>, vector<64x128xf32> -> vector<64x128xf32>
    %128 = vector.broadcast %116 : vector<64x1xf32> to vector<64x128xf32>
    %129 = arith.addf %128, %127 : vector<64x128xf32>
    %130 = vector.extract_strided_slice %129 {offsets = [0, 0], sizes = [32, 128], strides = [1, 1]} : vector<64x128xf32> to vector<32x128xf32>
    %131 = math.exp %130 : vector<32x128xf32>
    %132 = arith.mulf %131, %107 : vector<32x128xf32>
    %133 = vector.extract_strided_slice %129 {offsets = [32, 0], sizes = [32, 128], strides = [1, 1]} : vector<64x128xf32> to vector<32x128xf32>
    %134 = arith.addf %132, %133 : vector<32x128xf32>
    %135 = arith.addf %96, %130 : vector<32x128xf32>
    %c1_i32_76 = arith.constant 1 : i32
    %136 = tpu.dynamic_rotate %134 by %c1_i32_76 dim 1 : vector<32x128xf32>, i32 -> vector<32x128xf32>
    %137 = vector.broadcast %0 : vector<1x128xf32> to vector<32x128xf32>
    %138 = arith.mulf %136, %137 : vector<32x128xf32>
    %c127_i32_77 = arith.constant 127 : i32
    %139 = tpu.dynamic_rotate %134 by %c127_i32_77 dim 1 : vector<32x128xf32>, i32 -> vector<32x128xf32>
    %140 = vector.broadcast %1 : vector<1x128xf32> to vector<32x128xf32>
    %141 = arith.mulf %139, %140 : vector<32x128xf32>
    %142 = tpu.concatenate %138, %134, %141 in 0 : vector<32x128xf32>, vector<32x128xf32>, vector<32x128xf32> -> vector<96x128xf32>
    %143 = arith.truncf %142 : vector<96x128xf32> to vector<96x128xbf16>
    %c3 = arith.constant 3 : index
    %c0_78 = arith.constant 0 : index
    %c0_79 = arith.constant 0 : index
    %144 = vector.load %arg5[%c3, %c0_78, %c0_79] : memref<8x32x32xf32, #tpu.memory_space<vmem>>, vector<1x32x32xf32>
    %145 = vector.shape_cast %144 : vector<1x32x32xf32> to vector<32x32xf32>
    %cst_80 = arith.constant dense<0.000000e+00> : vector<32x128xf32>
    %146 = tpu.matmul %145, %134, %cst_80 {dimension_numbers = #tpu.dot_dimension_numbers<[1], [0], [0], [1], [0, 0, 1, 1], [], []>} : vector<32x32xf32>, vector<32x128xf32>, vector<32x128xf32> -> vector<32x128xf32>
    %c96 = arith.constant 96 : index
    %c0_81 = arith.constant 0 : index
    %147 = vector.load %arg13[%c96, %c0_81] : memref<256x128xf32, #tpu.memory_space<vmem>>, vector<32x128xf32>
    %c3_82 = arith.constant 3 : index
    %c0_83 = arith.constant 0 : index
    %c0_84 = arith.constant 0 : index
    %148 = vector.load %arg6[%c3_82, %c0_83, %c0_84] : memref<8x32x96xbf16, #tpu.memory_space<vmem>>, vector<1x32x96xbf16>
    %149 = vector.shape_cast %148 : vector<1x32x96xbf16> to vector<32x96xbf16>
    %cst_85 = arith.constant dense<0.000000e+00> : vector<32x128xf32>
    %150 = tpu.matmul %149, %143, %cst_85 {dimension_numbers = #tpu.dot_dimension_numbers<[1], [0], [0], [1], [0, 0, 1, 1], [], []>} : vector<32x96xbf16>, vector<96x128xbf16>, vector<32x128xf32> -> vector<32x128xf32>
    %151 = arith.addf %147, %150 : vector<32x128xf32>
    %cst_86 = arith.constant 0.000000e+00 : f32
    %152 = vector.broadcast %cst_86 : f32 to vector<32x128xf32>
    %153 = arith.maximumf %151, %152 : vector<32x128xf32>
    %c3_87 = arith.constant 3 : index
    %c0_88 = arith.constant 0 : index
    %c0_89 = arith.constant 0 : index
    %154 = vector.load %arg10[%c3_87, %c0_88, %c0_89] : memref<8x64x1xf32, #tpu.memory_space<vmem>>, vector<1x64x1xf32>
    %155 = vector.shape_cast %154 : vector<1x64x1xf32> to vector<64x1xf32>
    %c3_90 = arith.constant 3 : index
    %c0_91 = arith.constant 0 : index
    %c0_92 = arith.constant 0 : index
    %156 = vector.load %arg9[%c3_90, %c0_91, %c0_92] : memref<8x64x96xbf16, #tpu.memory_space<vmem>>, vector<1x64x96xbf16>
    %157 = vector.shape_cast %156 : vector<1x64x96xbf16> to vector<64x96xbf16>
    %c1_i32_93 = arith.constant 1 : i32
    %158 = tpu.dynamic_rotate %153 by %c1_i32_93 dim 1 : vector<32x128xf32>, i32 -> vector<32x128xf32>
    %159 = vector.broadcast %0 : vector<1x128xf32> to vector<32x128xf32>
    %160 = arith.mulf %158, %159 : vector<32x128xf32>
    %c127_i32_94 = arith.constant 127 : i32
    %161 = tpu.dynamic_rotate %153 by %c127_i32_94 dim 1 : vector<32x128xf32>, i32 -> vector<32x128xf32>
    %162 = vector.broadcast %1 : vector<1x128xf32> to vector<32x128xf32>
    %163 = arith.mulf %161, %162 : vector<32x128xf32>
    %164 = tpu.concatenate %160, %153, %163 in 0 : vector<32x128xf32>, vector<32x128xf32>, vector<32x128xf32> -> vector<96x128xf32>
    %165 = arith.truncf %164 : vector<96x128xf32> to vector<96x128xbf16>
    %cst_95 = arith.constant dense<0.000000e+00> : vector<64x128xf32>
    %166 = tpu.matmul %157, %165, %cst_95 {dimension_numbers = #tpu.dot_dimension_numbers<[1], [0], [0], [1], [0, 0, 1, 1], [], []>} : vector<64x96xbf16>, vector<96x128xbf16>, vector<64x128xf32> -> vector<64x128xf32>
    %167 = vector.broadcast %155 : vector<64x1xf32> to vector<64x128xf32>
    %168 = arith.addf %167, %166 : vector<64x128xf32>
    %169 = vector.extract_strided_slice %168 {offsets = [0, 0], sizes = [32, 128], strides = [1, 1]} : vector<64x128xf32> to vector<32x128xf32>
    %170 = math.exp %169 : vector<32x128xf32>
    %171 = arith.mulf %170, %146 : vector<32x128xf32>
    %172 = vector.extract_strided_slice %168 {offsets = [32, 0], sizes = [32, 128], strides = [1, 1]} : vector<64x128xf32> to vector<32x128xf32>
    %173 = arith.addf %171, %172 : vector<32x128xf32>
    %174 = arith.addf %135, %169 : vector<32x128xf32>
    %c1_i32_96 = arith.constant 1 : i32
    %175 = tpu.dynamic_rotate %173 by %c1_i32_96 dim 1 : vector<32x128xf32>, i32 -> vector<32x128xf32>
    %176 = vector.broadcast %0 : vector<1x128xf32> to vector<32x128xf32>
    %177 = arith.mulf %175, %176 : vector<32x128xf32>
    %c127_i32_97 = arith.constant 127 : i32
    %178 = tpu.dynamic_rotate %173 by %c127_i32_97 dim 1 : vector<32x128xf32>, i32 -> vector<32x128xf32>
    %179 = vector.broadcast %1 : vector<1x128xf32> to vector<32x128xf32>
    %180 = arith.mulf %178, %179 : vector<32x128xf32>
    %181 = tpu.concatenate %177, %173, %180 in 0 : vector<32x128xf32>, vector<32x128xf32>, vector<32x128xf32> -> vector<96x128xf32>
    %182 = arith.truncf %181 : vector<96x128xf32> to vector<96x128xbf16>
    %c4 = arith.constant 4 : index
    %c0_98 = arith.constant 0 : index
    %c0_99 = arith.constant 0 : index
    %183 = vector.load %arg5[%c4, %c0_98, %c0_99] : memref<8x32x32xf32, #tpu.memory_space<vmem>>, vector<1x32x32xf32>
    %184 = vector.shape_cast %183 : vector<1x32x32xf32> to vector<32x32xf32>
    %cst_100 = arith.constant dense<0.000000e+00> : vector<32x128xf32>
    %185 = tpu.matmul %184, %173, %cst_100 {dimension_numbers = #tpu.dot_dimension_numbers<[1], [0], [0], [1], [0, 0, 1, 1], [], []>} : vector<32x32xf32>, vector<32x128xf32>, vector<32x128xf32> -> vector<32x128xf32>
    %c128 = arith.constant 128 : index
    %c0_101 = arith.constant 0 : index
    %186 = vector.load %arg13[%c128, %c0_101] : memref<256x128xf32, #tpu.memory_space<vmem>>, vector<32x128xf32>
    %c4_102 = arith.constant 4 : index
    %c0_103 = arith.constant 0 : index
    %c0_104 = arith.constant 0 : index
    %187 = vector.load %arg6[%c4_102, %c0_103, %c0_104] : memref<8x32x96xbf16, #tpu.memory_space<vmem>>, vector<1x32x96xbf16>
    %188 = vector.shape_cast %187 : vector<1x32x96xbf16> to vector<32x96xbf16>
    %cst_105 = arith.constant dense<0.000000e+00> : vector<32x128xf32>
    %189 = tpu.matmul %188, %182, %cst_105 {dimension_numbers = #tpu.dot_dimension_numbers<[1], [0], [0], [1], [0, 0, 1, 1], [], []>} : vector<32x96xbf16>, vector<96x128xbf16>, vector<32x128xf32> -> vector<32x128xf32>
    %190 = arith.addf %186, %189 : vector<32x128xf32>
    %cst_106 = arith.constant 0.000000e+00 : f32
    %191 = vector.broadcast %cst_106 : f32 to vector<32x128xf32>
    %192 = arith.maximumf %190, %191 : vector<32x128xf32>
    %c4_107 = arith.constant 4 : index
    %c0_108 = arith.constant 0 : index
    %c0_109 = arith.constant 0 : index
    %193 = vector.load %arg10[%c4_107, %c0_108, %c0_109] : memref<8x64x1xf32, #tpu.memory_space<vmem>>, vector<1x64x1xf32>
    %194 = vector.shape_cast %193 : vector<1x64x1xf32> to vector<64x1xf32>
    %c4_110 = arith.constant 4 : index
    %c0_111 = arith.constant 0 : index
    %c0_112 = arith.constant 0 : index
    %195 = vector.load %arg9[%c4_110, %c0_111, %c0_112] : memref<8x64x96xbf16, #tpu.memory_space<vmem>>, vector<1x64x96xbf16>
    %196 = vector.shape_cast %195 : vector<1x64x96xbf16> to vector<64x96xbf16>
    %c1_i32_113 = arith.constant 1 : i32
    %197 = tpu.dynamic_rotate %192 by %c1_i32_113 dim 1 : vector<32x128xf32>, i32 -> vector<32x128xf32>
    %198 = vector.broadcast %0 : vector<1x128xf32> to vector<32x128xf32>
    %199 = arith.mulf %197, %198 : vector<32x128xf32>
    %c127_i32_114 = arith.constant 127 : i32
    %200 = tpu.dynamic_rotate %192 by %c127_i32_114 dim 1 : vector<32x128xf32>, i32 -> vector<32x128xf32>
    %201 = vector.broadcast %1 : vector<1x128xf32> to vector<32x128xf32>
    %202 = arith.mulf %200, %201 : vector<32x128xf32>
    %203 = tpu.concatenate %199, %192, %202 in 0 : vector<32x128xf32>, vector<32x128xf32>, vector<32x128xf32> -> vector<96x128xf32>
    %204 = arith.truncf %203 : vector<96x128xf32> to vector<96x128xbf16>
    %cst_115 = arith.constant dense<0.000000e+00> : vector<64x128xf32>
    %205 = tpu.matmul %196, %204, %cst_115 {dimension_numbers = #tpu.dot_dimension_numbers<[1], [0], [0], [1], [0, 0, 1, 1], [], []>} : vector<64x96xbf16>, vector<96x128xbf16>, vector<64x128xf32> -> vector<64x128xf32>
    %206 = vector.broadcast %194 : vector<64x1xf32> to vector<64x128xf32>
    %207 = arith.addf %206, %205 : vector<64x128xf32>
    %208 = vector.extract_strided_slice %207 {offsets = [0, 0], sizes = [32, 128], strides = [1, 1]} : vector<64x128xf32> to vector<32x128xf32>
    %209 = math.exp %208 : vector<32x128xf32>
    %210 = arith.mulf %209, %185 : vector<32x128xf32>
    %211 = vector.extract_strided_slice %207 {offsets = [32, 0], sizes = [32, 128], strides = [1, 1]} : vector<64x128xf32> to vector<32x128xf32>
    %212 = arith.addf %210, %211 : vector<32x128xf32>
    %213 = arith.addf %174, %208 : vector<32x128xf32>
    %c1_i32_116 = arith.constant 1 : i32
    %214 = tpu.dynamic_rotate %212 by %c1_i32_116 dim 1 : vector<32x128xf32>, i32 -> vector<32x128xf32>
    %215 = vector.broadcast %0 : vector<1x128xf32> to vector<32x128xf32>
    %216 = arith.mulf %214, %215 : vector<32x128xf32>
    %c127_i32_117 = arith.constant 127 : i32
    %217 = tpu.dynamic_rotate %212 by %c127_i32_117 dim 1 : vector<32x128xf32>, i32 -> vector<32x128xf32>
    %218 = vector.broadcast %1 : vector<1x128xf32> to vector<32x128xf32>
    %219 = arith.mulf %217, %218 : vector<32x128xf32>
    %220 = tpu.concatenate %216, %212, %219 in 0 : vector<32x128xf32>, vector<32x128xf32>, vector<32x128xf32> -> vector<96x128xf32>
    %221 = arith.truncf %220 : vector<96x128xf32> to vector<96x128xbf16>
    %c5 = arith.constant 5 : index
    %c0_118 = arith.constant 0 : index
    %c0_119 = arith.constant 0 : index
    %222 = vector.load %arg5[%c5, %c0_118, %c0_119] : memref<8x32x32xf32, #tpu.memory_space<vmem>>, vector<1x32x32xf32>
    %223 = vector.shape_cast %222 : vector<1x32x32xf32> to vector<32x32xf32>
    %cst_120 = arith.constant dense<0.000000e+00> : vector<32x128xf32>
    %224 = tpu.matmul %223, %212, %cst_120 {dimension_numbers = #tpu.dot_dimension_numbers<[1], [0], [0], [1], [0, 0, 1, 1], [], []>} : vector<32x32xf32>, vector<32x128xf32>, vector<32x128xf32> -> vector<32x128xf32>
    %c160 = arith.constant 160 : index
    %c0_121 = arith.constant 0 : index
    %225 = vector.load %arg13[%c160, %c0_121] : memref<256x128xf32, #tpu.memory_space<vmem>>, vector<32x128xf32>
    %c5_122 = arith.constant 5 : index
    %c0_123 = arith.constant 0 : index
    %c0_124 = arith.constant 0 : index
    %226 = vector.load %arg6[%c5_122, %c0_123, %c0_124] : memref<8x32x96xbf16, #tpu.memory_space<vmem>>, vector<1x32x96xbf16>
    %227 = vector.shape_cast %226 : vector<1x32x96xbf16> to vector<32x96xbf16>
    %cst_125 = arith.constant dense<0.000000e+00> : vector<32x128xf32>
    %228 = tpu.matmul %227, %221, %cst_125 {dimension_numbers = #tpu.dot_dimension_numbers<[1], [0], [0], [1], [0, 0, 1, 1], [], []>} : vector<32x96xbf16>, vector<96x128xbf16>, vector<32x128xf32> -> vector<32x128xf32>
    %229 = arith.addf %225, %228 : vector<32x128xf32>
    %cst_126 = arith.constant 0.000000e+00 : f32
    %230 = vector.broadcast %cst_126 : f32 to vector<32x128xf32>
    %231 = arith.maximumf %229, %230 : vector<32x128xf32>
    %c5_127 = arith.constant 5 : index
    %c0_128 = arith.constant 0 : index
    %c0_129 = arith.constant 0 : index
    %232 = vector.load %arg10[%c5_127, %c0_128, %c0_129] : memref<8x64x1xf32, #tpu.memory_space<vmem>>, vector<1x64x1xf32>
    %233 = vector.shape_cast %232 : vector<1x64x1xf32> to vector<64x1xf32>
    %c5_130 = arith.constant 5 : index
    %c0_131 = arith.constant 0 : index
    %c0_132 = arith.constant 0 : index
    %234 = vector.load %arg9[%c5_130, %c0_131, %c0_132] : memref<8x64x96xbf16, #tpu.memory_space<vmem>>, vector<1x64x96xbf16>
    %235 = vector.shape_cast %234 : vector<1x64x96xbf16> to vector<64x96xbf16>
    %c1_i32_133 = arith.constant 1 : i32
    %236 = tpu.dynamic_rotate %231 by %c1_i32_133 dim 1 : vector<32x128xf32>, i32 -> vector<32x128xf32>
    %237 = vector.broadcast %0 : vector<1x128xf32> to vector<32x128xf32>
    %238 = arith.mulf %236, %237 : vector<32x128xf32>
    %c127_i32_134 = arith.constant 127 : i32
    %239 = tpu.dynamic_rotate %231 by %c127_i32_134 dim 1 : vector<32x128xf32>, i32 -> vector<32x128xf32>
    %240 = vector.broadcast %1 : vector<1x128xf32> to vector<32x128xf32>
    %241 = arith.mulf %239, %240 : vector<32x128xf32>
    %242 = tpu.concatenate %238, %231, %241 in 0 : vector<32x128xf32>, vector<32x128xf32>, vector<32x128xf32> -> vector<96x128xf32>
    %243 = arith.truncf %242 : vector<96x128xf32> to vector<96x128xbf16>
    %cst_135 = arith.constant dense<0.000000e+00> : vector<64x128xf32>
    %244 = tpu.matmul %235, %243, %cst_135 {dimension_numbers = #tpu.dot_dimension_numbers<[1], [0], [0], [1], [0, 0, 1, 1], [], []>} : vector<64x96xbf16>, vector<96x128xbf16>, vector<64x128xf32> -> vector<64x128xf32>
    %245 = vector.broadcast %233 : vector<64x1xf32> to vector<64x128xf32>
    %246 = arith.addf %245, %244 : vector<64x128xf32>
    %247 = vector.extract_strided_slice %246 {offsets = [0, 0], sizes = [32, 128], strides = [1, 1]} : vector<64x128xf32> to vector<32x128xf32>
    %248 = math.exp %247 : vector<32x128xf32>
    %249 = arith.mulf %248, %224 : vector<32x128xf32>
    %250 = vector.extract_strided_slice %246 {offsets = [32, 0], sizes = [32, 128], strides = [1, 1]} : vector<64x128xf32> to vector<32x128xf32>
    %251 = arith.addf %249, %250 : vector<32x128xf32>
    %252 = arith.addf %213, %247 : vector<32x128xf32>
    %c1_i32_136 = arith.constant 1 : i32
    %253 = tpu.dynamic_rotate %251 by %c1_i32_136 dim 1 : vector<32x128xf32>, i32 -> vector<32x128xf32>
    %254 = vector.broadcast %0 : vector<1x128xf32> to vector<32x128xf32>
    %255 = arith.mulf %253, %254 : vector<32x128xf32>
    %c127_i32_137 = arith.constant 127 : i32
    %256 = tpu.dynamic_rotate %251 by %c127_i32_137 dim 1 : vector<32x128xf32>, i32 -> vector<32x128xf32>
    %257 = vector.broadcast %1 : vector<1x128xf32> to vector<32x128xf32>
    %258 = arith.mulf %256, %257 : vector<32x128xf32>
    %259 = tpu.concatenate %255, %251, %258 in 0 : vector<32x128xf32>, vector<32x128xf32>, vector<32x128xf32> -> vector<96x128xf32>
    %260 = arith.truncf %259 : vector<96x128xf32> to vector<96x128xbf16>
    %c6 = arith.constant 6 : index
    %c0_138 = arith.constant 0 : index
    %c0_139 = arith.constant 0 : index
    %261 = vector.load %arg5[%c6, %c0_138, %c0_139] : memref<8x32x32xf32, #tpu.memory_space<vmem>>, vector<1x32x32xf32>
    %262 = vector.shape_cast %261 : vector<1x32x32xf32> to vector<32x32xf32>
    %cst_140 = arith.constant dense<0.000000e+00> : vector<32x128xf32>
    %263 = tpu.matmul %262, %251, %cst_140 {dimension_numbers = #tpu.dot_dimension_numbers<[1], [0], [0], [1], [0, 0, 1, 1], [], []>} : vector<32x32xf32>, vector<32x128xf32>, vector<32x128xf32> -> vector<32x128xf32>
    %c192 = arith.constant 192 : index
    %c0_141 = arith.constant 0 : index
    %264 = vector.load %arg13[%c192, %c0_141] : memref<256x128xf32, #tpu.memory_space<vmem>>, vector<32x128xf32>
    %c6_142 = arith.constant 6 : index
    %c0_143 = arith.constant 0 : index
    %c0_144 = arith.constant 0 : index
    %265 = vector.load %arg6[%c6_142, %c0_143, %c0_144] : memref<8x32x96xbf16, #tpu.memory_space<vmem>>, vector<1x32x96xbf16>
    %266 = vector.shape_cast %265 : vector<1x32x96xbf16> to vector<32x96xbf16>
    %cst_145 = arith.constant dense<0.000000e+00> : vector<32x128xf32>
    %267 = tpu.matmul %266, %260, %cst_145 {dimension_numbers = #tpu.dot_dimension_numbers<[1], [0], [0], [1], [0, 0, 1, 1], [], []>} : vector<32x96xbf16>, vector<96x128xbf16>, vector<32x128xf32> -> vector<32x128xf32>
    %268 = arith.addf %264, %267 : vector<32x128xf32>
    %cst_146 = arith.constant 0.000000e+00 : f32
    %269 = vector.broadcast %cst_146 : f32 to vector<32x128xf32>
    %270 = arith.maximumf %268, %269 : vector<32x128xf32>
    %c6_147 = arith.constant 6 : index
    %c0_148 = arith.constant 0 : index
    %c0_149 = arith.constant 0 : index
    %271 = vector.load %arg10[%c6_147, %c0_148, %c0_149] : memref<8x64x1xf32, #tpu.memory_space<vmem>>, vector<1x64x1xf32>
    %272 = vector.shape_cast %271 : vector<1x64x1xf32> to vector<64x1xf32>
    %c6_150 = arith.constant 6 : index
    %c0_151 = arith.constant 0 : index
    %c0_152 = arith.constant 0 : index
    %273 = vector.load %arg9[%c6_150, %c0_151, %c0_152] : memref<8x64x96xbf16, #tpu.memory_space<vmem>>, vector<1x64x96xbf16>
    %274 = vector.shape_cast %273 : vector<1x64x96xbf16> to vector<64x96xbf16>
    %c1_i32_153 = arith.constant 1 : i32
    %275 = tpu.dynamic_rotate %270 by %c1_i32_153 dim 1 : vector<32x128xf32>, i32 -> vector<32x128xf32>
    %276 = vector.broadcast %0 : vector<1x128xf32> to vector<32x128xf32>
    %277 = arith.mulf %275, %276 : vector<32x128xf32>
    %c127_i32_154 = arith.constant 127 : i32
    %278 = tpu.dynamic_rotate %270 by %c127_i32_154 dim 1 : vector<32x128xf32>, i32 -> vector<32x128xf32>
    %279 = vector.broadcast %1 : vector<1x128xf32> to vector<32x128xf32>
    %280 = arith.mulf %278, %279 : vector<32x128xf32>
    %281 = tpu.concatenate %277, %270, %280 in 0 : vector<32x128xf32>, vector<32x128xf32>, vector<32x128xf32> -> vector<96x128xf32>
    %282 = arith.truncf %281 : vector<96x128xf32> to vector<96x128xbf16>
    %cst_155 = arith.constant dense<0.000000e+00> : vector<64x128xf32>
    %283 = tpu.matmul %274, %282, %cst_155 {dimension_numbers = #tpu.dot_dimension_numbers<[1], [0], [0], [1], [0, 0, 1, 1], [], []>} : vector<64x96xbf16>, vector<96x128xbf16>, vector<64x128xf32> -> vector<64x128xf32>
    %284 = vector.broadcast %272 : vector<64x1xf32> to vector<64x128xf32>
    %285 = arith.addf %284, %283 : vector<64x128xf32>
    %286 = vector.extract_strided_slice %285 {offsets = [0, 0], sizes = [32, 128], strides = [1, 1]} : vector<64x128xf32> to vector<32x128xf32>
    %287 = math.exp %286 : vector<32x128xf32>
    %288 = arith.mulf %287, %263 : vector<32x128xf32>
    %289 = vector.extract_strided_slice %285 {offsets = [32, 0], sizes = [32, 128], strides = [1, 1]} : vector<64x128xf32> to vector<32x128xf32>
    %290 = arith.addf %288, %289 : vector<32x128xf32>
    %291 = arith.addf %252, %286 : vector<32x128xf32>
    %c1_i32_156 = arith.constant 1 : i32
    %292 = tpu.dynamic_rotate %290 by %c1_i32_156 dim 1 : vector<32x128xf32>, i32 -> vector<32x128xf32>
    %293 = vector.broadcast %0 : vector<1x128xf32> to vector<32x128xf32>
    %294 = arith.mulf %292, %293 : vector<32x128xf32>
    %c127_i32_157 = arith.constant 127 : i32
    %295 = tpu.dynamic_rotate %290 by %c127_i32_157 dim 1 : vector<32x128xf32>, i32 -> vector<32x128xf32>
    %296 = vector.broadcast %1 : vector<1x128xf32> to vector<32x128xf32>
    %297 = arith.mulf %295, %296 : vector<32x128xf32>
    %298 = tpu.concatenate %294, %290, %297 in 0 : vector<32x128xf32>, vector<32x128xf32>, vector<32x128xf32> -> vector<96x128xf32>
    %299 = arith.truncf %298 : vector<96x128xf32> to vector<96x128xbf16>
    %c7 = arith.constant 7 : index
    %c0_158 = arith.constant 0 : index
    %c0_159 = arith.constant 0 : index
    %300 = vector.load %arg5[%c7, %c0_158, %c0_159] : memref<8x32x32xf32, #tpu.memory_space<vmem>>, vector<1x32x32xf32>
    %301 = vector.shape_cast %300 : vector<1x32x32xf32> to vector<32x32xf32>
    %cst_160 = arith.constant dense<0.000000e+00> : vector<32x128xf32>
    %302 = tpu.matmul %301, %290, %cst_160 {dimension_numbers = #tpu.dot_dimension_numbers<[1], [0], [0], [1], [0, 0, 1, 1], [], []>} : vector<32x32xf32>, vector<32x128xf32>, vector<32x128xf32> -> vector<32x128xf32>
    %c224 = arith.constant 224 : index
    %c0_161 = arith.constant 0 : index
    %303 = vector.load %arg13[%c224, %c0_161] : memref<256x128xf32, #tpu.memory_space<vmem>>, vector<32x128xf32>
    %c7_162 = arith.constant 7 : index
    %c0_163 = arith.constant 0 : index
    %c0_164 = arith.constant 0 : index
    %304 = vector.load %arg6[%c7_162, %c0_163, %c0_164] : memref<8x32x96xbf16, #tpu.memory_space<vmem>>, vector<1x32x96xbf16>
    %305 = vector.shape_cast %304 : vector<1x32x96xbf16> to vector<32x96xbf16>
    %cst_165 = arith.constant dense<0.000000e+00> : vector<32x128xf32>
    %306 = tpu.matmul %305, %299, %cst_165 {dimension_numbers = #tpu.dot_dimension_numbers<[1], [0], [0], [1], [0, 0, 1, 1], [], []>} : vector<32x96xbf16>, vector<96x128xbf16>, vector<32x128xf32> -> vector<32x128xf32>
    %307 = arith.addf %303, %306 : vector<32x128xf32>
    %cst_166 = arith.constant 0.000000e+00 : f32
    %308 = vector.broadcast %cst_166 : f32 to vector<32x128xf32>
    %309 = arith.maximumf %307, %308 : vector<32x128xf32>
    %c7_167 = arith.constant 7 : index
    %c0_168 = arith.constant 0 : index
    %c0_169 = arith.constant 0 : index
    %310 = vector.load %arg10[%c7_167, %c0_168, %c0_169] : memref<8x64x1xf32, #tpu.memory_space<vmem>>, vector<1x64x1xf32>
    %311 = vector.shape_cast %310 : vector<1x64x1xf32> to vector<64x1xf32>
    %c7_170 = arith.constant 7 : index
    %c0_171 = arith.constant 0 : index
    %c0_172 = arith.constant 0 : index
    %312 = vector.load %arg9[%c7_170, %c0_171, %c0_172] : memref<8x64x96xbf16, #tpu.memory_space<vmem>>, vector<1x64x96xbf16>
    %313 = vector.shape_cast %312 : vector<1x64x96xbf16> to vector<64x96xbf16>
    %c1_i32_173 = arith.constant 1 : i32
    %314 = tpu.dynamic_rotate %309 by %c1_i32_173 dim 1 : vector<32x128xf32>, i32 -> vector<32x128xf32>
    %315 = vector.broadcast %0 : vector<1x128xf32> to vector<32x128xf32>
    %316 = arith.mulf %314, %315 : vector<32x128xf32>
    %c127_i32_174 = arith.constant 127 : i32
    %317 = tpu.dynamic_rotate %309 by %c127_i32_174 dim 1 : vector<32x128xf32>, i32 -> vector<32x128xf32>
    %318 = vector.broadcast %1 : vector<1x128xf32> to vector<32x128xf32>
    %319 = arith.mulf %317, %318 : vector<32x128xf32>
    %320 = tpu.concatenate %316, %309, %319 in 0 : vector<32x128xf32>, vector<32x128xf32>, vector<32x128xf32> -> vector<96x128xf32>
    %321 = arith.truncf %320 : vector<96x128xf32> to vector<96x128xbf16>
    %cst_175 = arith.constant dense<0.000000e+00> : vector<64x128xf32>
    %322 = tpu.matmul %313, %321, %cst_175 {dimension_numbers = #tpu.dot_dimension_numbers<[1], [0], [0], [1], [0, 0, 1, 1], [], []>} : vector<64x96xbf16>, vector<96x128xbf16>, vector<64x128xf32> -> vector<64x128xf32>
    %323 = vector.broadcast %311 : vector<64x1xf32> to vector<64x128xf32>
    %324 = arith.addf %323, %322 : vector<64x128xf32>
    %325 = vector.extract_strided_slice %324 {offsets = [0, 0], sizes = [32, 128], strides = [1, 1]} : vector<64x128xf32> to vector<32x128xf32>
    %326 = math.exp %325 : vector<32x128xf32>
    %327 = arith.mulf %326, %302 : vector<32x128xf32>
    %328 = vector.extract_strided_slice %324 {offsets = [32, 0], sizes = [32, 128], strides = [1, 1]} : vector<64x128xf32> to vector<32x128xf32>
    %329 = arith.addf %327, %328 : vector<32x128xf32>
    %330 = arith.addf %291, %325 : vector<32x128xf32>
    %c0_176 = arith.constant 0 : index
    %c0_177 = arith.constant 0 : index
    %331 = vector.load %arg11[%c0_176, %c0_177] : memref<32x128xf32, #tpu.memory_space<vmem>>, vector<32x128xf32>
    tpu.vector_store %arg11[%c0_176, %c0_177], %329 {strides = array<i32>} : memref<32x128xf32, #tpu.memory_space<vmem>>, vector<32x128xf32>,
    %c0_178 = arith.constant 0 : index
    %c0_179 = arith.constant 0 : index
    %332 = vector.load %arg4[%c0_178, %c0_179] : memref<1x128xf32, #tpu.memory_space<vmem>>, vector<1x128xf32>
    %333 = vector.broadcast %332 : vector<1x128xf32> to vector<32x128xf32>
    %334 = arith.mulf %330, %333 : vector<32x128xf32>
    %cst_180 = arith.constant dense<0.000000e+00> : vector<32xf32>
    %335 = vector.multi_reduction <add>, %334, %cst_180 [1] : vector<32x128xf32> to vector<32xf32>
    %336 = vector.shape_cast %335 : vector<32xf32> to vector<32x1xf32>
    %cst_181 = arith.constant dense<0.000000e+00> : vector<1xf32>
    %337 = vector.multi_reduction <add>, %336, %cst_181 [0] : vector<32x1xf32> to vector<1xf32>
    %338 = vector.shape_cast %337 : vector<1xf32> to vector<1x1xf32>
    %c0_182 = arith.constant 0 : index
    %c0_183 = arith.constant 0 : index
    %339 = vector.load %arg12[%c0_182, %c0_183] : memref<1x1xf32, #tpu.memory_space<vmem>>, vector<1x1xf32>
    tpu.vector_store %arg12[%c0_182, %c0_183], %338 {strides = array<i32>} : memref<1x1xf32, #tpu.memory_space<vmem>>, vector<1x1xf32>,
    return
  }
}

</mosaic_0001>

<bundles_post_ra>
// kernel: flow_aff_conv_forward.1
= control target key start
LH: loop header
LB: loop body
LE: loop exit
PB: predicated region body
PF: predicated region fallthrough
CT: control target
= control target key end

     0   :  { %s5432_s25 = smov 1   ;;  %s5433_s19 = smov 127   ;;  %vm234_vm0 = vcmask 785408   ;;  %s6674_s0 = inlined_call_operand.vmem [shape: f32[32,128], index: 0, kind: input, shape index: {}]   ;;  %s6675_s1 = inlined_call_operand.vmem [shape: f32[32,128], index: 1, kind: input, shape index: {}]   ;;  %s6676_s2 = inlined_call_operand.vmem [shape: f32[1,128], index: 2, kind: input, shape index: {}]   ;;  %s6677_s3 = inlined_call_operand.vmem [shape: f32[1,128], index: 3, kind: input, shape index: {}]   ;;  %s6678_s4 = inlined_call_operand.vmem [shape: f32[1,128], index: 4, kind: input, shape index: {}]   ;;  %s6679_s5 = inlined_call_operand.vmem [shape: f32[8,32,32], index: 5, kind: input, shape index: {}]   ;;  %s6680_s6 = inlined_call_operand.vmem [shape: bf16[8,32,96], index: 6, kind: input, shape index: {}]   ;;  %s6681_s7 = inlined_call_operand.vmem [shape: bf16[256,96], index: 7, kind: input, shape index: {}]   ;;  %s6682_s8 = inlined_call_operand.vmem [shape: f32[256,1], index: 8, kind: input, shape index: {}]   ;;  %s6683_s9 = inlined_call_operand.vmem [shape: bf16[8,64,96], index: 9, kind: input, shape index: {}]   ;;  %s6684_s10 = inlined_call_operand.vmem [shape: f32[8,64,1], index: 10, kind: input, shape index: {}]   ;;  %s6685_s11 = inlined_call_operand.vmem [shape: f32[32,128], index: 11, kind: output, shape index: {0}]   ;;  %s6686_s12 = inlined_call_operand.hbm [shape: f32[1,1], index: 12, kind: output, shape index: {1}]  }
   0x1   :  { %v110_v0 = vld [vmem:[%s6675_s1 + $0x10] sm:$0xff]  ;;  %v108_v1 = vld [vmem:[%s6675_s1] sm:$0xff]  ;;  %v109_v2 = vld [vmem:[%s6675_s1 + $0x8] sm:$0xff] }
   0x2   :  { %116 = vrot.lane.b32.xlu1 %v110_v0, %s5432_s25  ;;  %112 = vrot.lane.b32.xlu0 %v108_v1, %s5432_s25  ;;  %v111_v3 = vld [vmem:[%s6675_s1 + $0x18] sm:$0xff]  ;;  %v669_v4 = vld [vmem:[%s6674_s0 + $0x8] sm:$0xff]  ;;  %v5521_v6 = vpack.c.bf16 %v109_v2, %v108_v1 }
   0x3   :  { %v668_v5 = vld [vmem:[%s6674_s0] sm:$0xff]  ;;  %v671_v7 = vld [vmem:[%s6674_s0 + $0x18] sm:$0xff]  ;;  %v670_v9 = vld [vmem:[%s6674_s0 + $0x10] sm:$0xff]  ;;  %v5533_v10 = vpack.c.bf16 %v111_v3, %v110_v0 }
   0x4   :  { %v5526_v8 = vpack.c.bf16 %v669_v4, %v668_v5  ;;  %v5535_v11 = vpack.c.bf16 %v671_v7, %v670_v9  ;;  %v5276_v12 = vld [vmem:[%s6681_s7] sm:$0xff]  }
   0x5   :  { %4710 = vmatprep.mubr.msk.bf16.mxu0 %vm234_vm0, %v5276_v12 }
   0x6   :  { %118 = vrot.lane.b32.xlu1 %v111_v3, %s5432_s25  ;;  %114 = vrot.lane.b32.xlu0 %v109_v2, %s5432_s25 }
   0x7   :  { %5143 = vmatprep.subr.bf16.mxu1 %v5526_v8 }
   0x8   :  { %5145 = vmatpush3.bf16.msra.mxu1 %v5526_v8 }
   0x9   :  { %5147 = vmatprep.subr.bf16.mxu1 %v5535_v11 }
   0xa   :  { %132 = vrot.lane.b32.xlu1 %v109_v2, %s5433_s19  ;;  %130 = vrot.lane.b32.xlu0 %v108_v1, %s5433_s19 }
   0xc   :  { %5149 = vmatpush3.bf16.msra.mxu1 %v5535_v11 }
   0xe   :  { %136 = vrot.lane.b32.xlu1 %v111_v3, %s5433_s19  ;;  %134 = vrot.lane.b32.xlu0 %v110_v0, %s5433_s19 }
  0x12   :  { %674 = vrot.lane.b32.xlu1 %v669_v4, %s5432_s25  ;;  %672 = vrot.lane.b32.xlu0 %v668_v5, %s5432_s25 }
  0x16   :  { %678 = vrot.lane.b32.xlu1 %v671_v7, %s5432_s25  ;;  %676 = vrot.lane.b32.xlu0 %v670_v9, %s5432_s25 }
  0x1a   :  { %686 = vrot.lane.b32.xlu1 %v669_v4, %s5433_s19  ;;  %684 = vrot.lane.b32.xlu0 %v668_v5, %s5433_s19 }
  0x1e   :  { %690 = vrot.lane.b32.xlu1 %v671_v7, %s5433_s19  ;;  %688 = vrot.lane.b32.xlu0 %v670_v9, %s5433_s19 }
  0x1f   :  { %18 = vsyncpa [#allocation4], 0  ;;  %v45_v13 = vld [vmem:[%s6682_s8 + $0x8] sm:$0xff]  ;;  %v44_v14 = vld [vmem:[%s6682_s8] sm:$0xff]  ;;  %v5434_v15 = vmov 0   ;;  %vm706_vm1 = vcmask 261120  }
  0x20   :  { %5275 = vset.pattern.permute.xlu1 %v5434_v15  ;;  %5274 = vset.pattern.permute.xlu0 %v5434_v15  ;;  %v46_v16 = vld [vmem:[%s6682_s8 + $0x10] sm:$0xff]  ;;  %v47_v17 = vld [vmem:[%s6682_s8 + $0x18] sm:$0xff]  ;;  %v5572_v20 = vld [vmem:[%s6676_s2] ss:$0 sm:$0xff]  ;;  %s5435_s24 = smov [#allocation3]   ;;  %vm4117_vm2 = vcmask 0  }
  0x21   :  { %v5581_v31 = vld [vmem:[%s6677_s3] ss:$0 sm:$0xff]  ;;  %v5277_v49 = vld [vmem:[%s6681_s7 + $0x8] sm:$0xff]   ;;  %v5278_v50 = vld [vmem:[%s6681_s7 + $0x10] sm:$0xff]  }
  0x22   :  { %451 = vperm.xlu1 %5275, %v45_v13   ;;  %446 = vperm.xlu0 %5274, %v44_v14   ;;  %v5279_v54 = vld [vmem:[%s6681_s7 + $0x18] sm:$0xff]   ;;  %v5280_v55 = vld [vmem:[%s6681_s7 + $0x20] sm:$0xff]   ;;  %v5281_v63 = vld [vmem:[%s6681_s7 + $0x28] sm:$0xff]  }
  0x23   :  { %v5282_v0 = vld [vmem:[%s6681_s7 + $0x30] sm:$0xff]   ;;  %v5283_v2 = vld [vmem:[%s6681_s7 + $0x38] sm:$0xff]   ;;  %v5284_v3 = vld [vmem:[%s6681_s7 + $0x40] sm:$0xff]  }
  0x24   :  { %v5285_v4 = vld [vmem:[%s6681_s7 + $0x48] sm:$0xff]   ;;  %v5286_v5 = vld [vmem:[%s6681_s7 + $0x50] sm:$0xff]   ;;  %v5288_v7 = vld [vmem:[%s6681_s7 + $0x60] sm:$0xff]  }
  0x25   :  { %v5290_v9 = vld [vmem:[%s6681_s7 + $0x70] sm:$0xff]   ;;  %v5293_v12 = vld [vmem:[%s6680_s6 + $0x8] sm:$0xff]   ;;  %v702_v15 = vld [vmem:[%s6679_s5] sm:$0xff] }
  0x26   :  { %456 = vperm.xlu1 %5275, %v46_v16   ;;  %461 = vperm.xlu0 %5274, %v47_v17   ;;  %v703_v17 = vld [vmem:[%s6679_s5 + $0x8] sm:$0xff] }
  0x27   :  { %4750 = vmatprep.mubr.msk.f32.mxu1 %vm706_vm1, %v702_v15 }
  0x28   :  { %4751 = vmatmul.mubr.msk.f32.vlgmr.msra.gmra.mrb[0].mxu1 %vm706_vm1, %v703_v17 }
  0x74   :  { %v117_v18 = vpop.permute.xlu1 %116  ;;  %v113_v19 = vpop.permute.xlu0 %112 }
  0x75   :  { %v128_v23 = vmul.f32 %v5572_v20, %v117_v18  ;;  %v126_v24 = vmul.f32 %v5572_v20, %v113_v19 }
  0x78   :  { %v119_v21 = vpop.permute.xlu1 %118  ;;  %v115_v22 = vpop.permute.xlu0 %114 }
  0x79   :  { %v129_v25 = vmul.f32 %v5572_v20, %v119_v21  ;;  %v127_v26 = vmul.f32 %v5572_v20, %v115_v22 }
  0x7b   :  { %v148_v27 = vpack.c.bf16 %v127_v26, %v126_v24  ;;  %v149_v30 = vpack.c.bf16 %v129_v25, %v128_v23 }
  0x7c   :  { %v133_v28 = vpop.permute.xlu1 %132  ;;  %v131_v29 = vpop.permute.xlu0 %130 }
  0x7d   :  { %4698 = vmatprep.subr.bf16.mxu0 %v148_v27  ;;  %v145_v34 = vmul.f32 %v5581_v31, %v133_v28  ;;  %v144_v35 = vmul.f32 %v5581_v31, %v131_v29 }
  0x7e   :  { %4699 = vmatpush3.bf16.msra.mxu0 %v148_v27 }
  0x7f   :  { %4700 = vmatprep.subr.bf16.mxu0 %v149_v30  ;;  %v152_v38 = vpack.c.bf16 %v145_v34, %v144_v35  ;;  %v704_v35 = vld [vmem:[%s6679_s5 + $0x10] sm:$0xff] }
  0x80   :  { %v137_v32 = vpop.permute.xlu1 %136  ;;  %v135_v33 = vpop.permute.xlu0 %134  ;;  %4753 = vmatprep.mubr.msk.f32.mxu1 %vm706_vm1, %v704_v35 }
  0x81   :  { %v147_v39 = vmul.f32 %v5581_v31, %v137_v32  ;;  %v146_v40 = vmul.f32 %v5581_v31, %v135_v33 }
  0x82   :  { %4701 = vmatpush3.bf16.msra.mxu0 %v149_v30 }
  0x83   :  { %4702 = vmatprep.subr.bf16.mxu0 %v5521_v6  ;;  %v153_v41 = vpack.c.bf16 %v147_v39, %v146_v40  ;;  %v886_v39 = vld [vmem:[%s6684_s10 + $0x8] sm:$0xff]  ;;  %v887_v40 = vld [vmem:[%s6684_s10 + $0x10] sm:$0xff] }
  0x84   :  { %v675_v36 = vpop.permute.xlu1 %674  ;;  %v673_v37 = vpop.permute.xlu0 %672 }
  0x85   :  { %v681_v42 = vmul.f32 %v5572_v20, %v675_v36  ;;  %v680_v43 = vmul.f32 %v5572_v20, %v673_v37  ;;  %v705_v36 = vld [vmem:[%s6679_s5 + $0x18] sm:$0xff]  ;;  %v885_v37 = vld [vmem:[%s6684_s10] sm:$0xff] }
  0x86   :  { %4703 = vmatpush3.bf16.msra.mxu0 %v5521_v6  ;;  %v5287_v6 = vld [vmem:[%s6681_s7 + $0x58] sm:$0xff]   ;;  %4754 = vmatmul.mubr.msk.f32.gmra.mrb[2].mxu1 %vm706_vm1, %v705_v36 }
  0x87   :  { %4704 = vmatprep.subr.bf16.mxu0 %v5533_v10  ;;  %v696_v46 = vpack.c.bf16 %v681_v42, %v680_v43  ;;  %v889_v42 = vld [vmem:[%s6684_s10 + $0x20] sm:$0xff]  ;;  %v890_v43 = vld [vmem:[%s6684_s10 + $0x28] sm:$0xff] }
  0x88   :  { %v679_v44 = vpop.permute.xlu1 %678  ;;  %v677_v45 = vpop.permute.xlu0 %676 }
  0x89   :  { %v683_v47 = vmul.f32 %v5572_v20, %v679_v44  ;;  %v682_v48 = vmul.f32 %v5572_v20, %v677_v45  ;;  %v891_v44 = vld [vmem:[%s6684_s10 + $0x30] sm:$0xff]  ;;  %v892_v45 = vld [vmem:[%s6684_s10 + $0x38] sm:$0xff] }
  0x8a   :  { %4705 = vmatpush3.bf16.msra.mxu0 %v5533_v10  ;;  %v5291_v10 = vld [vmem:[%s6681_s7 + $0x78] sm:$0xff]  }
  0x8b   :  { %4706 = vmatprep.subr.bf16.mxu0 %v152_v38  ;;  %v697_v51 = vpack.c.bf16 %v683_v47, %v682_v48 }
  0x8c   :  { %v687_v52 = vpop.permute.xlu1 %686  ;;  %v685_v53 = vpop.permute.xlu0 %684 }
  0x8d   :  { %v693_v56 = vmul.f32 %v5581_v31, %v687_v52  ;;  %v692_v57 = vmul.f32 %v5581_v31, %v685_v53 }
  0x8e   :  { %4707 = vmatpush3.bf16.msra.mxu0 %v152_v38  ;;  %v5294_v38 = vld [vmem:[%s6683_s9] sm:$0xff]  }
  0x8f   :  { %4708 = vmatprep.subr.bf16.mxu0 %v153_v41  ;;  %v700_v60 = vpack.c.bf16 %v693_v56, %v692_v57  ;;  %4784 = vmatprep.mubr.msk.bf16.mxu1 %vm234_vm0, %v5294_v38 }
  0x90   :  { %v691_v58 = vpop.permute.xlu1 %690  ;;  %v689_v59 = vpop.permute.xlu0 %688 }
  0x91   :  { %v695_v61 = vmul.f32 %v5581_v31, %v691_v58  ;;  %v694_v62 = vmul.f32 %v5581_v31, %v689_v59 }
  0x92   :  { %4709 = vmatpush3.bf16.msra.mxu0 %v153_v41  ;;  %v888_v41 = vld [vmem:[%s6684_s10 + $0x18] sm:$0xff] }
  0x93   :  { %4756 = vmatprep.subr.bf16.mxu0 %v696_v46  ;;  %v701_v1 = vpack.c.bf16 %v695_v61, %v694_v62 }
  0x95   :  { %4711 = vmatmul.mubr.msk.bf16.vlgmr.msra.gmra.mrb[0].mxu0 %vm234_vm0, %v5277_v49 }
  0x96   :  { %4757 = vmatpush3.bf16.msra.mxu0 %v696_v46  ;;  %4714 = vmatprep.mubr.msk.bf16.mxu0 %vm234_vm0, %v5278_v50 }
  0x97   :  { %4758 = vmatprep.subr.bf16.mxu0 %v697_v51 }
  0x9a   :  { %4759 = vmatpush3.bf16.msra.mxu0 %v697_v51 }
  0x9b   :  { %4760 = vmatprep.subr.bf16.mxu0 %v5526_v8 }
  0x9d   :  { %4715 = vmatmul.mubr.msk.bf16.gmra.mrb[4].mxu0 %vm234_vm0, %v5279_v54 }
  0x9e   :  { %4718 = vmatprep.mubr.msk.bf16.mxu0 %vm234_vm0, %v5280_v55  ;;  %4761 = vmatpush3.bf16.msra.mxu0 %v5526_v8  ;;  %v5289_v8 = vld [vmem:[%s6681_s7 + $0x68] sm:$0xff]  }
  0x9f   :  { %4762 = vmatprep.subr.bf16.mxu0 %v5535_v11 }
  0xa1   :  { %v452_v13 = vpop.permute.xlu1 %451  ;;  %v447_v14 = vpop.permute.xlu0 %446 }
  0xa2   :  { %4763 = vmatpush3.bf16.msra.mxu0 %v5535_v11  ;;  %v5292_v11 = vld [vmem:[%s6680_s6] sm:$0xff]  }
  0xa3   :  { %4764 = vmatprep.subr.bf16.mxu0 %v700_v60 }
  0xa5   :  { %4719 = vmatmul.mubr.msk.bf16.gmra.mrb[8].mxu0 %vm234_vm0, %v5281_v63  ;;  %v457_v16 = vpop.permute.xlu1 %456  ;;  %v462_v19 = vpop.permute.xlu0 %461 }
  0xa6   :  { %4722 = vmatprep.mubr.msk.bf16.mxu0 %vm234_vm0, %v5282_v0  ;;  %4765 = vmatpush3.bf16.msra.mxu0 %v700_v60 }
  0xa7   :  { %4766 = vmatprep.subr.bf16.mxu0 %v701_v1 }
  0xaa   :  { %4767 = vmatpush3.bf16.msra.mxu0 %v701_v1 }
  0xad   :  { %4723 = vmatmul.mubr.msk.bf16.gmra.mrb[12].mxu0 %vm234_vm0, %v5283_v2  ;;  %v5295_v2 = vld [vmem:[%s6683_s9 + $0x8] sm:$0xff]  }
  0xae   :  { %4726 = vmatprep.mubr.msk.bf16.mxu0 %vm234_vm0, %v5284_v3  ;;  %v5296_v3 = vld [vmem:[%s6683_s9 + $0x10] sm:$0xff]  }
  0xb5   :  { %4727 = vmatmul.mubr.msk.bf16.gmra.mrb[16].mxu0 %vm234_vm0, %v5285_v4  ;;  %v5297_v4 = vld [vmem:[%s6683_s9 + $0x18] sm:$0xff]  }
  0xb6   :  { %4730 = vmatprep.mubr.msk.bf16.mxu0 %vm234_vm0, %v5286_v5 }
  0xbd   :  { %4731 = vmatmul.mubr.msk.bf16.gmra.mrb[20].mxu0 %vm234_vm0, %v5287_v6 }
  0xbe   :  { %4734 = vmatprep.mubr.msk.bf16.mxu0 %vm234_vm0, %v5288_v7 }
  0xc5   :  { %4735 = vmatmul.mubr.msk.bf16.gmra.mrb[24].mxu0 %vm234_vm0, %v5289_v8 }
  0xc6   :  { %4738 = vmatprep.mubr.msk.bf16.mxu0 %vm234_vm0, %v5290_v9 }
  0xcd   :  { %4739 = vmatmul.mubr.msk.bf16.gmra.mrb[28].mxu0 %vm234_vm0, %v5291_v10 }
  0xce   :  { %4768 = vmatprep.mubr.msk.bf16.mxu0 %vm234_vm0, %v5292_v11 }
  0xd5   :  { %4769 = vmatmul.mubr.msk.bf16.vlgmr.msra.gmra.mrb[0].mxu0 %vm234_vm0, %v5293_v12 }
  0xfb   :  { %v4752_v5 = vpop.f32.mrb[0].mxu1 }
  0xfc   :  { %v785_v6 = vpop.f32.mrb[1].mxu1 }
 0x159   :  { %v4755_v7 = vpop.f32.mrb[2].mxu1 }
 0x15a   :  { %v795_v8 = vpop.f32.mrb[3].mxu1 }
 0x1a8   :  { %v4770_v18 = vpop.f32.mrb[0].mxu0 }
 0x1a9   :  { %v5206_v21 = vadd.f32 %v4770_v18, %v457_v16  ;;  %v862_v22 = vpop.f32.mrb[1].mxu0 }
 0x1aa   :  { %v5207_v23 = vadd.f32 %v862_v22, %v447_v14  ;;  %v4771_v24 = vpop.f32.mrb[2].mxu0 }
 0x1ab   :  { %v5208_v25 = vadd.f32 %v4771_v24, %v462_v19  ;;  %v865_v26 = vpop.f32.mrb[3].mxu0  ;;  %v883_v29 = vmax.f32 %v5206_v21, 0.0 }
 0x1ac   :  { %v881_v27 = vmax.f32 %v5207_v23, 0.0  ;;  %v5209_v28 = vadd.f32 %v865_v26, %v452_v13 }
 0x1ad   :  { %v884_v30 = vmax.f32 %v5208_v25, 0.0 }
 0x1ae   :  { %v882_v32 = vmax.f32 %v5209_v28, 0.0  ;;  %901 = vrot.lane.b32.xlu1 %v881_v27, %s5432_s25 }
 0x1af   :  { %v928_v33 = vpack.c.bf16 %v884_v30, %v883_v29 }
 0x1b0   :  { %903 = vrot.lane.b32.xlu0 %v882_v32, %s5432_s25  ;;  %v927_v34 = vpack.c.bf16 %v882_v32, %v881_v27 }
 0x1b2   :  { %905 = vrot.lane.b32.xlu1 %v883_v29, %s5432_s25 }
 0x1b4   :  { %907 = vrot.lane.b32.xlu0 %v884_v30, %s5432_s25 }
 0x1b6   :  { %913 = vrot.lane.b32.xlu1 %v881_v27, %s5433_s19 }
 0x1b8   :  { %915 = vrot.lane.b32.xlu0 %v882_v32, %s5433_s19 }
 0x1ba   :  { %917 = vrot.lane.b32.xlu1 %v883_v29, %s5433_s19 }
 0x1bc   :  { %919 = vrot.lane.b32.xlu0 %v884_v30, %s5433_s19 }
 0x1be   :  { %1030 = vperm.xlu1 %5275, %v885_v37  }
 0x1c0   :  { %1035 = vperm.xlu0 %5274, %v886_v39  }
 0x1c2   :  { %1040 = vperm.xlu1 %5275, %v887_v40  }
 0x1c4   :  { %1045 = vperm.xlu0 %5274, %v888_v41  }
 0x1c6   :  { %1050 = vperm.xlu1 %5275, %v889_v42  }
 0x1c8   :  { %1055 = vperm.xlu0 %5274, %v890_v43  }
 0x1ca   :  { %1060 = vperm.xlu1 %5275, %v891_v44  }
 0x1cc   :  { %1065 = vperm.xlu0 %5274, %v892_v45  }
 0x220   :  { %v902_v46 = vpop.permute.xlu1 %901 }
 0x221   :  { %v909_v48 = vmul.f32 %v5572_v20, %v902_v46 }
 0x222   :  { %v904_v47 = vpop.permute.xlu0 %903 }
 0x223   :  { %v910_v49 = vmul.f32 %v5572_v20, %v904_v47 }
 0x224   :  { %v906_v50 = vpop.permute.xlu1 %905 }
 0x225   :  { %v925_v51 = vpack.c.bf16 %v910_v49, %v909_v48  ;;  %v911_v53 = vmul.f32 %v5572_v20, %v906_v50 }
 0x226   :  { %v908_v52 = vpop.permute.xlu0 %907 }
 0x227   :  { %v912_v54 = vmul.f32 %v5572_v20, %v908_v52  ;;  %4772 = vmatprep.subr.bf16.mxu1 %v925_v51 }
 0x228   :  { %4773 = vmatpush3.bf16.msra.mxu1 %v925_v51  ;;  %v914_v57 = vpop.permute.xlu1 %913 }
 0x229   :  { %v926_v55 = vpack.c.bf16 %v912_v54, %v911_v53  ;;  %v921_v60 = vmul.f32 %v5581_v31, %v914_v57  ;;  %v48_v53 = vld [vmem:[%s6682_s8 + $0x20] sm:$0xff]  ;;  %v5298_v54 = vld [vmem:[%s6680_s6 + $0x10] sm:$0xff]   ;;  %v51_v57 = vld [vmem:[%s6682_s8 + $0x38] sm:$0xff] }
 0x22a   :  { %v916_v56 = vpop.permute.xlu0 %915  ;;  %4818 = vmatprep.mubr.msk.bf16.mxu0 %vm234_vm0, %v5298_v54 }
 0x22b   :  { %4774 = vmatprep.subr.bf16.mxu1 %v926_v55  ;;  %v922_v58 = vmul.f32 %v5581_v31, %v916_v56  ;;  %v50_v56 = vld [vmem:[%s6682_s8 + $0x30] sm:$0xff] }
 0x22c   :  { %4775 = vmatpush3.bf16.msra.mxu1 %v926_v55  ;;  %v918_v61 = vpop.permute.xlu1 %917  ;;  %v49_v55 = vld [vmem:[%s6682_s8 + $0x28] sm:$0xff] }
 0x22d   :  { %4776 = vmatprep.subr.bf16.mxu1 %v927_v34  ;;  %v929_v62 = vpack.c.bf16 %v922_v58, %v921_v60  ;;  %v923_v0 = vmul.f32 %v5581_v31, %v918_v61 }
 0x22e   :  { %v920_v59 = vpop.permute.xlu0 %919 }
 0x22f   :  { %v924_v63 = vmul.f32 %v5581_v31, %v920_v59 }
 0x230   :  { %4777 = vmatpush3.bf16.msra.mxu1 %v927_v34 }
 0x231   :  { %4778 = vmatprep.subr.bf16.mxu1 %v928_v33  ;;  %v930_v1 = vpack.c.bf16 %v924_v63, %v923_v0 }
 0x234   :  { %4779 = vmatpush3.bf16.msra.mxu1 %v928_v33 }
 0x235   :  { %4780 = vmatprep.subr.bf16.mxu1 %v929_v62 }
 0x238   :  { %4781 = vmatpush3.bf16.msra.mxu1 %v929_v62 }
 0x239   :  { %4782 = vmatprep.subr.bf16.mxu1 %v930_v1 }
 0x23c   :  { %4783 = vmatpush3.bf16.msra.mxu1 %v930_v1 }
 0x23d   :  { %v1031_v9 = vpop.permute.xlu1 %1030 }
 0x23f   :  { %4785 = vmatmul.mubr.msk.bf16.vlgmr.msra.gmra.mrb[4].mxu1 %vm234_vm0, %v5295_v2  ;;  %v1036_v10 = vpop.permute.xlu0 %1035 }
 0x240   :  { %4788 = vmatprep.mubr.msk.bf16.mxu1 %vm234_vm0, %v5296_v3 }
 0x241   :  { %v1041_v11 = vpop.permute.xlu1 %1040 }
 0x243   :  { %v1046_v15 = vpop.permute.xlu0 %1045 }
 0x245   :  { %v1051_v27 = vpop.permute.xlu1 %1050 }
 0x247   :  { %4789 = vmatmul.mubr.msk.bf16.gmra.mrb[8].mxu1 %vm234_vm0, %v5297_v4  ;;  %v1056_v30 = vpop.permute.xlu0 %1055 }
 0x249   :  { %v1061_v34 = vpop.permute.xlu1 %1060 }
 0x24b   :  { %v1066_v39 = vpop.permute.xlu0 %1065 }
 0x312   :  { %v4786_v12 = vpop.f32.mrb[4].mxu1 }
 0x313   :  { %v5743_v13 = vadd.f32 %v4786_v12, %v1041_v11  ;;  %v997_v14 = vpop.f32.mrb[5].mxu1 }
 0x314   :  { %v5745_v16 = vadd.f32 %v1031_v9, %v997_v14  ;;  %v4787_v17 = vpop.f32.mrb[6].mxu1 }
 0x315   :  { %v1080_v18 = vmul.f32 1.442695, %v5743_v13  ;;  %v5748_v19 = vadd.f32 %v4787_v17, %v1046_v15  ;;  %v1000_v21 = vpop.f32.mrb[7].mxu1  ;;  %v5299_v15 = vld [vmem:[%s6680_s6 + $0x18] sm:$0xff]  }
 0x316   :  { %v1076_v22 = vmul.f32 1.442695, %v5745_v16  ;;  %v5751_v23 = vadd.f32 %v1036_v10, %v1000_v21  ;;  %v4187_v21 = vld [vmem:[%s6679_s5 + $0x20] sm:$0xff] }
 0x317   :  { %5340 = vpow2.f32 %v1080_v18  ;;  %v1082_v24 = vmul.f32 1.442695, %v5748_v19  ;;  %4800 = vmatprep.mubr.msk.f32.mxu1 %vm706_vm1, %v4187_v21 }
 0x318   :  { %5342 = vpow2.f32 %v1076_v22  ;;  %v1078_v25 = vmul.f32 1.442695, %v5751_v23  ;;  %v4188_v22 = vld [vmem:[%s6679_s5 + $0x28] sm:$0xff] }
 0x319   :  { %5344 = vpow2.f32 %v1082_v24 }
 0x31a   :  { %5346 = vpow2.f32 %v1078_v25  ;;  %v4790_v26 = vpop.f32.mrb[8].mxu1 }
 0x31b   :  { %v1013_v28 = vpop.f32.mrb[9].mxu1  ;;  %v1074_v36 = vadd.f32 %v4790_v26, %v1061_v34 }
 0x31c   :  { %v4791_v29 = vpop.f32.mrb[10].mxu1  ;;  %v1072_v40 = vadd.f32 %v1051_v27, %v1013_v28 }
 0x31d   :  { %v1016_v32 = vpop.f32.mrb[11].mxu1  ;;  %v1075_v44 = vadd.f32 %v4791_v29, %v1066_v39 }
 0x31e   :  { %v1073_v47 = vadd.f32 %v1056_v30, %v1016_v32 }
 0x321   :  { %v5341_v33 = vpop.eup %5340 }
 0x322   :  { %v5343_v35 = vpop.eup %5342  ;;  %v1086_v37 = vmul.f32 %v5341_v33, %v795_v8 }
 0x323   :  { %v5345_v38 = vpop.eup %5344  ;;  %v1084_v41 = vmul.f32 %v5343_v35, %v785_v6 }
 0x324   :  { %v5347_v42 = vpop.eup %5346  ;;  %v1090_v43 = vadd.f32 %v1086_v37, %v1074_v36  ;;  %v1087_v45 = vmul.f32 %v5345_v38, %v4755_v7 }
 0x325   :  { %v1088_v46 = vadd.f32 %v1084_v41, %v1072_v40  ;;  %v1085_v48 = vmul.f32 %v5347_v42, %v4752_v5  ;;  %v4189_v41 = vld [vmem:[%s6679_s5 + $0x30] sm:$0xff]  ;;  %v4190_v42 = vld [vmem:[%s6679_s5 + $0x38] sm:$0xff] }
 0x326   :  { %v1091_v49 = vadd.f32 %v1087_v45, %v1075_v44  ;;  %v5300_v44 = vld [vmem:[%s6683_s9 + $0x20] sm:$0xff]   ;;  %v4204_v45 = vld [vmem:[%s6684_s10 + $0x48] sm:$0xff] }
 0x327   :  { %v1089_v50 = vadd.f32 %v1085_v48, %v1073_v47  ;;  %1096 = vrot.lane.b32.xlu1 %v1088_v46, %s5432_s25  ;;  %v4206_v47 = vld [vmem:[%s6684_s10 + $0x58] sm:$0xff]  ;;  %v4207_v48 = vld [vmem:[%s6684_s10 + $0x60] sm:$0xff] }
 0x328   :  { %v1123_v51 = vpack.c.bf16 %v1091_v49, %v1090_v43 }
 0x329   :  { %v1122_v52 = vpack.c.bf16 %v1089_v50, %v1088_v46  ;;  %1098 = vrot.lane.b32.xlu0 %v1089_v50, %s5432_s25 }
 0x32b   :  { %1100 = vrot.lane.b32.xlu1 %v1090_v43, %s5432_s25  ;;  %5151 = vmatprep.subr.bf16.mxu1 %v1122_v52 }
 0x32c   :  { %5153 = vmatpush3.bf16.msra.mxu1 %v1122_v52 }
 0x32d   :  { %1102 = vrot.lane.b32.xlu0 %v1091_v49, %s5432_s25  ;;  %5155 = vmatprep.subr.bf16.mxu1 %v1123_v51 }
 0x32f   :  { %1108 = vrot.lane.b32.xlu1 %v1088_v46, %s5433_s19  ;;  %v4205_v46 = vld [vmem:[%s6684_s10 + $0x50] sm:$0xff] }
 0x330   :  { %5157 = vmatpush3.bf16.msra.mxu1 %v1123_v51 }
 0x331   :  { %1110 = vrot.lane.b32.xlu0 %v1089_v50, %s5433_s19  ;;  %v4209_v50 = vld [vmem:[%s6684_s10 + $0x70] sm:$0xff] }
 0x333   :  { %1112 = vrot.lane.b32.xlu1 %v1090_v43, %s5433_s19  ;;  %4801 = vmatmul.mubr.msk.f32.vlgmr.msra.gmra.mrb[12].mxu1 %vm706_vm1, %v4188_v22  ;;  %v4203_v43 = vld [vmem:[%s6684_s10 + $0x40] sm:$0xff] }
 0x334   :  { %4803 = vmatprep.mubr.msk.f32.mxu1 %vm706_vm1, %v4189_v41 }
 0x335   :  { %1114 = vrot.lane.b32.xlu0 %v1091_v49, %s5433_s19  ;;  %v4208_v49 = vld [vmem:[%s6684_s10 + $0x68] sm:$0xff] }
 0x337   :  { %466 = vperm.xlu1 %5275, %v48_v53   ;;  %4804 = vmatmul.mubr.msk.f32.gmra.mrb[14].mxu1 %vm706_vm1, %v4190_v42 }
 0x338   :  { %4834 = vmatprep.mubr.msk.bf16.mxu1 %vm234_vm0, %v5300_v44 }
 0x339   :  { %471 = vperm.xlu0 %5274, %v49_v55  }
 0x33b   :  { %476 = vperm.xlu1 %5275, %v50_v56  }
 0x33d   :  { %481 = vperm.xlu0 %5274, %v51_v57  }
 0x399   :  { %v1097_v58 = vpop.permute.xlu1 %1096 }
 0x39a   :  { %v1104_v60 = vmul.f32 %v5572_v20, %v1097_v58 }
 0x39b   :  { %v1099_v59 = vpop.permute.xlu0 %1098 }
 0x39c   :  { %v1105_v61 = vmul.f32 %v5572_v20, %v1099_v59 }
 0x39d   :  { %v1101_v62 = vpop.permute.xlu1 %1100 }
 0x39e   :  { %v1120_v63 = vpack.c.bf16 %v1105_v61, %v1104_v60  ;;  %v1106_v1 = vmul.f32 %v5572_v20, %v1101_v62 }
 0x39f   :  { %v1103_v0 = vpop.permute.xlu0 %1102 }
 0x3a0   :  { %v1107_v2 = vmul.f32 %v5572_v20, %v1103_v0  ;;  %4806 = vmatprep.subr.bf16.mxu0 %v1120_v63 }
 0x3a1   :  { %4807 = vmatpush3.bf16.msra.mxu0 %v1120_v63  ;;  %v1109_v5 = vpop.permute.xlu1 %1108 }
 0x3a2   :  { %v1121_v3 = vpack.c.bf16 %v1107_v2, %v1106_v1  ;;  %v1116_v8 = vmul.f32 %v5581_v31, %v1109_v5 }
 0x3a3   :  { %v1111_v4 = vpop.permute.xlu0 %1110 }
 0x3a4   :  { %4808 = vmatprep.subr.bf16.mxu0 %v1121_v3  ;;  %v1117_v6 = vmul.f32 %v5581_v31, %v1111_v4 }
 0x3a5   :  { %4809 = vmatpush3.bf16.msra.mxu0 %v1121_v3  ;;  %v1113_v9 = vpop.permute.xlu1 %1112 }
 0x3a6   :  { %4810 = vmatprep.subr.bf16.mxu0 %v1122_v52  ;;  %v1124_v10 = vpack.c.bf16 %v1117_v6, %v1116_v8  ;;  %v1118_v12 = vmul.f32 %v5581_v31, %v1113_v9  ;;  %v5301_v8 = vld [vmem:[%s6683_s9 + $0x28] sm:$0xff]   ;;  %v5302_v9 = vld [vmem:[%s6683_s9 + $0x30] sm:$0xff]  }
 0x3a7   :  { %v1115_v7 = vpop.permute.xlu0 %1114 }
 0x3a8   :  { %v1119_v11 = vmul.f32 %v5581_v31, %v1115_v7 }
 0x3a9   :  { %4811 = vmatpush3.bf16.msra.mxu0 %v1122_v52 }
 0x3aa   :  { %4812 = vmatprep.subr.bf16.mxu0 %v1123_v51  ;;  %v1125_v14 = vpack.c.bf16 %v1119_v11, %v1118_v12 }
 0x3ad   :  { %4813 = vmatpush3.bf16.msra.mxu0 %v1123_v51  ;;  %v4210_v51 = vld [vmem:[%s6684_s10 + $0x78] sm:$0xff] }
 0x3ae   :  { %4814 = vmatprep.subr.bf16.mxu0 %v1124_v10 }
 0x3b1   :  { %4815 = vmatpush3.bf16.msra.mxu0 %v1124_v10  ;;  %v5303_v10 = vld [vmem:[%s6683_s9 + $0x38] sm:$0xff]  }
 0x3b2   :  { %4816 = vmatprep.subr.bf16.mxu0 %v1125_v14 }
 0x3b5   :  { %4817 = vmatpush3.bf16.msra.mxu0 %v1125_v14 }
 0x3b6   :  { %v467_v17 = vpop.permute.xlu1 %466 }
 0x3b8   :  { %4819 = vmatmul.mubr.msk.bf16.vlgmr.msra.gmra.mrb[4].mxu0 %vm234_vm0, %v5299_v15  ;;  %v472_v18 = vpop.permute.xlu0 %471 }
 0x3ba   :  { %v477_v24 = vpop.permute.xlu1 %476 }
 0x3bc   :  { %v482_v28 = vpop.permute.xlu0 %481 }
 0x406   :  { %v4802_v11 = vpop.f32.mrb[12].mxu1 }
 0x407   :  { %v1209_v12 = vpop.f32.mrb[13].mxu1 }
 0x40a   :  { %v4805_v14 = vpop.f32.mrb[14].mxu1 }
 0x40b   :  { %v1219_v15 = vpop.f32.mrb[15].mxu1 }
 0x48b   :  { %v4820_v25 = vpop.f32.mrb[4].mxu0 }
 0x48c   :  { %v5210_v26 = vadd.f32 %v4820_v25, %v477_v24  ;;  %v1287_v27 = vpop.f32.mrb[5].mxu0 }
 0x48d   :  { %v5211_v29 = vadd.f32 %v1287_v27, %v467_v17  ;;  %v4821_v30 = vpop.f32.mrb[6].mxu0 }
 0x48e   :  { %v5212_v32 = vadd.f32 %v4821_v30, %v482_v28  ;;  %v1290_v33 = vpop.f32.mrb[7].mxu0  ;;  %v1308_v36 = vmax.f32 %v5210_v26, 0.0 }
 0x48f   :  { %v1306_v34 = vmax.f32 %v5211_v29, 0.0  ;;  %v5213_v35 = vadd.f32 %v1290_v33, %v472_v18 }
 0x490   :  { %v1309_v37 = vmax.f32 %v5212_v32, 0.0 }
 0x491   :  { %v1307_v38 = vmax.f32 %v5213_v35, 0.0  ;;  %1328 = vrot.lane.b32.xlu1 %v1306_v34, %s5432_s25 }
 0x492   :  { %v1355_v39 = vpack.c.bf16 %v1309_v37, %v1308_v36 }
 0x493   :  { %1330 = vrot.lane.b32.xlu0 %v1307_v38, %s5432_s25  ;;  %v1354_v40 = vpack.c.bf16 %v1307_v38, %v1306_v34 }
 0x495   :  { %1332 = vrot.lane.b32.xlu1 %v1308_v36, %s5432_s25 }
 0x497   :  { %1334 = vrot.lane.b32.xlu0 %v1309_v37, %s5432_s25 }
 0x499   :  { %1340 = vrot.lane.b32.xlu1 %v1306_v34, %s5433_s19 }
 0x49b   :  { %1342 = vrot.lane.b32.xlu0 %v1307_v38, %s5433_s19 }
 0x49d   :  { %1344 = vrot.lane.b32.xlu1 %v1308_v36, %s5433_s19 }
 0x49f   :  { %1346 = vrot.lane.b32.xlu0 %v1309_v37, %s5433_s19 }
 0x4a1   :  { %1457 = vperm.xlu1 %5275, %v4203_v43  }
 0x4a3   :  { %1462 = vperm.xlu0 %5274, %v4204_v45  }
 0x4a5   :  { %1467 = vperm.xlu1 %5275, %v4205_v46  }
 0x4a7   :  { %1472 = vperm.xlu0 %5274, %v4206_v47  }
 0x4a9   :  { %1477 = vperm.xlu1 %5275, %v4207_v48  }
 0x4ab   :  { %1482 = vperm.xlu0 %5274, %v4208_v49  }
 0x4ad   :  { %1487 = vperm.xlu1 %5275, %v4209_v50  }
 0x4af   :  { %1492 = vperm.xlu0 %5274, %v4210_v51  }
 0x503   :  { %v1329_v52 = vpop.permute.xlu1 %1328 }
 0x504   :  { %v1336_v54 = vmul.f32 %v5572_v20, %v1329_v52 }
 0x505   :  { %v1331_v53 = vpop.permute.xlu0 %1330 }
 0x506   :  { %v1337_v55 = vmul.f32 %v5572_v20, %v1331_v53 }
 0x507   :  { %v1333_v56 = vpop.permute.xlu1 %1332 }
 0x508   :  { %v1352_v57 = vpack.c.bf16 %v1337_v55, %v1336_v54  ;;  %v1338_v59 = vmul.f32 %v5572_v20, %v1333_v56 }
 0x509   :  { %v1335_v58 = vpop.permute.xlu0 %1334 }
 0x50a   :  { %v1339_v60 = vmul.f32 %v5572_v20, %v1335_v58  ;;  %4822 = vmatprep.subr.bf16.mxu1 %v1352_v57 }
 0x50b   :  { %4823 = vmatpush3.bf16.msra.mxu1 %v1352_v57  ;;  %v1341_v63 = vpop.permute.xlu1 %1340 }
 0x50c   :  { %v1353_v61 = vpack.c.bf16 %v1339_v60, %v1338_v59  ;;  %v1348_v2 = vmul.f32 %v5581_v31, %v1341_v63  ;;  %v52_v63 = vld [vmem:[%s6682_s8 + $0x40] sm:$0xff] }
 0x50d   :  { %v1343_v62 = vpop.permute.xlu0 %1342 }
 0x50e   :  { %4824 = vmatprep.subr.bf16.mxu1 %v1353_v61  ;;  %v1349_v0 = vmul.f32 %v5581_v31, %v1343_v62 }
 0x50f   :  { %4825 = vmatpush3.bf16.msra.mxu1 %v1353_v61  ;;  %v1345_v3 = vpop.permute.xlu1 %1344 }
 0x510   :  { %4826 = vmatprep.subr.bf16.mxu1 %v1354_v40  ;;  %v1356_v4 = vpack.c.bf16 %v1349_v0, %v1348_v2  ;;  %v1350_v6 = vmul.f32 %v5581_v31, %v1345_v3  ;;  %v5304_v0 = vld [vmem:[%s6680_s6 + $0x20] sm:$0xff]   ;;  %v54_v2 = vld [vmem:[%s6682_s8 + $0x50] sm:$0xff]  ;;  %v55_v3 = vld [vmem:[%s6682_s8 + $0x58] sm:$0xff] }
 0x511   :  { %v1347_v1 = vpop.permute.xlu0 %1346  ;;  %4868 = vmatprep.mubr.msk.bf16.mxu0 %vm234_vm0, %v5304_v0 }
 0x512   :  { %v1351_v5 = vmul.f32 %v5581_v31, %v1347_v1  ;;  %v53_v1 = vld [vmem:[%s6682_s8 + $0x48] sm:$0xff] }
 0x513   :  { %4827 = vmatpush3.bf16.msra.mxu1 %v1354_v40 }
 0x514   :  { %4828 = vmatprep.subr.bf16.mxu1 %v1355_v39  ;;  %v1357_v7 = vpack.c.bf16 %v1351_v5, %v1350_v6 }
 0x517   :  { %4829 = vmatpush3.bf16.msra.mxu1 %v1355_v39 }
 0x518   :  { %4830 = vmatprep.subr.bf16.mxu1 %v1356_v4 }
 0x51b   :  { %4831 = vmatpush3.bf16.msra.mxu1 %v1356_v4 }
 0x51c   :  { %4832 = vmatprep.subr.bf16.mxu1 %v1357_v7 }
 0x51f   :  { %4833 = vmatpush3.bf16.msra.mxu1 %v1357_v7 }
 0x520   :  { %v1458_v17 = vpop.permute.xlu1 %1457 }
 0x522   :  { %4835 = vmatmul.mubr.msk.bf16.vlgmr.msra.gmra.mrb[16].mxu1 %vm234_vm0, %v5301_v8  ;;  %v1463_v18 = vpop.permute.xlu0 %1462 }
 0x523   :  { %4838 = vmatprep.mubr.msk.bf16.mxu1 %vm234_vm0, %v5302_v9 }
 0x524   :  { %v1468_v21 = vpop.permute.xlu1 %1467 }
 0x526   :  { %v1473_v26 = vpop.permute.xlu0 %1472 }
 0x528   :  { %v1478_v38 = vpop.permute.xlu1 %1477 }
 0x52a   :  { %4839 = vmatmul.mubr.msk.bf16.gmra.mrb[20].mxu1 %vm234_vm0, %v5303_v10  ;;  %v1483_v41 = vpop.permute.xlu0 %1482 }
 0x52c   :  { %v1488_v44 = vpop.permute.xlu1 %1487 }
 0x52e   :  { %v1493_v49 = vpop.permute.xlu0 %1492 }
 0x5f5   :  { %v4836_v22 = vpop.f32.mrb[16].mxu1 }
 0x5f6   :  { %v5863_v24 = vadd.f32 %v4836_v22, %v1468_v21  ;;  %v1424_v25 = vpop.f32.mrb[17].mxu1 }
 0x5f7   :  { %v5865_v27 = vadd.f32 %v1458_v17, %v1424_v25  ;;  %v4837_v28 = vpop.f32.mrb[18].mxu1 }
 0x5f8   :  { %v1507_v29 = vmul.f32 1.442695, %v5863_v24  ;;  %v5868_v30 = vadd.f32 %v4837_v28, %v1473_v26  ;;  %v1427_v32 = vpop.f32.mrb[19].mxu1 }
 0x5f9   :  { %v1503_v33 = vmul.f32 1.442695, %v5865_v27  ;;  %v5871_v34 = vadd.f32 %v1463_v18, %v1427_v32  ;;  %v5305_v32 = vld [vmem:[%s6680_s6 + $0x28] sm:$0xff]  }
 0x5fa   :  { %5348 = vpow2.f32 %v1507_v29  ;;  %v1509_v35 = vmul.f32 1.442695, %v5868_v30 }
 0x5fb   :  { %5350 = vpow2.f32 %v1503_v33  ;;  %v1505_v36 = vmul.f32 1.442695, %v5871_v34 }
 0x5fc   :  { %5352 = vpow2.f32 %v1509_v35 }
 0x5fd   :  { %5354 = vpow2.f32 %v1505_v36  ;;  %v4840_v37 = vpop.f32.mrb[20].mxu1  ;;  %v4227_v36 = vld [vmem:[%s6679_s5 + $0x40] sm:$0xff] }
 0x5fe   :  { %v1440_v39 = vpop.f32.mrb[21].mxu1  ;;  %v1501_v46 = vadd.f32 %v4840_v37, %v1488_v44  ;;  %4850 = vmatprep.mubr.msk.f32.mxu1 %vm706_vm1, %v4227_v36 }
 0x5ff   :  { %v4841_v40 = vpop.f32.mrb[22].mxu1  ;;  %v1499_v50 = vadd.f32 %v1478_v38, %v1440_v39 }
 0x600   :  { %v1443_v42 = vpop.f32.mrb[23].mxu1  ;;  %v1502_v54 = vadd.f32 %v4841_v40, %v1493_v49 }
 0x601   :  { %v1500_v57 = vadd.f32 %v1483_v41, %v1443_v42 }
 0x604   :  { %v5349_v43 = vpop.eup %5348 }
 0x605   :  { %v5351_v45 = vpop.eup %5350  ;;  %v1513_v47 = vmul.f32 %v5349_v43, %v1219_v15 }
 0x606   :  { %v5353_v48 = vpop.eup %5352  ;;  %v1511_v51 = vmul.f32 %v5351_v45, %v1209_v12 }
 0x607   :  { %v5355_v52 = vpop.eup %5354  ;;  %v1517_v53 = vadd.f32 %v1513_v47, %v1501_v46  ;;  %v1514_v55 = vmul.f32 %v5353_v48, %v4805_v14 }
 0x608   :  { %v1515_v56 = vadd.f32 %v1511_v51, %v1499_v50  ;;  %v1512_v58 = vmul.f32 %v5355_v52, %v4802_v11 }
 0x609   :  { %v1518_v59 = vadd.f32 %v1514_v55, %v1502_v54  ;;  %v4230_v54 = vld [vmem:[%s6679_s5 + $0x58] sm:$0xff]  ;;  %v4243_v55 = vld [vmem:[%s6684_s10 + $0x80] sm:$0xff] }
 0x60a   :  { %v1516_v60 = vadd.f32 %v1512_v58, %v1500_v57  ;;  %1523 = vrot.lane.b32.xlu1 %v1515_v56, %s5432_s25  ;;  %v4244_v57 = vld [vmem:[%s6684_s10 + $0x88] sm:$0xff]  ;;  %v4245_v58 = vld [vmem:[%s6684_s10 + $0x90] sm:$0xff] }
 0x60b   :  { %v1550_v61 = vpack.c.bf16 %v1518_v59, %v1517_v53 }
 0x60c   :  { %v1549_v62 = vpack.c.bf16 %v1516_v60, %v1515_v56  ;;  %1525 = vrot.lane.b32.xlu0 %v1516_v60, %s5432_s25 }
 0x60e   :  { %1527 = vrot.lane.b32.xlu1 %v1517_v53, %s5432_s25  ;;  %5159 = vmatprep.subr.bf16.mxu1 %v1549_v62 }
 0x60f   :  { %5161 = vmatpush3.bf16.msra.mxu1 %v1549_v62 }
 0x610   :  { %1529 = vrot.lane.b32.xlu0 %v1518_v59, %s5432_s25  ;;  %5163 = vmatprep.subr.bf16.mxu1 %v1550_v61 }
 0x612   :  { %1535 = vrot.lane.b32.xlu1 %v1515_v56, %s5433_s19  ;;  %v5306_v56 = vld [vmem:[%s6683_s9 + $0x40] sm:$0xff]  }
 0x613   :  { %5165 = vmatpush3.bf16.msra.mxu1 %v1550_v61 }
 0x614   :  { %1537 = vrot.lane.b32.xlu0 %v1516_v60, %s5433_s19  ;;  %v4247_v60 = vld [vmem:[%s6684_s10 + $0xa0] sm:$0xff] }
 0x616   :  { %1539 = vrot.lane.b32.xlu1 %v1517_v53, %s5433_s19  ;;  %v4229_v53 = vld [vmem:[%s6679_s5 + $0x50] sm:$0xff] }
 0x618   :  { %1541 = vrot.lane.b32.xlu0 %v1518_v59, %s5433_s19  ;;  %v4246_v59 = vld [vmem:[%s6684_s10 + $0x98] sm:$0xff] }
 0x61a   :  { %486 = vperm.xlu1 %5275, %v52_v63   ;;  %v4250_v63 = vld [vmem:[%s6684_s10 + $0xb8] sm:$0xff] }
 0x61c   :  { %491 = vperm.xlu0 %5274, %v53_v1  }
 0x61e   :  { %496 = vperm.xlu1 %5275, %v54_v2   ;;  %v5966_v2 = vld [vmem:[%s6676_s2] ss:$0 sm:$0xff] }
 0x620   :  { %501 = vperm.xlu0 %5274, %v55_v3  }
 0x67c   :  { %v1524_v4 = vpop.permute.xlu1 %1523 }
 0x67d   :  { %v1531_v6 = vmul.f32 %v5572_v20, %v1524_v4 }
 0x67e   :  { %v1526_v5 = vpop.permute.xlu0 %1525 }
 0x67f   :  { %v1532_v7 = vmul.f32 %v5572_v20, %v1526_v5 }
 0x680   :  { %v1528_v8 = vpop.permute.xlu1 %1527 }
 0x681   :  { %v1547_v9 = vpack.c.bf16 %v1532_v7, %v1531_v6  ;;  %v1533_v11 = vmul.f32 %v5572_v20, %v1528_v8 }
 0x682   :  { %v1530_v10 = vpop.permute.xlu0 %1529 }
 0x683   :  { %v1534_v12 = vmul.f32 %v5572_v20, %v1530_v10  ;;  %4856 = vmatprep.subr.bf16.mxu0 %v1547_v9 }
 0x684   :  { %4857 = vmatpush3.bf16.msra.mxu0 %v1547_v9  ;;  %v1536_v17 = vpop.permute.xlu1 %1535 }
 0x685   :  { %v1548_v14 = vpack.c.bf16 %v1534_v12, %v1533_v11  ;;  %v1543_v22 = vmul.f32 %v5581_v31, %v1536_v17 }
 0x686   :  { %v1538_v15 = vpop.permute.xlu0 %1537 }
 0x687   :  { %4858 = vmatprep.subr.bf16.mxu0 %v1548_v14  ;;  %v1544_v18 = vmul.f32 %v5581_v31, %v1538_v15 }
 0x688   :  { %4859 = vmatpush3.bf16.msra.mxu0 %v1548_v14  ;;  %v1540_v25 = vpop.permute.xlu1 %1539  ;;  %v5975_v14 = vld [vmem:[%s6677_s3] ss:$0 sm:$0xff] }
 0x689   :  { %4860 = vmatprep.subr.bf16.mxu0 %v1549_v62  ;;  %v1551_v26 = vpack.c.bf16 %v1544_v18, %v1543_v22  ;;  %v1545_v20 = vmul.f32 %v5581_v31, %v1540_v25 }
 0x68a   :  { %v1542_v21 = vpop.permute.xlu0 %1541 }
 0x68b   :  { %v1546_v28 = vmul.f32 %v5581_v31, %v1542_v21  ;;  %v4228_v31 = vld [vmem:[%s6679_s5 + $0x48] sm:$0xff] }
 0x68c   :  { %4861 = vmatpush3.bf16.msra.mxu0 %v1549_v62  ;;  %4851 = vmatmul.mubr.msk.f32.vlgmr.msra.gmra.mrb[24].mxu1 %vm706_vm1, %v4228_v31  ;;  %v4249_v62 = vld [vmem:[%s6684_s10 + $0xb0] sm:$0xff] }
 0x68d   :  { %4862 = vmatprep.subr.bf16.mxu0 %v1550_v61  ;;  %v1552_v29 = vpack.c.bf16 %v1546_v28, %v1545_v20  ;;  %4853 = vmatprep.mubr.msk.f32.mxu1 %vm706_vm1, %v4229_v53  ;;  %v5307_v20 = vld [vmem:[%s6683_s9 + $0x48] sm:$0xff]   ;;  %v1520_v53 = vadd.f32 %v5871_v34, %v5751_v23 }
 0x690   :  { %4863 = vmatpush3.bf16.msra.mxu0 %v1550_v61  ;;  %4854 = vmatmul.mubr.msk.f32.gmra.mrb[26].mxu1 %vm706_vm1, %v4230_v54  ;;  %v4248_v61 = vld [vmem:[%s6684_s10 + $0xa8] sm:$0xff] }
 0x691   :  { %4864 = vmatprep.subr.bf16.mxu0 %v1551_v26  ;;  %4884 = vmatprep.mubr.msk.bf16.mxu1 %vm234_vm0, %v5306_v56 }
 0x694   :  { %4865 = vmatpush3.bf16.msra.mxu0 %v1551_v26 }
 0x695   :  { %4866 = vmatprep.subr.bf16.mxu0 %v1552_v29 }
 0x698   :  { %4867 = vmatpush3.bf16.msra.mxu0 %v1552_v29  ;;  %v5308_v29 = vld [vmem:[%s6683_s9 + $0x50] sm:$0xff]  }
 0x699   :  { %v487_v33 = vpop.permute.xlu1 %486 }
 0x69b   :  { %4869 = vmatmul.mubr.msk.bf16.vlgmr.msra.gmra.mrb[8].mxu0 %vm234_vm0, %v5305_v32  ;;  %v492_v35 = vpop.permute.xlu0 %491  ;;  %v5309_v32 = vld [vmem:[%s6683_s9 + $0x58] sm:$0xff]  }
 0x69d   :  { %v497_v37 = vpop.permute.xlu1 %496 }
 0x69f   :  { %v502_v41 = vpop.permute.xlu0 %501 }
 0x76e   :  { %v4870_v38 = vpop.f32.mrb[8].mxu0 }
 0x76f   :  { %v5214_v39 = vadd.f32 %v4870_v38, %v497_v37  ;;  %v1714_v40 = vpop.f32.mrb[9].mxu0 }
 0x770   :  { %v5215_v42 = vadd.f32 %v1714_v40, %v487_v33  ;;  %v4871_v43 = vpop.f32.mrb[10].mxu0  ;;  %v4852_v33 = vpop.f32.mrb[24].mxu1 }
 0x771   :  { %v5216_v44 = vadd.f32 %v4871_v43, %v502_v41  ;;  %v1717_v45 = vpop.f32.mrb[11].mxu0  ;;  %v1735_v48 = vmax.f32 %v5214_v39, 0.0  ;;  %v1521_v41 = vadd.f32 %v5863_v24, %v5743_v13 }
 0x772   :  { %v1733_v46 = vmax.f32 %v5215_v42, 0.0  ;;  %v5217_v47 = vadd.f32 %v1717_v45, %v492_v35  ;;  %v1636_v35 = vpop.f32.mrb[25].mxu1 }
 0x773   :  { %v1736_v49 = vmax.f32 %v5216_v44, 0.0  ;;  %v4855_v36 = vpop.f32.mrb[26].mxu1  ;;  %v1519_v44 = vadd.f32 %v5865_v27, %v5745_v16 }
 0x774   :  { %v1734_v50 = vmax.f32 %v5217_v47, 0.0  ;;  %1755 = vrot.lane.b32.xlu1 %v1733_v46, %s5432_s25  ;;  %v1646_v31 = vpop.f32.mrb[27].mxu1 }
 0x775   :  { %v1782_v51 = vpack.c.bf16 %v1736_v49, %v1735_v48 }
 0x776   :  { %1757 = vrot.lane.b32.xlu0 %v1734_v50, %s5432_s25  ;;  %v1781_v52 = vpack.c.bf16 %v1734_v50, %v1733_v46 }
 0x778   :  { %1759 = vrot.lane.b32.xlu1 %v1735_v48, %s5432_s25 }
 0x77a   :  { %1761 = vrot.lane.b32.xlu0 %v1736_v49, %s5432_s25 }
 0x77c   :  { %1767 = vrot.lane.b32.xlu1 %v1733_v46, %s5433_s19 }
 0x77e   :  { %1769 = vrot.lane.b32.xlu0 %v1734_v50, %s5433_s19 }
 0x780   :  { %1771 = vrot.lane.b32.xlu1 %v1735_v48, %s5433_s19  ;;  %v1522_v48 = vadd.f32 %v5868_v30, %v5748_v19 }
 0x782   :  { %1773 = vrot.lane.b32.xlu0 %v1736_v49, %s5433_s19 }
 0x784   :  { %1884 = vperm.xlu1 %5275, %v4243_v55  }
 0x786   :  { %1889 = vperm.xlu0 %5274, %v4244_v57  }
 0x788   :  { %1894 = vperm.xlu1 %5275, %v4245_v58  }
 0x78a   :  { %1899 = vperm.xlu0 %5274, %v4246_v59  }
 0x78c   :  { %1904 = vperm.xlu1 %5275, %v4247_v60  }
 0x78e   :  { %1909 = vperm.xlu0 %5274, %v4248_v61  }
 0x790   :  { %1914 = vperm.xlu1 %5275, %v4249_v62  }
 0x792   :  { %1919 = vperm.xlu0 %5274, %v4250_v63  }
 0x7e6   :  { %v1756_v0 = vpop.permute.xlu1 %1755 }
 0x7e7   :  { %v1763_v3 = vmul.f32 %v5966_v2, %v1756_v0 }
 0x7e8   :  { %v1758_v1 = vpop.permute.xlu0 %1757 }
 0x7e9   :  { %v1764_v4 = vmul.f32 %v5966_v2, %v1758_v1 }
 0x7ea   :  { %v1760_v5 = vpop.permute.xlu1 %1759 }
 0x7eb   :  { %v1779_v6 = vpack.c.bf16 %v1764_v4, %v1763_v3  ;;  %v1765_v8 = vmul.f32 %v5966_v2, %v1760_v5 }
 0x7ec   :  { %v1762_v7 = vpop.permute.xlu0 %1761 }
 0x7ed   :  { %v1766_v9 = vmul.f32 %v5966_v2, %v1762_v7  ;;  %4872 = vmatprep.subr.bf16.mxu1 %v1779_v6 }
 0x7ee   :  { %4873 = vmatpush3.bf16.msra.mxu1 %v1779_v6  ;;  %v1768_v12 = vpop.permute.xlu1 %1767 }
 0x7ef   :  { %v1780_v10 = vpack.c.bf16 %v1766_v9, %v1765_v8  ;;  %v1775_v18 = vmul.f32 %v5975_v14, %v1768_v12 }
 0x7f0   :  { %v1770_v11 = vpop.permute.xlu0 %1769 }
 0x7f1   :  { %4874 = vmatprep.subr.bf16.mxu1 %v1780_v10  ;;  %v1776_v15 = vmul.f32 %v5975_v14, %v1770_v11 }
 0x7f2   :  { %4875 = vmatpush3.bf16.msra.mxu1 %v1780_v10  ;;  %v1772_v21 = vpop.permute.xlu1 %1771 }
 0x7f3   :  { %4876 = vmatprep.subr.bf16.mxu1 %v1781_v52  ;;  %v1783_v22 = vpack.c.bf16 %v1776_v15, %v1775_v18  ;;  %v1777_v26 = vmul.f32 %v5975_v14, %v1772_v21  ;;  %v56_v21 = vld [vmem:[%s6682_s8 + $0x60] sm:$0xff] }
 0x7f4   :  { %v1774_v17 = vpop.permute.xlu0 %1773 }
 0x7f5   :  { %v1778_v25 = vmul.f32 %v5975_v14, %v1774_v17 }
 0x7f6   :  { %4877 = vmatpush3.bf16.msra.mxu1 %v1781_v52 }
 0x7f7   :  { %4878 = vmatprep.subr.bf16.mxu1 %v1782_v51  ;;  %v1784_v28 = vpack.c.bf16 %v1778_v25, %v1777_v26  ;;  %v57_v25 = vld [vmem:[%s6682_s8 + $0x68] sm:$0xff]  ;;  %v58_v26 = vld [vmem:[%s6682_s8 + $0x70] sm:$0xff] }
 0x7fa   :  { %4879 = vmatpush3.bf16.msra.mxu1 %v1782_v51 }
 0x7fb   :  { %4880 = vmatprep.subr.bf16.mxu1 %v1783_v22 }
 0x7fe   :  { %4881 = vmatpush3.bf16.msra.mxu1 %v1783_v22  ;;  %v5310_v22 = vld [vmem:[%s6680_s6 + $0x30] sm:$0xff]  }
 0x7ff   :  { %4882 = vmatprep.subr.bf16.mxu1 %v1784_v28  ;;  %4918 = vmatprep.mubr.msk.bf16.mxu0 %vm234_vm0, %v5310_v22 }
 0x802   :  { %4883 = vmatpush3.bf16.msra.mxu1 %v1784_v28  ;;  %v59_v28 = vld [vmem:[%s6682_s8 + $0x78] sm:$0xff] }
 0x803   :  { %v1885_v37 = vpop.permute.xlu1 %1884 }
 0x805   :  { %4885 = vmatmul.mubr.msk.bf16.vlgmr.msra.gmra.mrb[28].mxu1 %vm234_vm0, %v5307_v20  ;;  %v1890_v38 = vpop.permute.xlu0 %1889 }
 0x806   :  { %4888 = vmatprep.mubr.msk.bf16.mxu1 %vm234_vm0, %v5308_v29 }
 0x807   :  { %v1895_v39 = vpop.permute.xlu1 %1894 }
 0x809   :  { %v1900_v45 = vpop.permute.xlu0 %1899 }
 0x80b   :  { %v1905_v30 = vpop.permute.xlu1 %1904 }
 0x80d   :  { %4889 = vmatmul.mubr.msk.bf16.gmra.mrb[32].mxu1 %vm234_vm0, %v5309_v32  ;;  %v1910_v59 = vpop.permute.xlu0 %1909 }
 0x80f   :  { %v1915_v60 = vpop.permute.xlu1 %1914 }
 0x811   :  { %v1920_v1 = vpop.permute.xlu0 %1919 }
 0x8d8   :  { %v4886_v40 = vpop.f32.mrb[28].mxu1 }
 0x8d9   :  { %v1924_v42 = vadd.f32 %v4886_v40, %v1895_v39  ;;  %v1851_v43 = vpop.f32.mrb[29].mxu1 }
 0x8da   :  { %v1922_v46 = vadd.f32 %v1885_v37, %v1851_v43  ;;  %v4887_v47 = vpop.f32.mrb[30].mxu1 }
 0x8db   :  { %v1934_v49 = vmul.f32 1.442695, %v1924_v42  ;;  %v5999_v50 = vadd.f32 %v1924_v42, %v1521_v41  ;;  %v1925_v51 = vadd.f32 %v4887_v47, %v1900_v45  ;;  %v1854_v52 = vpop.f32.mrb[31].mxu1 }
 0x8dc   :  { %v1930_v13 = vmul.f32 1.442695, %v1922_v46  ;;  %v6003_v24 = vadd.f32 %v1922_v46, %v1519_v44  ;;  %v1923_v54 = vadd.f32 %v1890_v38, %v1854_v52 }
 0x8dd   :  { %5356 = vpow2.f32 %v1934_v49  ;;  %v1936_v16 = vmul.f32 1.442695, %v1925_v51  ;;  %v6005_v27 = vadd.f32 %v1925_v51, %v1522_v48  ;;  %v5311_v51 = vld [vmem:[%s6680_s6 + $0x38] sm:$0xff]  }
 0x8de   :  { %5358 = vpow2.f32 %v1930_v13  ;;  %v1932_v55 = vmul.f32 1.442695, %v1923_v54  ;;  %v6007_v56 = vadd.f32 %v1923_v54, %v1520_v53  ;;  %v4267_v13 = vld [vmem:[%s6679_s5 + $0x60] sm:$0xff]  ;;  %v4268_v54 = vld [vmem:[%s6679_s5 + $0x68] sm:$0xff] }
 0x8df   :  { %5360 = vpow2.f32 %v1936_v16  ;;  %4900 = vmatprep.mubr.msk.f32.mxu1 %vm706_vm1, %v4267_v13 }
 0x8e0   :  { %5362 = vpow2.f32 %v1932_v55  ;;  %v4890_v19 = vpop.f32.mrb[32].mxu1 }
 0x8e1   :  { %v1867_v57 = vpop.f32.mrb[33].mxu1  ;;  %v1928_v62 = vadd.f32 %v4890_v19, %v1915_v60 }
 0x8e2   :  { %v4891_v58 = vpop.f32.mrb[34].mxu1  ;;  %v1926_v3 = vadd.f32 %v1905_v30, %v1867_v57 }
 0x8e3   :  { %v1870_v23 = vpop.f32.mrb[35].mxu1  ;;  %v1929_v7 = vadd.f32 %v4891_v58, %v1920_v1 }
 0x8e4   :  { %v1927_v10 = vadd.f32 %v1910_v59, %v1870_v23 }
 0x8e7   :  { %v5357_v34 = vpop.eup %5356 }
 0x8e8   :  { %v5359_v61 = vpop.eup %5358  ;;  %v1940_v63 = vmul.f32 %v5357_v34, %v1646_v31 }
 0x8e9   :  { %v5361_v0 = vpop.eup %5360  ;;  %v1938_v4 = vmul.f32 %v5359_v61, %v1636_v35 }
 0x8ea   :  { %v5363_v5 = vpop.eup %5362  ;;  %v1944_v6 = vadd.f32 %v1940_v63, %v1928_v62  ;;  %v1941_v8 = vmul.f32 %v5361_v0, %v4855_v36 }
 0x8eb   :  { %v1942_v9 = vadd.f32 %v1938_v4, %v1926_v3  ;;  %v1939_v11 = vmul.f32 %v5363_v5, %v4852_v33  ;;  %v4269_v4 = vld [vmem:[%s6679_s5 + $0x70] sm:$0xff]  ;;  %v4270_v5 = vld [vmem:[%s6679_s5 + $0x78] sm:$0xff] }
 0x8ec   :  { %v1945_v12 = vadd.f32 %v1941_v8, %v1929_v7  ;;  %v5312_v7 = vld [vmem:[%s6683_s9 + $0x60] sm:$0xff]   ;;  %v4284_v8 = vld [vmem:[%s6684_s10 + $0xc8] sm:$0xff] }
 0x8ed   :  { %v1943_v15 = vadd.f32 %v1939_v11, %v1927_v10  ;;  %1950 = vrot.lane.b32.xlu1 %v1942_v9, %s5432_s25  ;;  %v4286_v10 = vld [vmem:[%s6684_s10 + $0xd8] sm:$0xff]  ;;  %v4287_v11 = vld [vmem:[%s6684_s10 + $0xe0] sm:$0xff] }
 0x8ee   :  { %v1977_v17 = vpack.c.bf16 %v1945_v12, %v1944_v6 }
 0x8ef   :  { %v1976_v18 = vpack.c.bf16 %v1943_v15, %v1942_v9  ;;  %1952 = vrot.lane.b32.xlu0 %v1943_v15, %s5432_s25 }
 0x8f1   :  { %1954 = vrot.lane.b32.xlu1 %v1944_v6, %s5432_s25  ;;  %5167 = vmatprep.subr.bf16.mxu1 %v1976_v18 }
 0x8f2   :  { %5169 = vmatpush3.bf16.msra.mxu1 %v1976_v18 }
 0x8f3   :  { %1956 = vrot.lane.b32.xlu0 %v1945_v12, %s5432_s25  ;;  %5171 = vmatprep.subr.bf16.mxu1 %v1977_v17 }
 0x8f5   :  { %1962 = vrot.lane.b32.xlu1 %v1942_v9, %s5433_s19  ;;  %v4285_v9 = vld [vmem:[%s6684_s10 + $0xd0] sm:$0xff] }
 0x8f6   :  { %5173 = vmatpush3.bf16.msra.mxu1 %v1977_v17 }
 0x8f7   :  { %1964 = vrot.lane.b32.xlu0 %v1943_v15, %s5433_s19  ;;  %v4289_v15 = vld [vmem:[%s6684_s10 + $0xf0] sm:$0xff] }
 0x8f9   :  { %1966 = vrot.lane.b32.xlu1 %v1944_v6, %s5433_s19  ;;  %4901 = vmatmul.mubr.msk.f32.vlgmr.msra.gmra.mrb[36].mxu1 %vm706_vm1, %v4268_v54  ;;  %v4283_v6 = vld [vmem:[%s6684_s10 + $0xc0] sm:$0xff] }
 0x8fa   :  { %4903 = vmatprep.mubr.msk.f32.mxu1 %vm706_vm1, %v4269_v4 }
 0x8fb   :  { %1968 = vrot.lane.b32.xlu0 %v1945_v12, %s5433_s19  ;;  %v4288_v12 = vld [vmem:[%s6684_s10 + $0xe8] sm:$0xff] }
 0x8fd   :  { %506 = vperm.xlu1 %5275, %v56_v21   ;;  %4904 = vmatmul.mubr.msk.f32.gmra.mrb[38].mxu1 %vm706_vm1, %v4270_v5 }
 0x8fe   :  { %4934 = vmatprep.mubr.msk.bf16.mxu1 %vm234_vm0, %v5312_v7 }
 0x8ff   :  { %511 = vperm.xlu0 %5274, %v57_v25  }
 0x901   :  { %516 = vperm.xlu1 %5275, %v58_v26  }
 0x903   :  { %521 = vperm.xlu0 %5274, %v59_v28  }
 0x95f   :  { %v1951_v20 = vpop.permute.xlu1 %1950 }
 0x960   :  { %v1958_v32 = vmul.f32 %v5966_v2, %v1951_v20 }
 0x961   :  { %v1953_v29 = vpop.permute.xlu0 %1952 }
 0x962   :  { %v1959_v33 = vmul.f32 %v5966_v2, %v1953_v29 }
 0x963   :  { %v1955_v35 = vpop.permute.xlu1 %1954 }
 0x964   :  { %v1974_v36 = vpack.c.bf16 %v1959_v33, %v1958_v32  ;;  %v1960_v37 = vmul.f32 %v5966_v2, %v1955_v35 }
 0x965   :  { %v1957_v31 = vpop.permute.xlu0 %1956 }
 0x966   :  { %v1961_v38 = vmul.f32 %v5966_v2, %v1957_v31  ;;  %4906 = vmatprep.subr.bf16.mxu0 %v1974_v36 }
 0x967   :  { %4907 = vmatpush3.bf16.msra.mxu0 %v1974_v36  ;;  %v1963_v41 = vpop.permute.xlu1 %1962 }
 0x968   :  { %v1975_v39 = vpack.c.bf16 %v1961_v38, %v1960_v37  ;;  %v1970_v44 = vmul.f32 %v5975_v14, %v1963_v41 }
 0x969   :  { %v1965_v40 = vpop.permute.xlu0 %1964 }
 0x96a   :  { %4908 = vmatprep.subr.bf16.mxu0 %v1975_v39  ;;  %v1971_v42 = vmul.f32 %v5975_v14, %v1965_v40 }
 0x96b   :  { %4909 = vmatpush3.bf16.msra.mxu0 %v1975_v39  ;;  %v1967_v45 = vpop.permute.xlu1 %1966 }
 0x96c   :  { %4910 = vmatprep.subr.bf16.mxu0 %v1976_v18  ;;  %v1978_v46 = vpack.c.bf16 %v1971_v42, %v1970_v44  ;;  %v1972_v48 = vmul.f32 %v5975_v14, %v1967_v45  ;;  %v5313_v44 = vld [vmem:[%s6683_s9 + $0x68] sm:$0xff]   ;;  %v5314_v45 = vld [vmem:[%s6683_s9 + $0x70] sm:$0xff]  }
 0x96d   :  { %v1969_v43 = vpop.permute.xlu0 %1968 }
 0x96e   :  { %v1973_v47 = vmul.f32 %v5975_v14, %v1969_v43 }
 0x96f   :  { %4911 = vmatpush3.bf16.msra.mxu0 %v1976_v18 }
 0x970   :  { %4912 = vmatprep.subr.bf16.mxu0 %v1977_v17  ;;  %v1979_v49 = vpack.c.bf16 %v1973_v47, %v1972_v48 }
 0x973   :  { %4913 = vmatpush3.bf16.msra.mxu0 %v1977_v17  ;;  %v4290_v17 = vld [vmem:[%s6684_s10 + $0xf8] sm:$0xff] }
 0x974   :  { %4914 = vmatprep.subr.bf16.mxu0 %v1978_v46 }
 0x977   :  { %4915 = vmatpush3.bf16.msra.mxu0 %v1978_v46  ;;  %v5315_v46 = vld [vmem:[%s6683_s9 + $0x78] sm:$0xff]  }
 0x978   :  { %4916 = vmatprep.subr.bf16.mxu0 %v1979_v49 }
 0x97b   :  { %4917 = vmatpush3.bf16.msra.mxu0 %v1979_v49 }
 0x97c   :  { %v507_v52 = vpop.permute.xlu1 %506 }
 0x97e   :  { %4919 = vmatmul.mubr.msk.bf16.vlgmr.msra.gmra.mrb[12].mxu0 %vm234_vm0, %v5311_v51  ;;  %v512_v53 = vpop.permute.xlu0 %511 }
 0x980   :  { %v517_v16 = vpop.permute.xlu1 %516 }
 0x982   :  { %v522_v57 = vpop.permute.xlu0 %521 }
 0x9cc   :  { %v4902_v47 = vpop.f32.mrb[36].mxu1 }
 0x9cd   :  { %v2063_v48 = vpop.f32.mrb[37].mxu1 }
 0x9d0   :  { %v4905_v49 = vpop.f32.mrb[38].mxu1 }
 0x9d1   :  { %v2073_v51 = vpop.f32.mrb[39].mxu1 }
 0xa51   :  { %v4920_v55 = vpop.f32.mrb[12].mxu0 }
 0xa52   :  { %v5218_v19 = vadd.f32 %v4920_v55, %v517_v16  ;;  %v2141_v30 = vpop.f32.mrb[13].mxu0 }
 0xa53   :  { %v5219_v58 = vadd.f32 %v2141_v30, %v507_v52  ;;  %v4921_v59 = vpop.f32.mrb[14].mxu0 }
 0xa54   :  { %v5220_v23 = vadd.f32 %v4921_v59, %v522_v57  ;;  %v2144_v34 = vpop.f32.mrb[15].mxu0  ;;  %v2162_v62 = vmax.f32 %v5218_v19, 0.0 }
 0xa55   :  { %v2160_v60 = vmax.f32 %v5219_v58, 0.0  ;;  %v5221_v61 = vadd.f32 %v2144_v34, %v512_v53 }
 0xa56   :  { %v2163_v63 = vmax.f32 %v5220_v23, 0.0 }
 0xa57   :  { %v2161_v0 = vmax.f32 %v5221_v61, 0.0  ;;  %2182 = vrot.lane.b32.xlu1 %v2160_v60, %s5432_s25 }
 0xa58   :  { %v2209_v1 = vpack.c.bf16 %v2163_v63, %v2162_v62 }
 0xa59   :  { %2184 = vrot.lane.b32.xlu0 %v2161_v0, %s5432_s25  ;;  %v2208_v3 = vpack.c.bf16 %v2161_v0, %v2160_v60 }
 0xa5b   :  { %2186 = vrot.lane.b32.xlu1 %v2162_v62, %s5432_s25 }
 0xa5d   :  { %2188 = vrot.lane.b32.xlu0 %v2163_v63, %s5432_s25 }
 0xa5f   :  { %2194 = vrot.lane.b32.xlu1 %v2160_v60, %s5433_s19 }
 0xa61   :  { %2196 = vrot.lane.b32.xlu0 %v2161_v0, %s5433_s19 }
 0xa63   :  { %2198 = vrot.lane.b32.xlu1 %v2162_v62, %s5433_s19 }
 0xa65   :  { %2200 = vrot.lane.b32.xlu0 %v2163_v63, %s5433_s19 }
 0xa67   :  { %2311 = vperm.xlu1 %5275, %v4283_v6  }
 0xa69   :  { %2316 = vperm.xlu0 %5274, %v4284_v8   ;;  %v4307_v8 = vld [vmem:[%s6679_s5 + $0x80] sm:$0xff] }
 0xa6a   :  { %4950 = vmatprep.mubr.msk.f32.mxu0 %vm706_vm1, %v4307_v8 }
 0xa6b   :  { %2321 = vperm.xlu1 %5275, %v4285_v9  }
 0xa6d   :  { %2326 = vperm.xlu0 %5274, %v4286_v10  }
 0xa6f   :  { %2331 = vperm.xlu1 %5275, %v4287_v11  }
 0xa71   :  { %2336 = vperm.xlu0 %5274, %v4288_v12  }
 0xa73   :  { %2341 = vperm.xlu1 %5275, %v4289_v15  }
 0xa75   :  { %2346 = vperm.xlu0 %5274, %v4290_v17  }
 0xac9   :  { %v2183_v18 = vpop.permute.xlu1 %2182 }
 0xaca   :  { %v2190_v22 = vmul.f32 %v5966_v2, %v2183_v18 }
 0xacb   :  { %v2185_v21 = vpop.permute.xlu0 %2184 }
 0xacc   :  { %v2191_v25 = vmul.f32 %v5966_v2, %v2185_v21 }
 0xacd   :  { %v2187_v26 = vpop.permute.xlu1 %2186 }
 0xace   :  { %v2206_v28 = vpack.c.bf16 %v2191_v25, %v2190_v22  ;;  %v2192_v29 = vmul.f32 %v5966_v2, %v2187_v26 }
 0xacf   :  { %v2189_v20 = vpop.permute.xlu0 %2188 }
 0xad0   :  { %v2193_v32 = vmul.f32 %v5966_v2, %v2189_v20  ;;  %4922 = vmatprep.subr.bf16.mxu1 %v2206_v28 }
 0xad1   :  { %4923 = vmatpush3.bf16.msra.mxu1 %v2206_v28  ;;  %v2195_v36 = vpop.permute.xlu1 %2194 }
 0xad2   :  { %v2207_v33 = vpack.c.bf16 %v2193_v32, %v2192_v29  ;;  %v2202_v38 = vmul.f32 %v5975_v14, %v2195_v36 }
 0xad3   :  { %v2197_v35 = vpop.permute.xlu0 %2196 }
 0xad4   :  { %4924 = vmatprep.subr.bf16.mxu1 %v2207_v33  ;;  %v2203_v31 = vmul.f32 %v5975_v14, %v2197_v35 }
 0xad5   :  { %4925 = vmatpush3.bf16.msra.mxu1 %v2207_v33  ;;  %v2199_v39 = vpop.permute.xlu1 %2198 }
 0xad6   :  { %4926 = vmatprep.subr.bf16.mxu1 %v2208_v3  ;;  %v2210_v40 = vpack.c.bf16 %v2203_v31, %v2202_v38  ;;  %v2204_v42 = vmul.f32 %v5975_v14, %v2199_v39  ;;  %v4308_v31 = vld [vmem:[%s6679_s5 + $0x88] sm:$0xff]  ;;  %v60_v38 = vld [vmem:[%s6682_s8 + $0x80] sm:$0xff]  ;;  %v4310_v39 = vld [vmem:[%s6679_s5 + $0x98] sm:$0xff] }
 0xad7   :  { %v2201_v37 = vpop.permute.xlu0 %2200 }
 0xad8   :  { %v2205_v41 = vmul.f32 %v5975_v14, %v2201_v37  ;;  %v4309_v37 = vld [vmem:[%s6679_s5 + $0x90] sm:$0xff] }
 0xad9   :  { %4927 = vmatpush3.bf16.msra.mxu1 %v2208_v3 }
 0xada   :  { %4928 = vmatprep.subr.bf16.mxu1 %v2209_v1  ;;  %v2211_v43 = vpack.c.bf16 %v2205_v41, %v2204_v42  ;;  %v61_v41 = vld [vmem:[%s6682_s8 + $0x88] sm:$0xff]  ;;  %v62_v42 = vld [vmem:[%s6682_s8 + $0x90] sm:$0xff] }
 0xadd   :  { %4929 = vmatpush3.bf16.msra.mxu1 %v2209_v1 }
 0xade   :  { %4930 = vmatprep.subr.bf16.mxu1 %v2210_v40 }
 0xae1   :  { %4931 = vmatpush3.bf16.msra.mxu1 %v2210_v40  ;;  %v5316_v40 = vld [vmem:[%s6680_s6 + $0x40] sm:$0xff]  }
 0xae2   :  { %4932 = vmatprep.subr.bf16.mxu1 %v2211_v43 }
 0xae5   :  { %4933 = vmatpush3.bf16.msra.mxu1 %v2211_v43  ;;  %v63_v43 = vld [vmem:[%s6682_s8 + $0x98] sm:$0xff] }
 0xae6   :  { %v2312_v52 = vpop.permute.xlu1 %2311 }
 0xae8   :  { %4935 = vmatmul.mubr.msk.bf16.vlgmr.msra.gmra.mrb[40].mxu1 %vm234_vm0, %v5313_v44  ;;  %v2317_v53 = vpop.permute.xlu0 %2316 }
 0xae9   :  { %4938 = vmatprep.mubr.msk.bf16.mxu1 %vm234_vm0, %v5314_v45 }
 0xaea   :  { %v2322_v13 = vpop.permute.xlu1 %2321 }
 0xaec   :  { %v2327_v19 = vpop.permute.xlu0 %2326 }
 0xaee   :  { %v2332_v4 = vpop.permute.xlu1 %2331 }
 0xaf0   :  { %4939 = vmatmul.mubr.msk.bf16.gmra.mrb[44].mxu1 %vm234_vm0, %v5315_v46  ;;  %v2337_v7 = vpop.permute.xlu0 %2336 }
 0xaf2   :  { %v2342_v9 = vpop.permute.xlu1 %2341 }
 0xaf4   :  { %v2347_v15 = vpop.permute.xlu0 %2346 }
 0xbbb   :  { %v4936_v54 = vpop.f32.mrb[40].mxu1 }
 0xbbc   :  { %v2351_v16 = vadd.f32 %v4936_v54, %v2322_v13  ;;  %v2278_v55 = vpop.f32.mrb[41].mxu1 }
 0xbbd   :  { %v2349_v30 = vadd.f32 %v2312_v52, %v2278_v55  ;;  %v4937_v57 = vpop.f32.mrb[42].mxu1 }
 0xbbe   :  { %v2361_v58 = vmul.f32 1.442695, %v2351_v16  ;;  %v6118_v59 = vadd.f32 %v2351_v16, %v5999_v50  ;;  %v2352_v23 = vadd.f32 %v4937_v57, %v2327_v19  ;;  %v2281_v34 = vpop.f32.mrb[43].mxu1 }
 0xbbf   :  { %v2357_v60 = vmul.f32 1.442695, %v2349_v30  ;;  %v6121_v61 = vadd.f32 %v2349_v30, %v6003_v24  ;;  %v2350_v62 = vadd.f32 %v2317_v53, %v2281_v34 }
 0xbc0   :  { %5364 = vpow2.f32 %v2361_v58  ;;  %v2363_v63 = vmul.f32 1.442695, %v2352_v23  ;;  %v6124_v0 = vadd.f32 %v2352_v23, %v6005_v27 }
 0xbc1   :  { %5366 = vpow2.f32 %v2357_v60  ;;  %v2359_v1 = vmul.f32 1.442695, %v2350_v62  ;;  %v6127_v3 = vadd.f32 %v2350_v62, %v6007_v56  ;;  %v5317_v62 = vld [vmem:[%s6680_s6 + $0x48] sm:$0xff]  }
 0xbc2   :  { %5368 = vpow2.f32 %v2363_v63 }
 0xbc3   :  { %5370 = vpow2.f32 %v2359_v1  ;;  %v4940_v50 = vpop.f32.mrb[44].mxu1 }
 0xbc4   :  { %v2294_v5 = vpop.f32.mrb[45].mxu1  ;;  %v2355_v11 = vadd.f32 %v4940_v50, %v2342_v9 }
 0xbc5   :  { %v4941_v6 = vpop.f32.mrb[46].mxu1  ;;  %v2353_v17 = vadd.f32 %v2332_v4, %v2294_v5 }
 0xbc6   :  { %v2297_v24 = vpop.f32.mrb[47].mxu1  ;;  %v2356_v25 = vadd.f32 %v4941_v6, %v2347_v15 }
 0xbc7   :  { %v2354_v20 = vadd.f32 %v2337_v7, %v2297_v24 }
 0xbca   :  { %v5365_v27 = vpop.eup %5364 }
 0xbcb   :  { %v5367_v10 = vpop.eup %5366  ;;  %v2367_v56 = vmul.f32 %v5365_v27, %v2073_v51 }
 0xbcc   :  { %v5369_v12 = vpop.eup %5368  ;;  %v2365_v18 = vmul.f32 %v5367_v10, %v2063_v48 }
 0xbcd   :  { %v5371_v21 = vpop.eup %5370  ;;  %v2371_v22 = vadd.f32 %v2367_v56, %v2355_v11  ;;  %v2368_v26 = vmul.f32 %v5369_v12, %v4905_v49 }
 0xbce   :  { %v2369_v28 = vadd.f32 %v2365_v18, %v2353_v17  ;;  %v2366_v29 = vmul.f32 %v5371_v21, %v4902_v47 }
 0xbcf   :  { %v2372_v32 = vadd.f32 %v2368_v26, %v2356_v25 }
 0xbd0   :  { %v2370_v33 = vadd.f32 %v2366_v29, %v2354_v20  ;;  %2377 = vrot.lane.b32.xlu1 %v2369_v28, %s5432_s25  ;;  %v5318_v20 = vld [vmem:[%s6683_s9 + $0x80] sm:$0xff]   ;;  %v4324_v29 = vld [vmem:[%s6684_s10 + $0x108] sm:$0xff] }
 0xbd1   :  { %v2404_v35 = vpack.c.bf16 %v2372_v32, %v2371_v22  ;;  %4984 = vmatprep.mubr.msk.bf16.mxu1 %vm234_vm0, %v5318_v20 }
 0xbd2   :  { %v2403_v36 = vpack.c.bf16 %v2370_v33, %v2369_v28  ;;  %2379 = vrot.lane.b32.xlu0 %v2370_v33, %s5432_s25 }
 0xbd4   :  { %2381 = vrot.lane.b32.xlu1 %v2371_v22, %s5432_s25  ;;  %5175 = vmatprep.subr.bf16.mxu0 %v2403_v36 }
 0xbd5   :  { %5177 = vmatpush3.bf16.msra.mxu0 %v2403_v36 }
 0xbd6   :  { %2383 = vrot.lane.b32.xlu0 %v2372_v32, %s5432_s25  ;;  %5179 = vmatprep.subr.bf16.mxu0 %v2404_v35 }
 0xbd8   :  { %2389 = vrot.lane.b32.xlu1 %v2369_v28, %s5433_s19  ;;  %v4323_v28 = vld [vmem:[%s6684_s10 + $0x100] sm:$0xff] }
 0xbd9   :  { %5181 = vmatpush3.bf16.msra.mxu0 %v2404_v35 }
 0xbda   :  { %2391 = vrot.lane.b32.xlu0 %v2370_v33, %s5433_s19  ;;  %v4326_v33 = vld [vmem:[%s6684_s10 + $0x118] sm:$0xff] }
 0xbdc   :  { %2393 = vrot.lane.b32.xlu1 %v2371_v22, %s5433_s19  ;;  %4951 = vmatmul.mubr.msk.f32.vlgmr.msra.gmra.mrb[32].mxu0 %vm706_vm1, %v4308_v31  ;;  %v4329_v31 = vld [vmem:[%s6684_s10 + $0x130] sm:$0xff] }
 0xbdd   :  { %4953 = vmatprep.mubr.msk.f32.mxu0 %vm706_vm1, %v4309_v37  ;;  %v4330_v37 = vld [vmem:[%s6684_s10 + $0x138] sm:$0xff] }
 0xbde   :  { %2395 = vrot.lane.b32.xlu0 %v2372_v32, %s5433_s19  ;;  %v4325_v32 = vld [vmem:[%s6684_s10 + $0x110] sm:$0xff] }
 0xbe0   :  { %526 = vperm.xlu1 %5275, %v60_v38   ;;  %4954 = vmatmul.mubr.msk.f32.gmra.mrb[34].mxu0 %vm706_vm1, %v4310_v39 }
 0xbe1   :  { %4968 = vmatprep.mubr.msk.bf16.mxu0 %vm234_vm0, %v5316_v40 }
 0xbe2   :  { %531 = vperm.xlu0 %5274, %v61_v41  }
 0xbe4   :  { %536 = vperm.xlu1 %5275, %v62_v42  }
 0xbe6   :  { %541 = vperm.xlu0 %5274, %v63_v43  }
 0xc42   :  { %v2378_v44 = vpop.permute.xlu1 %2377 }
 0xc43   :  { %v2385_v46 = vmul.f32 %v5966_v2, %v2378_v44 }
 0xc44   :  { %v2380_v45 = vpop.permute.xlu0 %2379 }
 0xc45   :  { %v2386_v47 = vmul.f32 %v5966_v2, %v2380_v45 }
 0xc46   :  { %v2382_v48 = vpop.permute.xlu1 %2381 }
 0xc47   :  { %v2401_v49 = vpack.c.bf16 %v2386_v47, %v2385_v46  ;;  %v2387_v52 = vmul.f32 %v5966_v2, %v2382_v48 }
 0xc48   :  { %v2384_v51 = vpop.permute.xlu0 %2383 }
 0xc49   :  { %v2388_v53 = vmul.f32 %v5966_v2, %v2384_v51  ;;  %4956 = vmatprep.subr.bf16.mxu0 %v2401_v49 }
 0xc4a   :  { %4957 = vmatpush3.bf16.msra.mxu0 %v2401_v49  ;;  %v2390_v16 = vpop.permute.xlu1 %2389 }
 0xc4b   :  { %v2402_v13 = vpack.c.bf16 %v2388_v53, %v2387_v52  ;;  %v2397_v30 = vmul.f32 %v5975_v14, %v2390_v16 }
 0xc4c   :  { %v2392_v54 = vpop.permute.xlu0 %2391 }
 0xc4d   :  { %4958 = vmatprep.subr.bf16.mxu0 %v2402_v13  ;;  %v2398_v55 = vmul.f32 %v5975_v14, %v2392_v54 }
 0xc4e   :  { %4959 = vmatpush3.bf16.msra.mxu0 %v2402_v13  ;;  %v2394_v57 = vpop.permute.xlu1 %2393 }
 0xc4f   :  { %4960 = vmatprep.subr.bf16.mxu0 %v2403_v36  ;;  %v2405_v58 = vpack.c.bf16 %v2398_v55, %v2397_v30  ;;  %v2399_v34 = vmul.f32 %v5975_v14, %v2394_v57  ;;  %v5320_v30 = vld [vmem:[%s6683_s9 + $0x90] sm:$0xff]  }
 0xc50   :  { %v2396_v19 = vpop.permute.xlu0 %2395 }
 0xc51   :  { %v2400_v23 = vmul.f32 %v5975_v14, %v2396_v19  ;;  %v5319_v19 = vld [vmem:[%s6683_s9 + $0x88] sm:$0xff]  }
 0xc52   :  { %4961 = vmatpush3.bf16.msra.mxu0 %v2403_v36  ;;  %v4328_v36 = vld [vmem:[%s6684_s10 + $0x128] sm:$0xff] }
 0xc53   :  { %4962 = vmatprep.subr.bf16.mxu0 %v2404_v35  ;;  %v2406_v60 = vpack.c.bf16 %v2400_v23, %v2399_v34 }
 0xc56   :  { %4963 = vmatpush3.bf16.msra.mxu0 %v2404_v35  ;;  %v4327_v35 = vld [vmem:[%s6684_s10 + $0x120] sm:$0xff] }
 0xc57   :  { %4964 = vmatprep.subr.bf16.mxu0 %v2405_v58 }
 0xc5a   :  { %4965 = vmatpush3.bf16.msra.mxu0 %v2405_v58 }
 0xc5b   :  { %4966 = vmatprep.subr.bf16.mxu0 %v2406_v60 }
 0xc5e   :  { %4967 = vmatpush3.bf16.msra.mxu0 %v2406_v60 }
 0xc5f   :  { %v527_v5 = vpop.permute.xlu1 %526 }
 0xc61   :  { %4969 = vmatmul.mubr.msk.bf16.vlgmr.msra.gmra.mrb[16].mxu0 %vm234_vm0, %v5317_v62  ;;  %v532_v6 = vpop.permute.xlu0 %531 }
 0xc63   :  { %v537_v7 = vpop.permute.xlu1 %536 }
 0xc65   :  { %v542_v9 = vpop.permute.xlu0 %541 }
 0xcaf   :  { %v6181_v63 = vpop.f32.mrb[32].mxu0 }
 0xcb0   :  { %v6183_v1 = vpop.f32.mrb[33].mxu0 }
 0xcb3   :  { %v6185_v50 = vpop.f32.mrb[34].mxu0 }
 0xcb4   :  { %v6187_v4 = vpop.f32.mrb[35].mxu0 }
 0xd34   :  { %v4970_v24 = vpop.f32.mrb[16].mxu0 }
 0xd35   :  { %v5222_v8 = vadd.f32 %v4970_v24, %v537_v7  ;;  %v2568_v27 = vpop.f32.mrb[17].mxu0 }
 0xd36   :  { %v5223_v10 = vadd.f32 %v2568_v27, %v527_v5  ;;  %v4971_v11 = vpop.f32.mrb[18].mxu0 }
 0xd37   :  { %v5224_v56 = vadd.f32 %v4971_v11, %v542_v9  ;;  %v2571_v12 = vpop.f32.mrb[19].mxu0  ;;  %v2589_v18 = vmax.f32 %v5222_v8, 0.0 }
 0xd38   :  { %v2587_v15 = vmax.f32 %v5223_v10, 0.0  ;;  %v5225_v17 = vadd.f32 %v2571_v12, %v532_v6 }
 0xd39   :  { %v2590_v21 = vmax.f32 %v5224_v56, 0.0 }
 0xd3a   :  { %v2588_v22 = vmax.f32 %v5225_v17, 0.0  ;;  %2609 = vrot.lane.b32.xlu1 %v2587_v15, %s5432_s25 }
 0xd3b   :  { %v2636_v25 = vpack.c.bf16 %v2590_v21, %v2589_v18 }
 0xd3c   :  { %2611 = vrot.lane.b32.xlu0 %v2588_v22, %s5432_s25  ;;  %v2635_v26 = vpack.c.bf16 %v2588_v22, %v2587_v15 }
 0xd3e   :  { %2613 = vrot.lane.b32.xlu1 %v2589_v18, %s5432_s25 }
 0xd40   :  { %2615 = vrot.lane.b32.xlu0 %v2590_v21, %s5432_s25 }
 0xd42   :  { %2621 = vrot.lane.b32.xlu1 %v2587_v15, %s5433_s19 }
 0xd44   :  { %2623 = vrot.lane.b32.xlu0 %v2588_v22, %s5433_s19 }
 0xd46   :  { %2625 = vrot.lane.b32.xlu1 %v2589_v18, %s5433_s19 }
 0xd48   :  { %2627 = vrot.lane.b32.xlu0 %v2590_v21, %s5433_s19 }
 0xd4a   :  { %2738 = vperm.xlu1 %5275, %v4323_v28  }
 0xd4c   :  { %2743 = vperm.xlu0 %5274, %v4324_v29  }
 0xd4e   :  { %2748 = vperm.xlu1 %5275, %v4325_v32  }
 0xd50   :  { %2753 = vperm.xlu0 %5274, %v4326_v33  }
 0xd52   :  { %2758 = vperm.xlu1 %5275, %v4327_v35  }
 0xd54   :  { %2763 = vperm.xlu0 %5274, %v4328_v36  }
 0xd56   :  { %2768 = vperm.xlu1 %5275, %v4329_v31  }
 0xd58   :  { %2773 = vperm.xlu0 %5274, %v4330_v37  }
 0xdac   :  { %v2610_v38 = vpop.permute.xlu1 %2609 }
 0xdad   :  { %v2617_v40 = vmul.f32 %v5966_v2, %v2610_v38 }
 0xdae   :  { %v2612_v39 = vpop.permute.xlu0 %2611 }
 0xdaf   :  { %v2618_v41 = vmul.f32 %v5966_v2, %v2612_v39 }
 0xdb0   :  { %v2614_v42 = vpop.permute.xlu1 %2613 }
 0xdb1   :  { %v2633_v43 = vpack.c.bf16 %v2618_v41, %v2617_v40  ;;  %v2619_v45 = vmul.f32 %v5966_v2, %v2614_v42 }
 0xdb2   :  { %v2616_v44 = vpop.permute.xlu0 %2615 }
 0xdb3   :  { %v2620_v46 = vmul.f32 %v5966_v2, %v2616_v44  ;;  %4972 = vmatprep.subr.bf16.mxu1 %v2633_v43 }
 0xdb4   :  { %4973 = vmatpush3.bf16.msra.mxu1 %v2633_v43  ;;  %v2622_v49 = vpop.permute.xlu1 %2621 }
 0xdb5   :  { %v2634_v47 = vpack.c.bf16 %v2620_v46, %v2619_v45  ;;  %v2629_v53 = vmul.f32 %v5975_v14, %v2622_v49  ;;  %v66_v46 = vld [vmem:[%s6682_s8 + $0xb0] sm:$0xff] }
 0xdb6   :  { %v2624_v48 = vpop.permute.xlu0 %2623 }
 0xdb7   :  { %4974 = vmatprep.subr.bf16.mxu1 %v2634_v47  ;;  %v2630_v51 = vmul.f32 %v5975_v14, %v2624_v48 }
 0xdb8   :  { %4975 = vmatpush3.bf16.msra.mxu1 %v2634_v47  ;;  %v2626_v13 = vpop.permute.xlu1 %2625  ;;  %v67_v47 = vld [vmem:[%s6682_s8 + $0xb8] sm:$0xff] }
 0xdb9   :  { %4976 = vmatprep.subr.bf16.mxu1 %v2635_v26  ;;  %v2637_v54 = vpack.c.bf16 %v2630_v51, %v2629_v53  ;;  %v2631_v2 = vmul.f32 %v5975_v14, %v2626_v13  ;;  %v6288_v51 = vld [vmem:[%s6676_s2] ss:$0 sm:$0xff] }
 0xdba   :  { %v2628_v52 = vpop.permute.xlu0 %2627 }
 0xdbb   :  { %v2632_v16 = vmul.f32 %v5975_v14, %v2628_v52  ;;  %v5321_v14 = vld [vmem:[%s6683_s9 + $0x98] sm:$0xff]  }
 0xdbc   :  { %4977 = vmatpush3.bf16.msra.mxu1 %v2635_v26 }
 0xdbd   :  { %4978 = vmatprep.subr.bf16.mxu1 %v2636_v25  ;;  %v2638_v55 = vpack.c.bf16 %v2632_v16, %v2631_v2 }
 0xdc0   :  { %4979 = vmatpush3.bf16.msra.mxu1 %v2636_v25 }
 0xdc1   :  { %4980 = vmatprep.subr.bf16.mxu1 %v2637_v54 }
 0xdc4   :  { %4981 = vmatpush3.bf16.msra.mxu1 %v2637_v54 }
 0xdc5   :  { %4982 = vmatprep.subr.bf16.mxu1 %v2638_v55 }
 0xdc8   :  { %4983 = vmatpush3.bf16.msra.mxu1 %v2638_v55 }
 0xdc9   :  { %v2739_v57 = vpop.permute.xlu1 %2738 }
 0xdcb   :  { %4985 = vmatmul.mubr.msk.bf16.vlgmr.msra.gmra.mrb[48].mxu1 %vm234_vm0, %v5319_v19  ;;  %v2744_v58 = vpop.permute.xlu0 %2743 }
 0xdcc   :  { %4988 = vmatprep.mubr.msk.bf16.mxu1 %vm234_vm0, %v5320_v30 }
 0xdcd   :  { %v2749_v23 = vpop.permute.xlu1 %2748 }
 0xdcf   :  { %v2754_v5 = vpop.permute.xlu0 %2753 }
 0xdd1   :  { %v2759_v21 = vpop.permute.xlu1 %2758 }
 0xdd3   :  { %4989 = vmatmul.mubr.msk.bf16.gmra.mrb[52].mxu1 %vm234_vm0, %v5321_v14  ;;  %v2764_v26 = vpop.permute.xlu0 %2763 }
 0xdd5   :  { %v2769_v20 = vpop.permute.xlu1 %2768 }
 0xdd7   :  { %v2774_v35 = vpop.permute.xlu0 %2773 }
 0xe9e   :  { %v4986_v34 = vpop.f32.mrb[48].mxu1 }
 0xe9f   :  { %v2778_v60 = vadd.f32 %v4986_v34, %v2749_v23  ;;  %v2705_v62 = vpop.f32.mrb[49].mxu1 }
 0xea0   :  { %v2776_v6 = vadd.f32 %v2739_v57, %v2705_v62  ;;  %v4987_v7 = vpop.f32.mrb[50].mxu1  ;;  %v6297_v57 = vld [vmem:[%s6677_s3] ss:$0 sm:$0xff] }
 0xea1   :  { %v2788_v24 = vmul.f32 1.442695, %v2778_v60  ;;  %v6246_v8 = vadd.f32 %v2778_v60, %v6118_v59  ;;  %v2779_v27 = vadd.f32 %v4987_v7, %v2754_v5  ;;  %v2708_v9 = vpop.f32.mrb[51].mxu1 }
 0xea2   :  { %v2784_v10 = vmul.f32 1.442695, %v2776_v6  ;;  %v6249_v11 = vadd.f32 %v2776_v6, %v6121_v61  ;;  %v2777_v56 = vadd.f32 %v2744_v58, %v2708_v9 }
 0xea3   :  { %5372 = vpow2.f32 %v2788_v24  ;;  %v2790_v12 = vmul.f32 1.442695, %v2779_v27  ;;  %v6252_v15 = vadd.f32 %v2779_v27, %v6124_v0  ;;  %v5323_v24 = vld [vmem:[%s6680_s6 + $0x58] sm:$0xff]  }
 0xea4   :  { %5374 = vpow2.f32 %v2784_v10  ;;  %v2786_v17 = vmul.f32 1.442695, %v2777_v56  ;;  %v6255_v18 = vadd.f32 %v2777_v56, %v6127_v3  ;;  %v4347_v10 = vld [vmem:[%s6679_s5 + $0xa0] sm:$0xff]  ;;  %v4348_v56 = vld [vmem:[%s6679_s5 + $0xa8] sm:$0xff] }
 0xea5   :  { %5376 = vpow2.f32 %v2790_v12  ;;  %5000 = vmatprep.mubr.msk.f32.mxu1 %vm706_vm1, %v4347_v10 }
 0xea6   :  { %5378 = vpow2.f32 %v2786_v17  ;;  %v4990_v59 = vpop.f32.mrb[52].mxu1 }
 0xea7   :  { %v2721_v22 = vpop.f32.mrb[53].mxu1  ;;  %v2782_v32 = vadd.f32 %v4990_v59, %v2769_v20 }
 0xea8   :  { %v4991_v25 = vpop.f32.mrb[54].mxu1  ;;  %v2780_v36 = vadd.f32 %v2759_v21, %v2721_v22 }
 0xea9   :  { %v2724_v61 = vpop.f32.mrb[55].mxu1  ;;  %v2783_v38 = vadd.f32 %v4991_v25, %v2774_v35 }
 0xeaa   :  { %v2781_v41 = vadd.f32 %v2764_v26, %v2724_v61 }
 0xead   :  { %v5373_v28 = vpop.eup %5372 }
 0xeae   :  { %v5375_v29 = vpop.eup %5374  ;;  %v2794_v0 = vmul.f32 %v5373_v28, %v6187_v4 }
 0xeaf   :  { %v5377_v33 = vpop.eup %5376  ;;  %v2792_v3 = vmul.f32 %v5375_v29, %v6183_v1  ;;  %v5322_v1 = vld [vmem:[%s6680_s6 + $0x50] sm:$0xff]  }
 0xeb0   :  { %v5379_v31 = vpop.eup %5378  ;;  %v2798_v37 = vadd.f32 %v2794_v0, %v2782_v32  ;;  %v2795_v39 = vmul.f32 %v5377_v33, %v6185_v50  ;;  %v65_v50 = vld [vmem:[%s6682_s8 + $0xa8] sm:$0xff]  ;;  %5018 = vmatprep.mubr.msk.bf16.mxu0 %vm234_vm0, %v5322_v1 }
 0xeb1   :  { %v2796_v40 = vadd.f32 %v2792_v3, %v2780_v36  ;;  %v2793_v42 = vmul.f32 %v5379_v31, %v6181_v63  ;;  %v64_v63 = vld [vmem:[%s6682_s8 + $0xa0] sm:$0xff]  ;;  %v4349_v3 = vld [vmem:[%s6679_s5 + $0xb0] sm:$0xff]  ;;  %v4350_v31 = vld [vmem:[%s6679_s5 + $0xb8] sm:$0xff] }
 0xeb2   :  { %v2799_v43 = vadd.f32 %v2795_v39, %v2783_v38  ;;  %v5324_v38 = vld [vmem:[%s6683_s9 + $0xa0] sm:$0xff]   ;;  %v4364_v39 = vld [vmem:[%s6684_s10 + $0x148] sm:$0xff] }
 0xeb3   :  { %v2797_v44 = vadd.f32 %v2793_v42, %v2781_v41  ;;  %2804 = vrot.lane.b32.xlu1 %v2796_v40, %s5432_s25  ;;  %v4366_v41 = vld [vmem:[%s6684_s10 + $0x158] sm:$0xff]  ;;  %v4367_v42 = vld [vmem:[%s6684_s10 + $0x160] sm:$0xff] }
 0xeb4   :  { %v2831_v45 = vpack.c.bf16 %v2799_v43, %v2798_v37 }
 0xeb5   :  { %v2830_v4 = vpack.c.bf16 %v2797_v44, %v2796_v40  ;;  %2806 = vrot.lane.b32.xlu0 %v2797_v44, %s5432_s25 }
 0xeb7   :  { %2808 = vrot.lane.b32.xlu1 %v2798_v37, %s5432_s25  ;;  %5183 = vmatprep.subr.bf16.mxu1 %v2830_v4 }
 0xeb8   :  { %5185 = vmatpush3.bf16.msra.mxu1 %v2830_v4 }
 0xeb9   :  { %2810 = vrot.lane.b32.xlu0 %v2799_v43, %s5432_s25  ;;  %5187 = vmatprep.subr.bf16.mxu1 %v2831_v45 }
 0xebb   :  { %2816 = vrot.lane.b32.xlu1 %v2796_v40, %s5433_s19  ;;  %v4365_v40 = vld [vmem:[%s6684_s10 + $0x150] sm:$0xff] }
 0xebc   :  { %5189 = vmatpush3.bf16.msra.mxu1 %v2831_v45 }
 0xebd   :  { %2818 = vrot.lane.b32.xlu0 %v2797_v44, %s5433_s19  ;;  %v4369_v44 = vld [vmem:[%s6684_s10 + $0x170] sm:$0xff] }
 0xebf   :  { %2820 = vrot.lane.b32.xlu1 %v2798_v37, %s5433_s19  ;;  %5001 = vmatmul.mubr.msk.f32.vlgmr.msra.gmra.mrb[56].mxu1 %vm706_vm1, %v4348_v56  ;;  %v4363_v37 = vld [vmem:[%s6684_s10 + $0x140] sm:$0xff] }
 0xec0   :  { %5003 = vmatprep.mubr.msk.f32.mxu1 %vm706_vm1, %v4349_v3 }
 0xec1   :  { %2822 = vrot.lane.b32.xlu0 %v2799_v43, %s5433_s19  ;;  %v4368_v43 = vld [vmem:[%s6684_s10 + $0x168] sm:$0xff] }
 0xec3   :  { %546 = vperm.xlu1 %5275, %v64_v63   ;;  %5004 = vmatmul.mubr.msk.f32.gmra.mrb[58].mxu1 %vm706_vm1, %v4350_v31 }
 0xec4   :  { %5034 = vmatprep.mubr.msk.bf16.mxu1 %vm234_vm0, %v5324_v38 }
 0xec5   :  { %551 = vperm.xlu0 %5274, %v65_v50  }
 0xec7   :  { %556 = vperm.xlu1 %5275, %v66_v46  }
 0xec9   :  { %561 = vperm.xlu0 %5274, %v67_v47  }
 0xf25   :  { %v2805_v48 = vpop.permute.xlu1 %2804 }
 0xf26   :  { %v2812_v52 = vmul.f32 %v6288_v51, %v2805_v48 }
 0xf27   :  { %v2807_v49 = vpop.permute.xlu0 %2806 }
 0xf28   :  { %v2813_v53 = vmul.f32 %v6288_v51, %v2807_v49 }
 0xf29   :  { %v2809_v13 = vpop.permute.xlu1 %2808 }
 0xf2a   :  { %v2828_v54 = vpack.c.bf16 %v2813_v53, %v2812_v52  ;;  %v2814_v2 = vmul.f32 %v6288_v51, %v2809_v13 }
 0xf2b   :  { %v2811_v16 = vpop.permute.xlu0 %2810 }
 0xf2c   :  { %v2815_v55 = vmul.f32 %v6288_v51, %v2811_v16  ;;  %5006 = vmatprep.subr.bf16.mxu0 %v2828_v54 }
 0xf2d   :  { %5007 = vmatpush3.bf16.msra.mxu0 %v2828_v54  ;;  %v2817_v14 = vpop.permute.xlu1 %2816 }
 0xf2e   :  { %v2829_v19 = vpack.c.bf16 %v2815_v55, %v2814_v2  ;;  %v2824_v34 = vmul.f32 %v6297_v57, %v2817_v14 }
 0xf2f   :  { %v2819_v30 = vpop.permute.xlu0 %2818 }
 0xf30   :  { %5008 = vmatprep.subr.bf16.mxu0 %v2829_v19  ;;  %v2825_v58 = vmul.f32 %v6297_v57, %v2819_v30 }
 0xf31   :  { %5009 = vmatpush3.bf16.msra.mxu0 %v2829_v19  ;;  %v2821_v60 = vpop.permute.xlu1 %2820 }
 0xf32   :  { %5010 = vmatprep.subr.bf16.mxu0 %v2830_v4  ;;  %v2832_v62 = vpack.c.bf16 %v2825_v58, %v2824_v34  ;;  %v2826_v6 = vmul.f32 %v6297_v57, %v2821_v60  ;;  %v5325_v34 = vld [vmem:[%s6683_s9 + $0xa8] sm:$0xff]   ;;  %v5326_v60 = vld [vmem:[%s6683_s9 + $0xb0] sm:$0xff]  }
 0xf33   :  { %v2823_v23 = vpop.permute.xlu0 %2822 }
 0xf34   :  { %v2827_v5 = vmul.f32 %v6297_v57, %v2823_v23 }
 0xf35   :  { %5011 = vmatpush3.bf16.msra.mxu0 %v2830_v4 }
 0xf36   :  { %5012 = vmatprep.subr.bf16.mxu0 %v2831_v45  ;;  %v2833_v7 = vpack.c.bf16 %v2827_v5, %v2826_v6 }
 0xf39   :  { %5013 = vmatpush3.bf16.msra.mxu0 %v2831_v45  ;;  %v4370_v45 = vld [vmem:[%s6684_s10 + $0x178] sm:$0xff] }
 0xf3a   :  { %5014 = vmatprep.subr.bf16.mxu0 %v2832_v62 }
 0xf3d   :  { %5015 = vmatpush3.bf16.msra.mxu0 %v2832_v62  ;;  %v5327_v62 = vld [vmem:[%s6683_s9 + $0xb8] sm:$0xff]  }
 0xf3e   :  { %5016 = vmatprep.subr.bf16.mxu0 %v2833_v7 }
 0xf41   :  { %5017 = vmatpush3.bf16.msra.mxu0 %v2833_v7 }
 0xf42   :  { %v547_v27 = vpop.permute.xlu1 %546 }
 0xf44   :  { %5019 = vmatmul.mubr.msk.bf16.vlgmr.msra.gmra.mrb[20].mxu0 %vm234_vm0, %v5323_v24  ;;  %v552_v9 = vpop.permute.xlu0 %551 }
 0xf46   :  { %v557_v12 = vpop.permute.xlu1 %556 }
 0xf48   :  { %v562_v22 = vpop.permute.xlu0 %561 }
 0xf92   :  { %v5002_v5 = vpop.f32.mrb[56].mxu1 }
 0xf93   :  { %v2917_v6 = vpop.f32.mrb[57].mxu1 }
 0xf96   :  { %v5005_v7 = vpop.f32.mrb[58].mxu1 }
 0xf97   :  { %v2927_v24 = vpop.f32.mrb[59].mxu1 }
0x1017   :  { %v5020_v17 = vpop.f32.mrb[20].mxu0 }
0x1018   :  { %v5226_v59 = vadd.f32 %v5020_v17, %v557_v12  ;;  %v2995_v21 = vpop.f32.mrb[21].mxu0 }
0x1019   :  { %v5227_v25 = vadd.f32 %v2995_v21, %v547_v27  ;;  %v5021_v26 = vpop.f32.mrb[22].mxu0 }
0x101a   :  { %v5228_v61 = vadd.f32 %v5021_v26, %v562_v22  ;;  %v2998_v28 = vpop.f32.mrb[23].mxu0  ;;  %v3016_v32 = vmax.f32 %v5226_v59, 0.0 }
0x101b   :  { %v3014_v20 = vmax.f32 %v5227_v25, 0.0  ;;  %v5229_v29 = vadd.f32 %v2998_v28, %v552_v9 }
0x101c   :  { %v3017_v0 = vmax.f32 %v5228_v61, 0.0 }
0x101d   :  { %v3015_v33 = vmax.f32 %v5229_v29, 0.0  ;;  %3036 = vrot.lane.b32.xlu1 %v3014_v20, %s5432_s25 }
0x101e   :  { %v3063_v35 = vpack.c.bf16 %v3017_v0, %v3016_v32 }
0x101f   :  { %3038 = vrot.lane.b32.xlu0 %v3015_v33, %s5432_s25  ;;  %v3062_v36 = vpack.c.bf16 %v3015_v33, %v3014_v20 }
0x1021   :  { %3040 = vrot.lane.b32.xlu1 %v3016_v32, %s5432_s25 }
0x1023   :  { %3042 = vrot.lane.b32.xlu0 %v3017_v0, %s5432_s25 }
0x1025   :  { %3048 = vrot.lane.b32.xlu1 %v3014_v20, %s5433_s19 }
0x1027   :  { %3050 = vrot.lane.b32.xlu0 %v3015_v33, %s5433_s19 }
0x1029   :  { %3052 = vrot.lane.b32.xlu1 %v3016_v32, %s5433_s19 }
0x102b   :  { %3054 = vrot.lane.b32.xlu0 %v3017_v0, %s5433_s19 }
0x102d   :  { %3165 = vperm.xlu1 %5275, %v4363_v37  }
0x102f   :  { %3170 = vperm.xlu0 %5274, %v4364_v39   ;;  %v4387_v39 = vld [vmem:[%s6679_s5 + $0xc0] sm:$0xff] }
0x1030   :  { %5050 = vmatprep.mubr.msk.f32.mxu0 %vm706_vm1, %v4387_v39 }
0x1031   :  { %3175 = vperm.xlu1 %5275, %v4365_v40  }
0x1033   :  { %3180 = vperm.xlu0 %5274, %v4366_v41  }
0x1035   :  { %3185 = vperm.xlu1 %5275, %v4367_v42  }
0x1037   :  { %3190 = vperm.xlu0 %5274, %v4368_v43  }
0x1039   :  { %3195 = vperm.xlu1 %5275, %v4369_v44  }
0x103b   :  { %3200 = vperm.xlu0 %5274, %v4370_v45  }
0x108f   :  { %v3037_v4 = vpop.permute.xlu1 %3036 }
0x1090   :  { %v3044_v1 = vmul.f32 %v6288_v51, %v3037_v4 }
0x1091   :  { %v3039_v63 = vpop.permute.xlu0 %3038 }
0x1092   :  { %v3045_v50 = vmul.f32 %v6288_v51, %v3039_v63 }
0x1093   :  { %v3041_v46 = vpop.permute.xlu1 %3040 }
0x1094   :  { %v3060_v47 = vpack.c.bf16 %v3045_v50, %v3044_v1  ;;  %v3046_v49 = vmul.f32 %v6288_v51, %v3041_v46 }
0x1095   :  { %v3043_v48 = vpop.permute.xlu0 %3042 }
0x1096   :  { %v3047_v52 = vmul.f32 %v6288_v51, %v3043_v48  ;;  %5022 = vmatprep.subr.bf16.mxu1 %v3060_v47 }
0x1097   :  { %5023 = vmatpush3.bf16.msra.mxu1 %v3060_v47  ;;  %v3049_v54 = vpop.permute.xlu1 %3048 }
0x1098   :  { %v3061_v53 = vpack.c.bf16 %v3047_v52, %v3046_v49  ;;  %v3056_v55 = vmul.f32 %v6297_v57, %v3049_v54 }
0x1099   :  { %v3051_v13 = vpop.permute.xlu0 %3050 }
0x109a   :  { %5024 = vmatprep.subr.bf16.mxu1 %v3061_v53  ;;  %v3057_v16 = vmul.f32 %v6297_v57, %v3051_v13 }
0x109b   :  { %5025 = vmatpush3.bf16.msra.mxu1 %v3061_v53  ;;  %v3053_v19 = vpop.permute.xlu1 %3052 }
0x109c   :  { %5026 = vmatprep.subr.bf16.mxu1 %v3062_v36  ;;  %v3064_v30 = vpack.c.bf16 %v3057_v16, %v3056_v55  ;;  %v3058_v58 = vmul.f32 %v6297_v57, %v3053_v19  ;;  %v4388_v16 = vld [vmem:[%s6679_s5 + $0xc8] sm:$0xff]  ;;  %v68_v55 = vld [vmem:[%s6682_s8 + $0xc0] sm:$0xff]  ;;  %v4390_v19 = vld [vmem:[%s6679_s5 + $0xd8] sm:$0xff] }
0x109d   :  { %v3055_v2 = vpop.permute.xlu0 %3054 }
0x109e   :  { %v3059_v14 = vmul.f32 %v6297_v57, %v3055_v2  ;;  %v4389_v2 = vld [vmem:[%s6679_s5 + $0xd0] sm:$0xff] }
0x109f   :  { %5027 = vmatpush3.bf16.msra.mxu1 %v3062_v36 }
0x10a0   :  { %5028 = vmatprep.subr.bf16.mxu1 %v3063_v35  ;;  %v3065_v23 = vpack.c.bf16 %v3059_v14, %v3058_v58  ;;  %v69_v14 = vld [vmem:[%s6682_s8 + $0xc8] sm:$0xff]  ;;  %v70_v58 = vld [vmem:[%s6682_s8 + $0xd0] sm:$0xff] }
0x10a3   :  { %5029 = vmatpush3.bf16.msra.mxu1 %v3063_v35 }
0x10a4   :  { %5030 = vmatprep.subr.bf16.mxu1 %v3064_v30 }
0x10a7   :  { %5031 = vmatpush3.bf16.msra.mxu1 %v3064_v30  ;;  %v5328_v30 = vld [vmem:[%s6680_s6 + $0x60] sm:$0xff]  }
0x10a8   :  { %5032 = vmatprep.subr.bf16.mxu1 %v3065_v23 }
0x10ab   :  { %5033 = vmatpush3.bf16.msra.mxu1 %v3065_v23  ;;  %v71_v23 = vld [vmem:[%s6682_s8 + $0xd8] sm:$0xff] }
0x10ac   :  { %v3166_v27 = vpop.permute.xlu1 %3165 }
0x10ae   :  { %5035 = vmatmul.mubr.msk.bf16.vlgmr.msra.gmra.mrb[60].mxu1 %vm234_vm0, %v5325_v34  ;;  %v3171_v9 = vpop.permute.xlu0 %3170 }
0x10af   :  { %5038 = vmatprep.mubr.msk.bf16.mxu1 %vm234_vm0, %v5326_v60 }
0x10b0   :  { %v3176_v10 = vpop.permute.xlu1 %3175 }
0x10b2   :  { %v3181_v59 = vpop.permute.xlu0 %3180 }
0x10b4   :  { %v3186_v3 = vpop.permute.xlu1 %3185 }
0x10b6   :  { %5039 = vmatmul.mubr.msk.bf16.gmra.mrb[64].mxu1 %vm234_vm0, %v5327_v62  ;;  %v3191_v38 = vpop.permute.xlu0 %3190 }
0x10b8   :  { %v3196_v40 = vpop.permute.xlu1 %3195 }
0x10ba   :  { %v3201_v44 = vpop.permute.xlu0 %3200 }
0x1181   :  { %v5036_v56 = vpop.f32.mrb[60].mxu1 }
0x1182   :  { %v3205_v12 = vadd.f32 %v5036_v56, %v3176_v10  ;;  %v3132_v17 = vpop.f32.mrb[61].mxu1 }
0x1183   :  { %v3203_v21 = vadd.f32 %v3166_v27, %v3132_v17  ;;  %v5037_v22 = vpop.f32.mrb[62].mxu1 }
0x1184   :  { %v3215_v25 = vmul.f32 1.442695, %v3205_v12  ;;  %v6380_v26 = vadd.f32 %v3205_v12, %v6246_v8  ;;  %v3206_v61 = vadd.f32 %v5037_v22, %v3181_v59  ;;  %v3135_v28 = vpop.f32.mrb[63].mxu1 }
0x1185   :  { %v3211_v20 = vmul.f32 1.442695, %v3203_v21  ;;  %v6383_v29 = vadd.f32 %v3203_v21, %v6249_v11  ;;  %v3204_v32 = vadd.f32 %v3171_v9, %v3135_v28 }
0x1186   :  { %5380 = vpow2.f32 %v3215_v25  ;;  %v3217_v0 = vmul.f32 1.442695, %v3206_v61  ;;  %v6386_v33 = vadd.f32 %v3206_v61, %v6252_v15 }
0x1187   :  { %5382 = vpow2.f32 %v3211_v20  ;;  %v3213_v35 = vmul.f32 1.442695, %v3204_v32  ;;  %v6389_v36 = vadd.f32 %v3204_v32, %v6255_v18  ;;  %v5329_v32 = vld [vmem:[%s6680_s6 + $0x68] sm:$0xff]  }
0x1188   :  { %5384 = vpow2.f32 %v3217_v0 }
0x1189   :  { %5386 = vpow2.f32 %v3213_v35  ;;  %v5040_v8 = vpop.f32.mrb[64].mxu1 }
0x118a   :  { %v3148_v31 = vpop.f32.mrb[65].mxu1  ;;  %v3209_v42 = vadd.f32 %v5040_v8, %v3196_v40 }
0x118b   :  { %v5041_v37 = vpop.f32.mrb[66].mxu1  ;;  %v3207_v45 = vadd.f32 %v3186_v3, %v3148_v31 }
0x118c   :  { %v3151_v11 = vpop.f32.mrb[67].mxu1  ;;  %v3210_v50 = vadd.f32 %v5041_v37, %v3201_v44 }
0x118d   :  { %v3208_v48 = vadd.f32 %v3191_v38, %v3151_v11 }
0x1190   :  { %v5381_v15 = vpop.eup %5380 }
0x1191   :  { %v5383_v41 = vpop.eup %5382  ;;  %v3221_v18 = vmul.f32 %v5381_v15, %v2927_v24 }
0x1192   :  { %v5385_v43 = vpop.eup %5384  ;;  %v3219_v4 = vmul.f32 %v5383_v41, %v2917_v6 }
0x1193   :  { %v5387_v63 = vpop.eup %5386  ;;  %v3225_v1 = vadd.f32 %v3221_v18, %v3209_v42  ;;  %v3222_v46 = vmul.f32 %v5385_v43, %v5005_v7 }
0x1194   :  { %v3223_v47 = vadd.f32 %v3219_v4, %v3207_v45  ;;  %v3220_v49 = vmul.f32 %v5387_v63, %v5002_v5 }
0x1195   :  { %v3226_v52 = vadd.f32 %v3222_v46, %v3210_v50 }
0x1196   :  { %v3224_v53 = vadd.f32 %v3220_v49, %v3208_v48  ;;  %3231 = vrot.lane.b32.xlu1 %v3223_v47, %s5432_s25  ;;  %v5330_v48 = vld [vmem:[%s6683_s9 + $0xc0] sm:$0xff]   ;;  %v4404_v49 = vld [vmem:[%s6684_s10 + $0x188] sm:$0xff] }
0x1197   :  { %v3258_v13 = vpack.c.bf16 %v3226_v52, %v3225_v1  ;;  %5084 = vmatprep.mubr.msk.bf16.mxu1 %vm234_vm0, %v5330_v48 }
0x1198   :  { %v3257_v54 = vpack.c.bf16 %v3224_v53, %v3223_v47  ;;  %3233 = vrot.lane.b32.xlu0 %v3224_v53, %s5432_s25 }
0x119a   :  { %3235 = vrot.lane.b32.xlu1 %v3225_v1, %s5432_s25  ;;  %5191 = vmatprep.subr.bf16.mxu0 %v3257_v54 }
0x119b   :  { %5193 = vmatpush3.bf16.msra.mxu0 %v3257_v54 }
0x119c   :  { %3237 = vrot.lane.b32.xlu0 %v3226_v52, %s5432_s25  ;;  %5195 = vmatprep.subr.bf16.mxu0 %v3258_v13 }
0x119e   :  { %3243 = vrot.lane.b32.xlu1 %v3223_v47, %s5433_s19  ;;  %v4403_v47 = vld [vmem:[%s6684_s10 + $0x180] sm:$0xff] }
0x119f   :  { %5197 = vmatpush3.bf16.msra.mxu0 %v3258_v13 }
0x11a0   :  { %3245 = vrot.lane.b32.xlu0 %v3224_v53, %s5433_s19  ;;  %v4406_v53 = vld [vmem:[%s6684_s10 + $0x198] sm:$0xff] }
0x11a2   :  { %3247 = vrot.lane.b32.xlu1 %v3225_v1, %s5433_s19  ;;  %5051 = vmatmul.mubr.msk.f32.vlgmr.msra.gmra.mrb[36].mxu0 %vm706_vm1, %v4388_v16  ;;  %v4409_v16 = vld [vmem:[%s6684_s10 + $0x1b0] sm:$0xff] }
0x11a3   :  { %5053 = vmatprep.mubr.msk.f32.mxu0 %vm706_vm1, %v4389_v2  ;;  %v4410_v2 = vld [vmem:[%s6684_s10 + $0x1b8] sm:$0xff] }
0x11a4   :  { %3249 = vrot.lane.b32.xlu0 %v3226_v52, %s5433_s19  ;;  %v4405_v52 = vld [vmem:[%s6684_s10 + $0x190] sm:$0xff] }
0x11a6   :  { %566 = vperm.xlu1 %5275, %v68_v55   ;;  %5054 = vmatmul.mubr.msk.f32.gmra.mrb[38].mxu0 %vm706_vm1, %v4390_v19 }
0x11a7   :  { %5068 = vmatprep.mubr.msk.bf16.mxu0 %vm234_vm0, %v5328_v30 }
0x11a8   :  { %571 = vperm.xlu0 %5274, %v69_v14  }
0x11aa   :  { %576 = vperm.xlu1 %5275, %v70_v58  }
0x11ac   :  { %581 = vperm.xlu0 %5274, %v71_v23  }
0x1208   :  { %v3232_v34 = vpop.permute.xlu1 %3231 }
0x1209   :  { %v3239_v62 = vmul.f32 %v6288_v51, %v3232_v34 }
0x120a   :  { %v3234_v60 = vpop.permute.xlu0 %3233 }
0x120b   :  { %v3240_v5 = vmul.f32 %v6288_v51, %v3234_v60 }
0x120c   :  { %v3236_v6 = vpop.permute.xlu1 %3235 }
0x120d   :  { %v3255_v7 = vpack.c.bf16 %v3240_v5, %v3239_v62  ;;  %v3241_v27 = vmul.f32 %v6288_v51, %v3236_v6 }
0x120e   :  { %v3238_v24 = vpop.permute.xlu0 %3237 }
0x120f   :  { %v3242_v9 = vmul.f32 %v6288_v51, %v3238_v24  ;;  %5056 = vmatprep.subr.bf16.mxu0 %v3255_v7 }
0x1210   :  { %5057 = vmatpush3.bf16.msra.mxu0 %v3255_v7  ;;  %v3244_v12 = vpop.permute.xlu1 %3243 }
0x1211   :  { %v3256_v10 = vpack.c.bf16 %v3242_v9, %v3241_v27  ;;  %v3251_v21 = vmul.f32 %v6297_v57, %v3244_v12 }
0x1212   :  { %v3246_v56 = vpop.permute.xlu0 %3245 }
0x1213   :  { %5058 = vmatprep.subr.bf16.mxu0 %v3256_v10  ;;  %v3252_v17 = vmul.f32 %v6297_v57, %v3246_v56 }
0x1214   :  { %5059 = vmatpush3.bf16.msra.mxu0 %v3256_v10  ;;  %v3248_v22 = vpop.permute.xlu1 %3247 }
0x1215   :  { %5060 = vmatprep.subr.bf16.mxu0 %v3257_v54  ;;  %v3259_v25 = vpack.c.bf16 %v3252_v17, %v3251_v21  ;;  %v3253_v28 = vmul.f32 %v6297_v57, %v3248_v22  ;;  %v5331_v21 = vld [vmem:[%s6683_s9 + $0xc8] sm:$0xff]   ;;  %v5332_v22 = vld [vmem:[%s6683_s9 + $0xd0] sm:$0xff]  }
0x1216   :  { %v3250_v59 = vpop.permute.xlu0 %3249 }
0x1217   :  { %v3254_v61 = vmul.f32 %v6297_v57, %v3250_v59 }
0x1218   :  { %5061 = vmatpush3.bf16.msra.mxu0 %v3257_v54  ;;  %v4408_v54 = vld [vmem:[%s6684_s10 + $0x1a8] sm:$0xff] }
0x1219   :  { %5062 = vmatprep.subr.bf16.mxu0 %v3258_v13  ;;  %v3260_v20 = vpack.c.bf16 %v3254_v61, %v3253_v28 }
0x121c   :  { %5063 = vmatpush3.bf16.msra.mxu0 %v3258_v13  ;;  %v4407_v13 = vld [vmem:[%s6684_s10 + $0x1a0] sm:$0xff] }
0x121d   :  { %5064 = vmatprep.subr.bf16.mxu0 %v3259_v25 }
0x1220   :  { %5065 = vmatpush3.bf16.msra.mxu0 %v3259_v25  ;;  %v5333_v25 = vld [vmem:[%s6683_s9 + $0xd8] sm:$0xff]  }
0x1221   :  { %5066 = vmatprep.subr.bf16.mxu0 %v3260_v20 }
0x1224   :  { %5067 = vmatpush3.bf16.msra.mxu0 %v3260_v20 }
0x1225   :  { %v567_v31 = vpop.permute.xlu1 %566 }
0x1227   :  { %5069 = vmatmul.mubr.msk.bf16.vlgmr.msra.gmra.mrb[24].mxu0 %vm234_vm0, %v5329_v32  ;;  %v572_v37 = vpop.permute.xlu0 %571 }
0x1229   :  { %v577_v38 = vpop.permute.xlu1 %576 }
0x122b   :  { %v582_v40 = vpop.permute.xlu0 %581 }
0x1275   :  { %v6443_v0 = vpop.f32.mrb[36].mxu0 }
0x1276   :  { %v6445_v35 = vpop.f32.mrb[37].mxu0 }
0x1279   :  { %v6447_v8 = vpop.f32.mrb[38].mxu0 }
0x127a   :  { %v6449_v3 = vpop.f32.mrb[39].mxu0 }
0x12fa   :  { %v5070_v11 = vpop.f32.mrb[24].mxu0 }
0x12fb   :  { %v5230_v39 = vadd.f32 %v5070_v11, %v577_v38  ;;  %v3422_v15 = vpop.f32.mrb[25].mxu0 }
0x12fc   :  { %v5231_v41 = vadd.f32 %v3422_v15, %v567_v31  ;;  %v5071_v42 = vpop.f32.mrb[26].mxu0 }
0x12fd   :  { %v5232_v18 = vadd.f32 %v5071_v42, %v582_v40  ;;  %v3425_v43 = vpop.f32.mrb[27].mxu0  ;;  %v3443_v4 = vmax.f32 %v5230_v39, 0.0 }
0x12fe   :  { %v3441_v44 = vmax.f32 %v5231_v41, 0.0  ;;  %v5233_v45 = vadd.f32 %v3425_v43, %v572_v37 }
0x12ff   :  { %v3444_v63 = vmax.f32 %v5232_v18, 0.0 }
0x1300   :  { %v3442_v1 = vmax.f32 %v5233_v45, 0.0  ;;  %3463 = vrot.lane.b32.xlu1 %v3441_v44, %s5432_s25 }
0x1301   :  { %v3490_v50 = vpack.c.bf16 %v3444_v63, %v3443_v4 }
0x1302   :  { %3465 = vrot.lane.b32.xlu0 %v3442_v1, %s5432_s25  ;;  %v3489_v46 = vpack.c.bf16 %v3442_v1, %v3441_v44 }
0x1304   :  { %3467 = vrot.lane.b32.xlu1 %v3443_v4, %s5432_s25 }
0x1306   :  { %3469 = vrot.lane.b32.xlu0 %v3444_v63, %s5432_s25 }
0x1308   :  { %3475 = vrot.lane.b32.xlu1 %v3441_v44, %s5433_s19 }
0x130a   :  { %3477 = vrot.lane.b32.xlu0 %v3442_v1, %s5433_s19 }
0x130c   :  { %3479 = vrot.lane.b32.xlu1 %v3443_v4, %s5433_s19 }
0x130e   :  { %3481 = vrot.lane.b32.xlu0 %v3444_v63, %s5433_s19 }
0x1310   :  { %3592 = vperm.xlu1 %5275, %v4403_v47  }
0x1312   :  { %3597 = vperm.xlu0 %5274, %v4404_v49   ;;  %v4427_v49 = vld [vmem:[%s6679_s5 + $0xe0] sm:$0xff] }
0x1313   :  { %5100 = vmatprep.mubr.msk.f32.mxu0 %vm706_vm1, %v4427_v49 }
0x1314   :  { %3602 = vperm.xlu1 %5275, %v4405_v52  }
0x1316   :  { %3607 = vperm.xlu0 %5274, %v4406_v53  }
0x1318   :  { %3612 = vperm.xlu1 %5275, %v4407_v13  }
0x131a   :  { %3617 = vperm.xlu0 %5274, %v4408_v54  }
0x131c   :  { %3622 = vperm.xlu1 %5275, %v4409_v16  }
0x131e   :  { %3627 = vperm.xlu0 %5274, %v4410_v2  }
0x1372   :  { %v3464_v55 = vpop.permute.xlu1 %3463 }
0x1373   :  { %v3471_v30 = vmul.f32 %v6288_v51, %v3464_v55 }
0x1374   :  { %v3466_v19 = vpop.permute.xlu0 %3465 }
0x1375   :  { %v3472_v14 = vmul.f32 %v6288_v51, %v3466_v19 }
0x1376   :  { %v3468_v58 = vpop.permute.xlu1 %3467 }
0x1377   :  { %v3487_v23 = vpack.c.bf16 %v3472_v14, %v3471_v30  ;;  %v3473_v60 = vmul.f32 %v6288_v51, %v3468_v58 }
0x1378   :  { %v3470_v34 = vpop.permute.xlu0 %3469 }
0x1379   :  { %v3474_v62 = vmul.f32 %v6288_v51, %v3470_v34  ;;  %5072 = vmatprep.subr.bf16.mxu1 %v3487_v23 }
0x137a   :  { %5073 = vmatpush3.bf16.msra.mxu1 %v3487_v23  ;;  %v3476_v7 = vpop.permute.xlu1 %3475 }
0x137b   :  { %v3488_v5 = vpack.c.bf16 %v3474_v62, %v3473_v60  ;;  %v3483_v9 = vmul.f32 %v6297_v57, %v3476_v7  ;;  %v4430_v7 = vld [vmem:[%s6679_s5 + $0xf8] sm:$0xff] }
0x137c   :  { %v3478_v6 = vpop.permute.xlu0 %3477 }
0x137d   :  { %5074 = vmatprep.subr.bf16.mxu1 %v3488_v5  ;;  %v3484_v24 = vmul.f32 %v6297_v57, %v3478_v6 }
0x137e   :  { %5075 = vmatpush3.bf16.msra.mxu1 %v3488_v5  ;;  %v3480_v10 = vpop.permute.xlu1 %3479 }
0x137f   :  { %5076 = vmatprep.subr.bf16.mxu1 %v3489_v46  ;;  %v3491_v56 = vpack.c.bf16 %v3484_v24, %v3483_v9  ;;  %v3485_v17 = vmul.f32 %v6297_v57, %v3480_v10  ;;  %v5334_v24 = vld [vmem:[%s6680_s6 + $0x70] sm:$0xff]   ;;  %v75_v10 = vld [vmem:[%s6682_s8 + $0xf8] sm:$0xff] }
0x1380   :  { %v3482_v27 = vpop.permute.xlu0 %3481  ;;  %v74_v9 = vld [vmem:[%s6682_s8 + $0xf0] sm:$0xff] }
0x1381   :  { %v3486_v12 = vmul.f32 %v6297_v57, %v3482_v27  ;;  %v73_v27 = vld [vmem:[%s6682_s8 + $0xe8] sm:$0xff] }
0x1382   :  { %5077 = vmatpush3.bf16.msra.mxu1 %v3489_v46 }
0x1383   :  { %5078 = vmatprep.subr.bf16.mxu1 %v3490_v50  ;;  %v3492_v59 = vpack.c.bf16 %v3486_v12, %v3485_v17 }
0x1386   :  { %5079 = vmatpush3.bf16.msra.mxu1 %v3490_v50 }
0x1387   :  { %5080 = vmatprep.subr.bf16.mxu1 %v3491_v56 }
0x138a   :  { %5081 = vmatpush3.bf16.msra.mxu1 %v3491_v56 }
0x138b   :  { %5082 = vmatprep.subr.bf16.mxu1 %v3492_v59 }
0x138e   :  { %5083 = vmatpush3.bf16.msra.mxu1 %v3492_v59 }
0x138f   :  { %v3593_v61 = vpop.permute.xlu1 %3592 }
0x1391   :  { %5085 = vmatmul.mubr.msk.bf16.vlgmr.msra.gmra.mrb[68].mxu1 %vm234_vm0, %v5331_v21  ;;  %v3598_v28 = vpop.permute.xlu0 %3597 }
0x1392   :  { %5088 = vmatprep.mubr.msk.bf16.mxu1 %vm234_vm0, %v5332_v22 }
0x1393   :  { %v3603_v20 = vpop.permute.xlu1 %3602 }
0x1395   :  { %v3608_v38 = vpop.permute.xlu0 %3607 }
0x1397   :  { %v3613_v50 = vpop.permute.xlu1 %3612 }
0x1399   :  { %5089 = vmatmul.mubr.msk.bf16.gmra.mrb[72].mxu1 %vm234_vm0, %v5333_v25  ;;  %v3618_v48 = vpop.permute.xlu0 %3617 }
0x139b   :  { %v3623_v52 = vpop.permute.xlu1 %3622 }
0x139d   :  { %v3628_v16 = vpop.permute.xlu0 %3627 }
0x1464   :  { %v5086_v32 = vpop.f32.mrb[68].mxu1 }
0x1465   :  { %v3632_v31 = vadd.f32 %v5086_v32, %v3603_v20  ;;  %v3559_v37 = vpop.f32.mrb[69].mxu1 }
0x1466   :  { %v3630_v11 = vadd.f32 %v3593_v61, %v3559_v37  ;;  %v5087_v39 = vpop.f32.mrb[70].mxu1 }
0x1467   :  { %v3642_v15 = vmul.f32 1.442695, %v3632_v31  ;;  %v6508_v40 = vadd.f32 %v3632_v31, %v6380_v26  ;;  %v3633_v41 = vadd.f32 %v5087_v39, %v3608_v38  ;;  %v3562_v42 = vpop.f32.mrb[71].mxu1 }
0x1468   :  { %v3638_v18 = vmul.f32 1.442695, %v3630_v11  ;;  %v6511_v43 = vadd.f32 %v3630_v11, %v6383_v29  ;;  %v3631_v44 = vadd.f32 %v3598_v28, %v3562_v42 }
0x1469   :  { %5388 = vpow2.f32 %v3642_v15  ;;  %v3644_v45 = vmul.f32 1.442695, %v3633_v41  ;;  %v6514_v4 = vadd.f32 %v3633_v41, %v6386_v33 }
0x146a   :  { %5390 = vpow2.f32 %v3638_v18  ;;  %v3640_v63 = vmul.f32 1.442695, %v3631_v44  ;;  %v6517_v1 = vadd.f32 %v3631_v44, %v6389_v36  ;;  %v5335_v44 = vld [vmem:[%s6680_s6 + $0x78] sm:$0xff]  }
0x146b   :  { %5392 = vpow2.f32 %v3644_v45 }
0x146c   :  { %5394 = vpow2.f32 %v3640_v63  ;;  %v5090_v26 = vpop.f32.mrb[72].mxu1 }
0x146d   :  { %v3575_v46 = vpop.f32.mrb[73].mxu1  ;;  %v3636_v13 = vadd.f32 %v5090_v26, %v3623_v52 }
0x146e   :  { %v5091_v47 = vpop.f32.mrb[74].mxu1  ;;  %v3634_v2 = vadd.f32 %v3613_v50, %v3575_v46 }
0x146f   :  { %v3578_v29 = vpop.f32.mrb[75].mxu1  ;;  %v3637_v14 = vadd.f32 %v5091_v47, %v3628_v16 }
0x1470   :  { %v3635_v34 = vadd.f32 %v3618_v48, %v3578_v29 }
0x1473   :  { %v5389_v33 = vpop.eup %5388 }
0x1474   :  { %v5391_v53 = vpop.eup %5390  ;;  %v3648_v36 = vmul.f32 %v5389_v33, %v6449_v3 }
0x1475   :  { %v5393_v54 = vpop.eup %5392  ;;  %v3646_v55 = vmul.f32 %v5391_v53, %v6445_v35  ;;  %v4429_v35 = vld [vmem:[%s6679_s5 + $0xf0] sm:$0xff] }
0x1476   :  { %v5395_v19 = vpop.eup %5394  ;;  %v3652_v30 = vadd.f32 %v3648_v36, %v3636_v13  ;;  %v3649_v58 = vmul.f32 %v5393_v54, %v6447_v8  ;;  %v72_v8 = vld [vmem:[%s6682_s8 + $0xe0] sm:$0xff] }
0x1477   :  { %v3650_v23 = vadd.f32 %v3646_v55, %v3634_v2  ;;  %v3647_v60 = vmul.f32 %v5395_v19, %v6443_v0  ;;  %v4428_v0 = vld [vmem:[%s6679_s5 + $0xe8] sm:$0xff] }
0x1478   :  { %v3653_v62 = vadd.f32 %v3649_v58, %v3637_v14 }
0x1479   :  { %v3651_v5 = vadd.f32 %v3647_v60, %v3635_v34  ;;  %3658 = vrot.lane.b32.xlu1 %v3650_v23, %s5432_s25  ;;  %v5336_v34 = vld [vmem:[%s6683_s9 + $0xe0] sm:$0xff]   ;;  %v4444_v60 = vld [vmem:[%s6684_s10 + $0x1c8] sm:$0xff] }
0x147a   :  { %v3685_v6 = vpack.c.bf16 %v3653_v62, %v3652_v30  ;;  %5134 = vmatprep.mubr.msk.bf16.mxu1 %vm234_vm0, %v5336_v34 }
0x147b   :  { %v3684_v3 = vpack.c.bf16 %v3651_v5, %v3650_v23  ;;  %3660 = vrot.lane.b32.xlu0 %v3651_v5, %s5432_s25 }
0x147d   :  { %3662 = vrot.lane.b32.xlu1 %v3652_v30, %s5432_s25  ;;  %5199 = vmatprep.subr.bf16.mxu0 %v3684_v3 }
0x147e   :  { %5201 = vmatpush3.bf16.msra.mxu0 %v3684_v3 }
0x147f   :  { %3664 = vrot.lane.b32.xlu0 %v3653_v62, %s5432_s25  ;;  %5203 = vmatprep.subr.bf16.mxu0 %v3685_v6 }
0x1481   :  { %3670 = vrot.lane.b32.xlu1 %v3650_v23, %s5433_s19  ;;  %v4443_v23 = vld [vmem:[%s6684_s10 + $0x1c0] sm:$0xff] }
0x1482   :  { %5205 = vmatpush3.bf16.msra.mxu0 %v3685_v6 }
0x1483   :  { %3672 = vrot.lane.b32.xlu0 %v3651_v5, %s5433_s19  ;;  %v4446_v5 = vld [vmem:[%s6684_s10 + $0x1d8] sm:$0xff] }
0x1485   :  { %3674 = vrot.lane.b32.xlu1 %v3652_v30, %s5433_s19  ;;  %5101 = vmatmul.mubr.msk.f32.vlgmr.msra.gmra.mrb[40].mxu0 %vm706_vm1, %v4428_v0 }
0x1486   :  { %5103 = vmatprep.mubr.msk.f32.mxu0 %vm706_vm1, %v4429_v35 }
0x1487   :  { %3676 = vrot.lane.b32.xlu0 %v3653_v62, %s5433_s19  ;;  %v4445_v62 = vld [vmem:[%s6684_s10 + $0x1d0] sm:$0xff] }
0x1489   :  { %586 = vperm.xlu1 %5275, %v72_v8   ;;  %5104 = vmatmul.mubr.msk.f32.gmra.mrb[42].mxu0 %vm706_vm1, %v4430_v7 }
0x148a   :  { %5118 = vmatprep.mubr.msk.bf16.mxu0 %vm234_vm0, %v5334_v24 }
0x148b   :  { %591 = vperm.xlu0 %5274, %v73_v27  }
0x148d   :  { %596 = vperm.xlu1 %5275, %v74_v9  }
0x148f   :  { %601 = vperm.xlu0 %5274, %v75_v10  }
0x14eb   :  { %v3659_v56 = vpop.permute.xlu1 %3658 }
0x14ec   :  { %v3666_v17 = vmul.f32 %v6288_v51, %v3659_v56 }
0x14ed   :  { %v3661_v12 = vpop.permute.xlu0 %3660 }
0x14ee   :  { %v3667_v59 = vmul.f32 %v6288_v51, %v3661_v12 }
0x14ef   :  { %v3663_v21 = vpop.permute.xlu1 %3662 }
0x14f0   :  { %v3682_v22 = vpack.c.bf16 %v3667_v59, %v3666_v17  ;;  %v3668_v61 = vmul.f32 %v6288_v51, %v3663_v21 }
0x14f1   :  { %v3665_v25 = vpop.permute.xlu0 %3664 }
0x14f2   :  { %v3669_v28 = vmul.f32 %v6288_v51, %v3665_v25  ;;  %5106 = vmatprep.subr.bf16.mxu0 %v3682_v22 }
0x14f3   :  { %5107 = vmatpush3.bf16.msra.mxu0 %v3682_v22  ;;  %v3671_v31 = vpop.permute.xlu1 %3670 }
0x14f4   :  { %v3683_v20 = vpack.c.bf16 %v3669_v28, %v3668_v61  ;;  %v3678_v11 = vmul.f32 %v6297_v57, %v3671_v31  ;;  %v5337_v31 = vld [vmem:[%s6683_s9 + $0xe8] sm:$0xff]  }
0x14f5   :  { %v3673_v32 = vpop.permute.xlu0 %3672 }
0x14f6   :  { %5108 = vmatprep.subr.bf16.mxu0 %v3683_v20  ;;  %v3679_v37 = vmul.f32 %v6297_v57, %v3673_v32 }
0x14f7   :  { %5109 = vmatpush3.bf16.msra.mxu0 %v3683_v20  ;;  %v3675_v39 = vpop.permute.xlu1 %3674 }
0x14f8   :  { %5110 = vmatprep.subr.bf16.mxu0 %v3684_v3  ;;  %v3686_v15 = vpack.c.bf16 %v3679_v37, %v3678_v11  ;;  %v3680_v42 = vmul.f32 %v6297_v57, %v3675_v39  ;;  %v5338_v37 = vld [vmem:[%s6683_s9 + $0xf0] sm:$0xff]  }
0x14f9   :  { %v3677_v38 = vpop.permute.xlu0 %3676 }
0x14fa   :  { %v3681_v41 = vmul.f32 %v6297_v57, %v3677_v38 }
0x14fb   :  { %5111 = vmatpush3.bf16.msra.mxu0 %v3684_v3  ;;  %v4447_v3 = vld [vmem:[%s6684_s10 + $0x1e0] sm:$0xff] }
0x14fc   :  { %5112 = vmatprep.subr.bf16.mxu0 %v3685_v6  ;;  %v3687_v18 = vpack.c.bf16 %v3681_v41, %v3680_v42 }
0x14ff   :  { %5113 = vmatpush3.bf16.msra.mxu0 %v3685_v6  ;;  %v4448_v6 = vld [vmem:[%s6684_s10 + $0x1e8] sm:$0xff] }
0x1500   :  { %5114 = vmatprep.subr.bf16.mxu0 %v3686_v15 }
0x1503   :  { %5115 = vmatpush3.bf16.msra.mxu0 %v3686_v15 }
0x1504   :  { %5116 = vmatprep.subr.bf16.mxu0 %v3687_v18 }
0x1507   :  { %5117 = vmatpush3.bf16.msra.mxu0 %v3687_v18 }
0x1508   :  { %v587_v46 = vpop.permute.xlu1 %586 }
0x150a   :  { %5119 = vmatmul.mubr.msk.bf16.vlgmr.msra.gmra.mrb[28].mxu0 %vm234_vm0, %v5335_v44  ;;  %v592_v47 = vpop.permute.xlu0 %591 }
0x150c   :  { %v597_v48 = vpop.permute.xlu1 %596 }
0x150e   :  { %v602_v52 = vpop.permute.xlu0 %601 }
0x1558   :  { %v6575_v45 = vpop.f32.mrb[40].mxu0 }
0x1559   :  { %v6577_v63 = vpop.f32.mrb[41].mxu0 }
0x155c   :  { %v6579_v26 = vpop.f32.mrb[42].mxu0 }
0x155d   :  { %v6581_v50 = vpop.f32.mrb[43].mxu0 }
0x15dd   :  { %v5120_v29 = vpop.f32.mrb[28].mxu0 }
0x15de   :  { %v5234_v49 = vadd.f32 %v5120_v29, %v597_v48  ;;  %v3849_v33 = vpop.f32.mrb[29].mxu0 }
0x15df   :  { %v5235_v53 = vadd.f32 %v3849_v33, %v587_v46  ;;  %v5121_v13 = vpop.f32.mrb[30].mxu0 }
0x15e0   :  { %v5236_v36 = vadd.f32 %v5121_v13, %v602_v52  ;;  %v3852_v54 = vpop.f32.mrb[31].mxu0  ;;  %v3870_v55 = vmax.f32 %v5234_v49, 0.0 }
0x15e1   :  { %v3868_v16 = vmax.f32 %v5235_v53, 0.0  ;;  %v5237_v2 = vadd.f32 %v3852_v54, %v592_v47  ;;  %v4467_v47 = vld [vmem:[%s6678_s4] ss:$0 sm:$0xff] }
0x15e2   :  { %v3871_v19 = vmax.f32 %v5236_v36, 0.0 }
0x15e3   :  { %v3869_v30 = vmax.f32 %v5237_v2, 0.0  ;;  %3890 = vrot.lane.b32.xlu1 %v3868_v16, %s5432_s25 }
0x15e4   :  { %v3917_v14 = vpack.c.bf16 %v3871_v19, %v3870_v55 }
0x15e5   :  { %3892 = vrot.lane.b32.xlu0 %v3869_v30, %s5432_s25  ;;  %v3916_v58 = vpack.c.bf16 %v3869_v30, %v3868_v16 }
0x15e7   :  { %3894 = vrot.lane.b32.xlu1 %v3870_v55, %s5432_s25 }
0x15e9   :  { %3896 = vrot.lane.b32.xlu0 %v3871_v19, %s5432_s25  ;;  %s4127_s25 = sshll.u32 %s5435_s24, 4  ;;  %s4128_s25 = int_to_ptr.vmem [resolvable:$true] %s4127_s25 }
0x15ea   :  { %s5408_s26 = scalar_lea.vmem %s4128_s25, 16  ;;  %s5412_s27 = scalar_lea.vmem %s4128_s25, 32 }
0x15eb   :  { %3902 = vrot.lane.b32.xlu1 %v3868_v16, %s5433_s19  ;;  %p5409_p0 = scmp.ne.s32.totalorder %s4128_s25, %s5408_s26  ;;  %p5413_p1 = scmp.lt.s32.totalorder %s4128_s25, %s4128_s25 }
0x15ec   :  { %p5414_p2 = scmp.lt.s32.totalorder %s5412_s27, %s5408_s26 }
0x15ed   :  { %3904 = vrot.lane.b32.xlu0 %v3869_v30, %s5433_s19 }
0x15ee   :  { %p5415_p3 = por %p5414_p2, %p5413_p1 }
0x15ef   :  { %3906 = vrot.lane.b32.xlu1 %v3870_v55, %s5433_s19 }
0x15f0   :  { %p5416_p4 = pnand %p5415_p3, %p5409_p0 }
0x15f1   :  { %3908 = vrot.lane.b32.xlu0 %v3871_v19, %s5433_s19 }
0x15f3   :  { %4019 = vperm.xlu1 %5275, %v4443_v23  }
0x15f5   :  { %4024 = vperm.xlu0 %5274, %v4444_v60  }
0x15f7   :  { %4029 = vperm.xlu1 %5275, %v4445_v62  }
0x15f9   :  { %4034 = vperm.xlu0 %5274, %v4446_v5  }
0x15fb   :  { %4044 = vperm.xlu1 %5275, %v4448_v6  }
0x15fd   :  { %4039 = vperm.xlu0 %5274, %v4447_v3  }
0x1655   :  { %v3891_v0 = vpop.permute.xlu1 %3890 }
0x1656   :  { %v3898_v8 = vmul.f32 %v6288_v51, %v3891_v0 }
0x1657   :  { %v3893_v35 = vpop.permute.xlu0 %3892 }
0x1658   :  { %v3899_v7 = vmul.f32 %v6288_v51, %v3893_v35 }
0x1659   :  { %v3895_v24 = vpop.permute.xlu1 %3894 }
0x165a   :  { %v3914_v27 = vpack.c.bf16 %v3899_v7, %v3898_v8  ;;  %v3900_v10 = vmul.f32 %v6288_v51, %v3895_v24 }
0x165b   :  { %v3897_v9 = vpop.permute.xlu0 %3896 }
0x165c   :  { %v3901_v56 = vmul.f32 %v6288_v51, %v3897_v9  ;;  %5122 = vmatprep.subr.bf16.mxu1 %v3914_v27 }
0x165d   :  { %5123 = vmatpush3.bf16.msra.mxu1 %v3914_v27  ;;  %v3903_v59 = vpop.permute.xlu1 %3902 }
0x165e   :  { %v3915_v12 = vpack.c.bf16 %v3901_v56, %v3900_v10  ;;  %v3910_v25 = vmul.f32 %v6297_v57, %v3903_v59 }
0x165f   :  { %v3905_v17 = vpop.permute.xlu0 %3904 }
0x1660   :  { %5124 = vmatprep.subr.bf16.mxu1 %v3915_v12  ;;  %v3911_v21 = vmul.f32 %v6297_v57, %v3905_v17 }
0x1661   :  { %5125 = vmatpush3.bf16.msra.mxu1 %v3915_v12  ;;  %v3907_v61 = vpop.permute.xlu1 %3906 }
0x1662   :  { %5126 = vmatprep.subr.bf16.mxu1 %v3916_v58  ;;  %v3918_v28 = vpack.c.bf16 %v3911_v21, %v3910_v25  ;;  %v3912_v51 = vmul.f32 %v6297_v57, %v3907_v61 }
0x1663   :  { %v3909_v22 = vpop.permute.xlu0 %3908 }
0x1664   :  { %v3913_v20 = vmul.f32 %v6297_v57, %v3909_v22  ;;  %v5339_v57 = vld [vmem:[%s6683_s9 + $0xf8] sm:$0xff]  }
0x1665   :  { %5127 = vmatpush3.bf16.msra.mxu1 %v3916_v58 }
0x1666   :  { %5128 = vmatprep.subr.bf16.mxu1 %v3917_v14  ;;  %v3919_v32 = vpack.c.bf16 %v3913_v20, %v3912_v51 }
0x1669   :  { %5129 = vmatpush3.bf16.msra.mxu1 %v3917_v14 }
0x166a   :  { %5130 = vmatprep.subr.bf16.mxu1 %v3918_v28 }
0x166d   :  { %5131 = vmatpush3.bf16.msra.mxu1 %v3918_v28 }
0x166e   :  { %5132 = vmatprep.subr.bf16.mxu1 %v3919_v32 }
0x1671   :  { %5133 = vmatpush3.bf16.msra.mxu1 %v3919_v32 }
0x1672   :  { %v4020_v38 = vpop.permute.xlu1 %4019 }
0x1674   :  { %5135 = vmatmul.mubr.msk.bf16.vlgmr.msra.gmra.mrb[76].mxu1 %vm234_vm0, %v5337_v31  ;;  %v4025_v11 = vpop.permute.xlu0 %4024 }
0x1675   :  { %5138 = vmatprep.mubr.msk.bf16.mxu1 %vm234_vm0, %v5338_v37 }
0x1676   :  { %v4030_v39 = vpop.permute.xlu1 %4029 }
0x1678   :  { %v4035_v18 = vpop.permute.xlu0 %4034 }
0x167a   :  { %v4045_v0 = vpop.permute.xlu1 %4044 }
0x167c   :  { %5139 = vmatmul.mubr.msk.bf16.gmra.mrb[80].mxu1 %vm234_vm0, %v5339_v57  ;;  %v4040_v60 = vpop.permute.xlu0 %4039 }
0x1747   :  { %v5136_v15 = vpop.f32.mrb[76].mxu1 }
0x1748   :  { %v4059_v41 = vadd.f32 %v5136_v15, %v4030_v39  ;;  %v3986_v42 = vpop.f32.mrb[77].mxu1 }
0x1749   :  { %v4057_v44 = vadd.f32 %v4020_v38, %v3986_v42  ;;  %v5137_v46 = vpop.f32.mrb[78].mxu1 }
0x174a   :  { %v4069_v48 = vmul.f32 1.442695, %v4059_v41  ;;  %v4083_v29 = vadd.f32 %v4059_v41, %v6508_v40  ;;  %v4060_v49 = vadd.f32 %v5137_v46, %v4035_v18  ;;  %v3989_v33 = vpop.f32.mrb[79].mxu1 }
0x174b   :  { %v4065_v52 = vmul.f32 1.442695, %v4057_v44  ;;  %v4081_v53 = vadd.f32 %v4057_v44, %v6511_v43  ;;  %v4058_v13 = vadd.f32 %v4025_v11, %v3989_v33 }
0x174c   :  { %5396 = vpow2.f32 %v4069_v48  ;;  %v4071_v36 = vmul.f32 1.442695, %v4060_v49  ;;  %v4084_v54 = vadd.f32 %v4060_v49, %v6514_v4  ;;  %v4098_v16 = vmul.f32 %v4467_v47, %v4083_v29 }
0x174d   :  { %5398 = vpow2.f32 %v4065_v52  ;;  %v4067_v2 = vmul.f32 1.442695, %v4058_v13  ;;  %v4082_v55 = vadd.f32 %v4058_v13, %v6517_v1  ;;  %v4096_v19 = vmul.f32 %v4467_v47, %v4081_v53 }
0x174e   :  { %5400 = vpow2.f32 %v4071_v36  ;;  %4104 = vadd.xlane.f32.xlu0 %v4098_v16  ;;  %v4099_v43 = vmul.f32 %v4467_v47, %v4084_v54 }
0x174f   :  { %5402 = vpow2.f32 %v4067_v2  ;;  %4100 = vadd.xlane.f32.xlu1 %v4096_v19  ;;  %v5140_v40 = vpop.f32.mrb[80].mxu1  ;;  %v4097_v30 = vmul.f32 %v4467_v47, %v4082_v55 }
0x1750   :  { %v4002_v14 = vpop.f32.mrb[81].mxu1 }
0x1751   :  { %v5141_v58 = vpop.f32.mrb[82].mxu1  ;;  %v4061_v1 = vadd.f32 %v4040_v60, %v4002_v14 }
0x1752   :  { %4102 = vadd.xlane.f32.xlu0 %v4097_v30  ;;  %v4005_v23 = vpop.f32.mrb[83].mxu1 }
0x1753   :  { %4106 = vadd.xlane.f32.xlu1 %v4099_v43  ;;  %v4062_v7 = vadd.f32 %v4045_v0, %v4005_v23 }
0x1756   :  { %v5397_v34 = vpop.eup %5396 }
0x1757   :  { %v5399_v4 = vpop.eup %5398  ;;  %v4075_v62 = vmul.f32 %v5397_v34, %v6581_v50 }
0x1758   :  { %v5401_v5 = vpop.eup %5400  ;;  %v4073_v6 = vmul.f32 %v5399_v4, %v6577_v63  ;;  %v4449_v63 = vld [vmem:[%s6684_s10 + $0x1f0] sm:$0xff] }
0x1759   :  { %v5403_v3 = vpop.eup %5402  ;;  %v4076_v35 = vmul.f32 %v5401_v5, %v6579_v26  ;;  %v4450_v26 = vld [vmem:[%s6684_s10 + $0x1f8] sm:$0xff] }
0x175a   :  { %v4077_v8 = vadd.f32 %v4073_v6, %v4061_v1  ;;  %v4074_v24 = vmul.f32 %v5403_v3, %v6575_v45 }
0x175c   :  { %4085 = vst [vmem:[%s6685_s11] sm:$0xff] %v4077_v8  ;;  %v4078_v27 = vadd.f32 %v4074_v24, %v4062_v7 }
0x175e   :  { %4086 = vst [vmem:[%s6685_s11 + $0x8] sm:$0xff] %v4078_v27 }
0x1764   :  { %4049 = vperm.xlu1 %5275, %v4449_v63  }
0x1768   :  { %4054 = vperm.xlu0 %5274, %v4450_v26  }
0x17db   :  { %v4105_v45 = vpop.xlane.xlu0 %4104 }
0x17dc   :  { %v4101_v50 = vpop.xlane.xlu1 %4100 }
0x17df   :  { %v4103_v9 = vpop.xlane.xlu0 %4102 }
0x17e0   :  { %v4108_v10 = vadd.f32 %v4103_v9, %v4101_v50  ;;  %v4107_v56 = vpop.xlane.xlu1 %4106 }
0x17e2   :  { %v4109_v12 = vadd.f32 %v4108_v10, %v4105_v45 }
0x17e4   :  { %v4110_v17 = vadd.f32 %v4109_v12, %v4107_v56  ;;  %v4050_v59 = vpop.permute.xlu1 %4049 }
0x17e5   :  { %v4063_v21 = vadd.f32 %v5140_v40, %v4050_v59 }
0x17e6   :  { %v4111_v22 = vrot.slane %v4110_v17, 4 }
0x17e7   :  { %v4079_v25 = vadd.f32 %v4075_v62, %v4063_v21  ;;  %v4055_v61 = vpop.permute.xlu0 %4054 }
0x17e8   :  { %v4112_v28 = vadd.f32 %v4111_v22, %v4110_v17  ;;  %v4064_v20 = vadd.f32 %v5141_v58, %v4055_v61 }
0x17e9   :  { %4087 = vst [vmem:[%s6685_s11 + $0x10] sm:$0xff] %v4079_v25 }
0x17ea   :  { %v4113_v51 = vrot.slane %v4112_v28, 2  ;;  %v4080_v32 = vadd.f32 %v4076_v35, %v4064_v20 }
0x17ec   :  { %v4114_v31 = vadd.f32 %v4113_v51, %v4112_v28  ;;  %4088 = vst [vmem:[%s6685_s11 + $0x18] sm:$0xff] %v4080_v32 }
0x17ee   :  { %v4115_v37 = vrot.slane %v4114_v31, 1 }
0x17f0   :  { %v4116_v57 = vadd.f32 %v4115_v37, %v4114_v31 }
0x17f2   :  { %4118 = vst.msk [vmem:[#allocation3] sm:$0x1] %vm4117_vm2, %v4116_v57 }
0x17f3   :  { %5419 = shalt.err (!%p5416_p4)
}
0x17f4   :  { %s5420_s28 = scalar_lea.hbm %s6686_s12, 16 }
0x17f5   :  { %p5421_p5 = scmp.ne.s32.totalorder %s6686_s12, %s5420_s28  ;;  %p5424_p6 = scmp.lt.u32.totalorder %s5420_s28, %s6686_s12 }
0x17f7   :  { %p5426_p7 = pnand %p5424_p6, %p5421_p5 }
0x17f9   :  { %5429 = shalt.err (!%p5426_p7)
}
0x17fa   :  { %4130 = dma.vmem_to_hbm [thread:$0]  %s4128_s25, 16, %s6686_s12, [#allocation4]  }
0x17fb   :  { %5430 = dma.done.wait [#allocation4], 16  }
0x17fc   :  { %5431 = vsyncadd [#allocation4], 4294967280 }
0x17fd   :  { %4136 = vsyncpa [#allocation4], 1 }

</bundles_post_ra>
